<compile_context>
chip_gen: v5e
topology: v5e:2x2
jax: 0.10.0
libtpu: 0.0.40
codegen_flags: <defaults>
</compile_context>

<pallas_src>
import jax
import jax.numpy as jnp
from jax.experimental import pallas as pl
from jax.experimental.pallas import tpu as pltpu


CFG = [64, (128, 2), 128]
IN_PLANES = 32
IMG_CH = 3


# ----------------------------- in-kernel helpers -----------------------------

def _shift2d(x, dh, dw):
    """result[i, j, :] = x[i + dh, j + dw, :], zero where out of range."""
    H, W, C = x.shape
    if dh == -1:
        x = jnp.concatenate([jnp.zeros((1, W, C), x.dtype), x[:H - 1]], axis=0)
    elif dh == 1:
        x = jnp.concatenate([x[1:], jnp.zeros((1, W, C), x.dtype)], axis=0)
    if dw == -1:
        x = jnp.concatenate([jnp.zeros((H, 1, C), x.dtype), x[:, :W - 1]], axis=1)
    elif dw == 1:
        x = jnp.concatenate([x[:, 1:], jnp.zeros((H, 1, C), x.dtype)], axis=1)
    return x


def _dw3x3(a, w_ref, b_ref):
    """Depthwise 3x3 (pad=1, stride=1) + shift + ReLU.  a: (H, W, C) f32."""
    H, W, C = a.shape
    acc = jnp.zeros((H, W, C), jnp.float32)
    for kh in range(3):
        for kw in range(3):
            acc = acc + _shift2d(a, kh - 1, kw - 1) * w_ref[kh, kw].astype(jnp.float32)
    return jnp.maximum(acc + b_ref[0].astype(jnp.float32), 0.0)


def _pw(a, w_ref, b_ref):
    """1x1 conv as an MXU matmul + shift + ReLU.  a: (H, W, Cin) f32."""
    H, W, Cin = a.shape
    Cout = w_ref.shape[-1]
    m = a.reshape(H * W, Cin)
    out = jnp.dot(m, w_ref[...].astype(jnp.float32),
                  preferred_element_type=jnp.float32)
    out = jnp.maximum(out + b_ref[0].astype(jnp.float32), 0.0)
    return out.reshape(H, W, Cout)


def _subsample2(a):
    """a[::2, ::2, :] built from static slices + concats (stays in-register)."""
    H, W, C = a.shape
    rows = jnp.concatenate([a[i:i + 1] for i in range(0, H, 2)], axis=0)
    return jnp.concatenate([rows[:, j:j + 1, :] for j in range(0, W, 2)], axis=1)


def _make_fused_kernel(strides):
    assert all(s in (1, 2) for s in strides), "only stride 1/2 blocks supported"

    def kernel(*refs):
        x_ref, o_ref = refs[0], refs[-1]
        w = refs[1:-1]   # conv1_w, conv1_b, then per block: dw_w, dw_b, pw_w, pw_b
        f32 = jnp.float32

        x = x_ref[0].astype(f32)                       # (H, W, Cin)
        H, W, Cin = x.shape
        w1, b1 = w[0], w[1]
        Cout1 = w1.shape[-1]

        # conv1: 3x3 pad=1 stride=1 as 9 per-tap MXU matmuls (BN scale folded).
        acc = jnp.zeros((H * W, Cout1), f32)
        for kh in range(3):
            for kw in range(3):
                patch = _shift2d(x, kh - 1, kw - 1).reshape(H * W, Cin)
                acc = acc + jnp.dot(patch, w1[kh, kw].astype(f32),
                                    preferred_element_type=f32)
        a = jnp.maximum(acc + b1[0].astype(f32), 0.0).reshape(H, W, Cout1)

        # depthwise-separable blocks, all VMEM-resident.
        idx = 2
        for s in strides:
            d = _dw3x3(a, w[idx], w[idx + 1])
            if s == 2:
                # stride-2 conv(pad=1) == stride-1 conv subsampled; BN/ReLU are
                # elementwise, and the subsample never leaves registers/VMEM.
                d = _subsample2(d)
            a = _pw(d, w[idx + 2], w[idx + 3])
            idx += 4

        o_ref[...] = a[None].astype(o_ref.dtype)

    return kernel


# ----------------------------- parameters -----------------------------

def _bn_params(key, c, eps=1e-5):
    kg, kb = jax.random.split(key)
    gamma = 1.0 + 0.1 * jax.random.normal(kg, (c,), jnp.float32)
    beta = 0.1 * jax.random.normal(kb, (c,), jnp.float32)
    running_mean = jnp.zeros((c,), jnp.float32)
    running_var = jnp.ones((c,), jnp.float32)
    scale = gamma * jax.lax.rsqrt(running_var + eps)
    shift = beta - running_mean * scale
    return scale, shift


def init_params(key, cfg=CFG, in_planes=IN_PLANES, img_ch=IMG_CH):
    keys = jax.random.split(key, 2 + 2 * len(cfg))
    params = {
        "conv1_w": 0.1 * jax.random.normal(keys[0], (3, 3, img_ch, in_planes), jnp.float32)
    }
    params["bn1_scale"], params["bn1_shift"] = _bn_params(keys[1], in_planes)

    blocks = []
    cur = in_planes
    for bi, item in enumerate(cfg):
        out_planes = item if isinstance(item, int) else item[0]
        stride = 1 if isinstance(item, int) else item[1]
        k_dw, k_pw = jax.random.split(keys[2 + 2 * bi])
        kb1, kb2 = jax.random.split(keys[3 + 2 * bi])
        blk = {
            "stride": stride,
            "dw_w": 0.1 * jax.random.normal(k_dw, (3, 3, cur), jnp.float32),
            "pw_w": 0.1 * jax.random.normal(k_pw, (cur, out_planes), jnp.float32),
        }
        blk["bn1_scale"], blk["bn1_shift"] = _bn_params(kb1, cur)
        blk["bn2_scale"], blk["bn2_shift"] = _bn_params(kb2, out_planes)
        blocks.append(blk)
        cur = out_planes
    params["blocks"] = blocks
    return params


def prepare_fused_params(params):
    """Fold BN scale into the conv weights; return the flat kernel-operand list."""
    flat = [params["conv1_w"] * params["bn1_scale"][None, None, None, :],
            params["bn1_shift"][None, :]]
    for blk in params["blocks"]:
        flat += [blk["dw_w"] * blk["bn1_scale"][None, None, :],
                 blk["bn1_shift"][None, :],
                 blk["pw_w"] * blk["bn2_scale"][None, :],
                 blk["bn2_shift"][None, :]]
    return flat


# ----------------------------- forward -----------------------------

def mobile_tree_root_net(x_nchw, params, cfg=CFG):
    """Forward pass.  x_nchw: (N, C, H, W) as in the PyTorch module; returns NCHW."""
    x = jnp.transpose(x_nchw, (0, 2, 3, 1)).astype(jnp.float32)   # NHWC, lane = channels
    N, H, W, Cin = x.shape

    strides = [1 if isinstance(c, int) else c[1] for c in cfg]
    total = 1
    for s in strides:
        total *= s
    Hs, Ws = H // total, W // total

    flat_w = prepare_fused_params(params)
    Cout = flat_w[-2].shape[-1]

    in_specs = [pl.BlockSpec((1, H, W, Cin), lambda n: (n, 0, 0, 0))]
    for arr in flat_w:
        in_specs.append(pl.BlockSpec(arr.shape, lambda n, _nd=arr.ndim: (0,) * _nd))

    out = pl.pallas_call(
        _make_fused_kernel(strides),
        out_shape=jax.ShapeDtypeStruct((N, Hs, Ws, Cout), jnp.float32),
        grid=(N,),
        in_specs=in_specs,
        out_specs=pl.BlockSpec((1, Hs, Ws, Cout), lambda n: (n, 0, 0, 0)),
        compiler_params=pltpu.CompilerParams(dimension_semantics=("parallel",)),
    )(x, *flat_w)
    return jnp.transpose(out, (0, 3, 1, 2))   # NCHW to match the PyTorch convention


# ----------------------------- pure-JAX reference -----------------------------

def _reference_forward(x_nchw, params):
    hp = jax.lax.Precision.HIGHEST
    dn = ("NHWC", "HWIO", "NHWC")
    y = jnp.transpose(x_nchw, (0, 2, 3, 1)).astype(jnp.float32)
    y = jax.lax.conv_general_dilated(
        y, params["conv1_w"], window_strides=(1, 1), padding=((1, 1), (1, 1)),
        dimension_numbers=dn, precision=hp)
    y = jnp.maximum(y * params["bn1_scale"] + params["bn1_shift"], 0.0)
    for blk in params["blocks"]:
        c = y.shape[-1]
        s = blk["stride"]
        dw = blk["dw_w"][:, :, None, :]               # (3, 3, 1, C) HWIO, groups=C
        y = jax.lax.conv_general_dilated(
            y, dw, window_strides=(s, s), padding=((1, 1), (1, 1)),
            dimension_numbers=dn, feature_group_count=c, precision=hp)
        y = jnp.maximum(y * blk["bn1_scale"] + blk["bn1_shift"], 0.0)
        y = jnp.einsum("nhwc,co->nhwo", y, blk["pw_w"], precision=hp)
        y = jnp.maximum(y * blk["bn2_scale"] + blk["bn2_shift"], 0.0)
    return jnp.transpose(y, (0, 3, 1, 2))


if __name__ == "__main__":
    key = jax.random.PRNGKey(0)
    k_x, k_p = jax.random.split(key)
    # small shapes consistent with the module: batch=2, C=3 (img_shape[0]), 16x16 spatial
    x = jax.random.normal(k_x, (2, 3, 16, 16), jnp.float32)
    params = init_params(k_p)

    fwd = jax.jit(mobile_tree_root_net)
    out = jax.block_until_ready(fwd(x, params))

    assert out.shape == (2, 128, 8, 8), out.shape        # 16x16 -> stride-2 block -> 8x8
    assert bool(jnp.all(jnp.isfinite(out)))

    ref = _reference_forward(x, params)
    max_err = float(jnp.max(jnp.abs(out - ref)))
    assert max_err < 5e-3, f"max abs err vs reference: {max_err}"

    print("KERNEL_OK")
</pallas_src>

<mosaic_0001>
module attributes {stable_mosaic.version = 11 : i64} {
  func.func @kernel(%arg0: i32, %arg1: memref<1x16x16x3xf32, #tpu.memory_space<vmem>>, %arg2: memref<3x3x3x32xf32, #tpu.memory_space<vmem>>, %arg3: memref<1x32xf32, #tpu.memory_space<vmem>>, %arg4: memref<3x3x32xf32, #tpu.memory_space<vmem>>, %arg5: memref<1x32xf32, #tpu.memory_space<vmem>>, %arg6: memref<32x64xf32, #tpu.memory_space<vmem>>, %arg7: memref<1x64xf32, #tpu.memory_space<vmem>>, %arg8: memref<3x3x64xf32, #tpu.memory_space<vmem>>, %arg9: memref<1x64xf32, #tpu.memory_space<vmem>>, %arg10: memref<64x128xf32, #tpu.memory_space<vmem>>, %arg11: memref<1x128xf32, #tpu.memory_space<vmem>>, %arg12: memref<3x3x128xf32, #tpu.memory_space<vmem>>, %arg13: memref<1x128xf32, #tpu.memory_space<vmem>>, %arg14: memref<128x128xf32, #tpu.memory_space<vmem>>, %arg15: memref<1x128xf32, #tpu.memory_space<vmem>>, %arg16: memref<1x8x8x128xf32, #tpu.memory_space<vmem>>) attributes {dimension_semantics = [#tpu.dimension_semantics<parallel>], iteration_bounds = array<i64: 2>, scalar_prefetch = 0 : i64, scratch_operands = 0 : i64, tpu.core_type = #tpu.core_type<tc>, window_params = [{transform_indices = @transform_0, window_bounds = array<i64: 1, 16, 16, 3>}, {pipeline_mode = #tpu.pipeline_mode<synchronous>, transform_indices = @transform_1, window_bounds = array<i64: 3, 3, 3, 32>}, {pipeline_mode = #tpu.pipeline_mode<synchronous>, transform_indices = @transform_2, window_bounds = array<i64: 1, 32>}, {pipeline_mode = #tpu.pipeline_mode<synchronous>, transform_indices = @transform_3, window_bounds = array<i64: 3, 3, 32>}, {pipeline_mode = #tpu.pipeline_mode<synchronous>, transform_indices = @transform_4, window_bounds = array<i64: 1, 32>}, {pipeline_mode = #tpu.pipeline_mode<synchronous>, transform_indices = @transform_5, window_bounds = array<i64: 32, 64>}, {pipeline_mode = #tpu.pipeline_mode<synchronous>, transform_indices = @transform_6, window_bounds = array<i64: 1, 64>}, {pipeline_mode = #tpu.pipeline_mode<synchronous>, transform_indices = @transform_7, window_bounds = array<i64: 3, 3, 64>}, {pipeline_mode = #tpu.pipeline_mode<synchronous>, transform_indices = @transform_8, window_bounds = array<i64: 1, 64>}, {pipeline_mode = #tpu.pipeline_mode<synchronous>, transform_indices = @transform_9, window_bounds = array<i64: 64, 128>}, {pipeline_mode = #tpu.pipeline_mode<synchronous>, transform_indices = @transform_10, window_bounds = array<i64: 1, 128>}, {pipeline_mode = #tpu.pipeline_mode<synchronous>, transform_indices = @transform_11, window_bounds = array<i64: 3, 3, 128>}, {pipeline_mode = #tpu.pipeline_mode<synchronous>, transform_indices = @transform_12, window_bounds = array<i64: 1, 128>}, {pipeline_mode = #tpu.pipeline_mode<synchronous>, transform_indices = @transform_13, window_bounds = array<i64: 128, 128>}, {pipeline_mode = #tpu.pipeline_mode<synchronous>, transform_indices = @transform_14, window_bounds = array<i64: 1, 128>}, {transform_indices = @transform_15, window_bounds = array<i64: 1, 8, 8, 128>}]} {
    %c0 = arith.constant 0 : index
    %c0_0 = arith.constant 0 : index
    %c0_1 = arith.constant 0 : index
    %c0_2 = arith.constant 0 : index
    %0 = vector.load %arg1[%c0, %c0_0, %c0_1, %c0_2] : memref<1x16x16x3xf32, #tpu.memory_space<vmem>>, vector<1x16x16x3xf32>
    %1 = vector.shape_cast %0 : vector<1x16x16x3xf32> to vector<16x16x3xf32>
    %cst = arith.constant 0.000000e+00 : f32
    %2 = vector.broadcast %cst : f32 to vector<256x32xf32>
    %cst_3 = arith.constant 0.000000e+00 : f32
    %3 = vector.broadcast %cst_3 : f32 to vector<1x16x3xf32>
    %4 = vector.extract_strided_slice %1 {offsets = [0, 0, 0], sizes = [15, 16, 3], strides = [1, 1, 1]} : vector<16x16x3xf32> to vector<15x16x3xf32>
    %5 = tpu.concatenate %3, %4 in 0 : vector<1x16x3xf32>, vector<15x16x3xf32> -> vector<16x16x3xf32>
    %cst_4 = arith.constant 0.000000e+00 : f32
    %6 = vector.broadcast %cst_4 : f32 to vector<16x1x3xf32>
    %7 = vector.extract_strided_slice %5 {offsets = [0, 0, 0], sizes = [16, 15, 3], strides = [1, 1, 1]} : vector<16x16x3xf32> to vector<16x15x3xf32>
    %8 = tpu.concatenate %6, %7 in 1 : vector<16x1x3xf32>, vector<16x15x3xf32> -> vector<16x16x3xf32>
    %9 = vector.shape_cast %8 : vector<16x16x3xf32> to vector<256x3xf32>
    %c0_5 = arith.constant 0 : index
    %c0_6 = arith.constant 0 : index
    %c0_7 = arith.constant 0 : index
    %c0_8 = arith.constant 0 : index
    %10 = vector.load %arg2[%c0_5, %c0_6, %c0_7, %c0_8] : memref<3x3x3x32xf32, #tpu.memory_space<vmem>>, vector<1x1x3x32xf32>
    %11 = vector.shape_cast %10 : vector<1x1x3x32xf32> to vector<3x32xf32>
    %cst_9 = arith.constant dense<0.000000e+00> : vector<256x32xf32>
    %12 = tpu.matmul %9, %11, %cst_9 {dimension_numbers = #tpu.dot_dimension_numbers<[1], [0], [0], [1], [0, 0, 1, 1], [], []>} : vector<256x3xf32>, vector<3x32xf32>, vector<256x32xf32> -> vector<256x32xf32>
    %13 = arith.addf %2, %12 : vector<256x32xf32>
    %cst_10 = arith.constant 0.000000e+00 : f32
    %14 = vector.broadcast %cst_10 : f32 to vector<1x16x3xf32>
    %15 = vector.extract_strided_slice %1 {offsets = [0, 0, 0], sizes = [15, 16, 3], strides = [1, 1, 1]} : vector<16x16x3xf32> to vector<15x16x3xf32>
    %16 = tpu.concatenate %14, %15 in 0 : vector<1x16x3xf32>, vector<15x16x3xf32> -> vector<16x16x3xf32>
    %17 = vector.shape_cast %16 : vector<16x16x3xf32> to vector<256x3xf32>
    %c0_11 = arith.constant 0 : index
    %c1 = arith.constant 1 : index
    %c0_12 = arith.constant 0 : index
    %c0_13 = arith.constant 0 : index
    %18 = vector.load %arg2[%c0_11, %c1, %c0_12, %c0_13] : memref<3x3x3x32xf32, #tpu.memory_space<vmem>>, vector<1x1x3x32xf32>
    %19 = vector.shape_cast %18 : vector<1x1x3x32xf32> to vector<3x32xf32>
    %cst_14 = arith.constant dense<0.000000e+00> : vector<256x32xf32>
    %20 = tpu.matmul %17, %19, %cst_14 {dimension_numbers = #tpu.dot_dimension_numbers<[1], [0], [0], [1], [0, 0, 1, 1], [], []>} : vector<256x3xf32>, vector<3x32xf32>, vector<256x32xf32> -> vector<256x32xf32>
    %21 = arith.addf %13, %20 : vector<256x32xf32>
    %cst_15 = arith.constant 0.000000e+00 : f32
    %22 = vector.broadcast %cst_15 : f32 to vector<1x16x3xf32>
    %23 = vector.extract_strided_slice %1 {offsets = [0, 0, 0], sizes = [15, 16, 3], strides = [1, 1, 1]} : vector<16x16x3xf32> to vector<15x16x3xf32>
    %24 = tpu.concatenate %22, %23 in 0 : vector<1x16x3xf32>, vector<15x16x3xf32> -> vector<16x16x3xf32>
    %25 = vector.extract_strided_slice %24 {offsets = [0, 1, 0], sizes = [16, 15, 3], strides = [1, 1, 1]} : vector<16x16x3xf32> to vector<16x15x3xf32>
    %cst_16 = arith.constant 0.000000e+00 : f32
    %26 = vector.broadcast %cst_16 : f32 to vector<16x1x3xf32>
    %27 = tpu.concatenate %25, %26 in 1 : vector<16x15x3xf32>, vector<16x1x3xf32> -> vector<16x16x3xf32>
    %28 = vector.shape_cast %27 : vector<16x16x3xf32> to vector<256x3xf32>
    %c0_17 = arith.constant 0 : index
    %c2 = arith.constant 2 : index
    %c0_18 = arith.constant 0 : index
    %c0_19 = arith.constant 0 : index
    %29 = vector.load %arg2[%c0_17, %c2, %c0_18, %c0_19] : memref<3x3x3x32xf32, #tpu.memory_space<vmem>>, vector<1x1x3x32xf32>
    %30 = vector.shape_cast %29 : vector<1x1x3x32xf32> to vector<3x32xf32>
    %cst_20 = arith.constant dense<0.000000e+00> : vector<256x32xf32>
    %31 = tpu.matmul %28, %30, %cst_20 {dimension_numbers = #tpu.dot_dimension_numbers<[1], [0], [0], [1], [0, 0, 1, 1], [], []>} : vector<256x3xf32>, vector<3x32xf32>, vector<256x32xf32> -> vector<256x32xf32>
    %32 = arith.addf %21, %31 : vector<256x32xf32>
    %cst_21 = arith.constant 0.000000e+00 : f32
    %33 = vector.broadcast %cst_21 : f32 to vector<16x1x3xf32>
    %34 = vector.extract_strided_slice %1 {offsets = [0, 0, 0], sizes = [16, 15, 3], strides = [1, 1, 1]} : vector<16x16x3xf32> to vector<16x15x3xf32>
    %35 = tpu.concatenate %33, %34 in 1 : vector<16x1x3xf32>, vector<16x15x3xf32> -> vector<16x16x3xf32>
    %36 = vector.shape_cast %35 : vector<16x16x3xf32> to vector<256x3xf32>
    %c1_22 = arith.constant 1 : index
    %c0_23 = arith.constant 0 : index
    %c0_24 = arith.constant 0 : index
    %c0_25 = arith.constant 0 : index
    %37 = vector.load %arg2[%c1_22, %c0_23, %c0_24, %c0_25] : memref<3x3x3x32xf32, #tpu.memory_space<vmem>>, vector<1x1x3x32xf32>
    %38 = vector.shape_cast %37 : vector<1x1x3x32xf32> to vector<3x32xf32>
    %cst_26 = arith.constant dense<0.000000e+00> : vector<256x32xf32>
    %39 = tpu.matmul %36, %38, %cst_26 {dimension_numbers = #tpu.dot_dimension_numbers<[1], [0], [0], [1], [0, 0, 1, 1], [], []>} : vector<256x3xf32>, vector<3x32xf32>, vector<256x32xf32> -> vector<256x32xf32>
    %40 = arith.addf %32, %39 : vector<256x32xf32>
    %41 = vector.shape_cast %1 : vector<16x16x3xf32> to vector<256x3xf32>
    %c1_27 = arith.constant 1 : index
    %c1_28 = arith.constant 1 : index
    %c0_29 = arith.constant 0 : index
    %c0_30 = arith.constant 0 : index
    %42 = vector.load %arg2[%c1_27, %c1_28, %c0_29, %c0_30] : memref<3x3x3x32xf32, #tpu.memory_space<vmem>>, vector<1x1x3x32xf32>
    %43 = vector.shape_cast %42 : vector<1x1x3x32xf32> to vector<3x32xf32>
    %cst_31 = arith.constant dense<0.000000e+00> : vector<256x32xf32>
    %44 = tpu.matmul %41, %43, %cst_31 {dimension_numbers = #tpu.dot_dimension_numbers<[1], [0], [0], [1], [0, 0, 1, 1], [], []>} : vector<256x3xf32>, vector<3x32xf32>, vector<256x32xf32> -> vector<256x32xf32>
    %45 = arith.addf %40, %44 : vector<256x32xf32>
    %46 = vector.extract_strided_slice %1 {offsets = [0, 1, 0], sizes = [16, 15, 3], strides = [1, 1, 1]} : vector<16x16x3xf32> to vector<16x15x3xf32>
    %cst_32 = arith.constant 0.000000e+00 : f32
    %47 = vector.broadcast %cst_32 : f32 to vector<16x1x3xf32>
    %48 = tpu.concatenate %46, %47 in 1 : vector<16x15x3xf32>, vector<16x1x3xf32> -> vector<16x16x3xf32>
    %49 = vector.shape_cast %48 : vector<16x16x3xf32> to vector<256x3xf32>
    %c1_33 = arith.constant 1 : index
    %c2_34 = arith.constant 2 : index
    %c0_35 = arith.constant 0 : index
    %c0_36 = arith.constant 0 : index
    %50 = vector.load %arg2[%c1_33, %c2_34, %c0_35, %c0_36] : memref<3x3x3x32xf32, #tpu.memory_space<vmem>>, vector<1x1x3x32xf32>
    %51 = vector.shape_cast %50 : vector<1x1x3x32xf32> to vector<3x32xf32>
    %cst_37 = arith.constant dense<0.000000e+00> : vector<256x32xf32>
    %52 = tpu.matmul %49, %51, %cst_37 {dimension_numbers = #tpu.dot_dimension_numbers<[1], [0], [0], [1], [0, 0, 1, 1], [], []>} : vector<256x3xf32>, vector<3x32xf32>, vector<256x32xf32> -> vector<256x32xf32>
    %53 = arith.addf %45, %52 : vector<256x32xf32>
    %54 = vector.extract_strided_slice %1 {offsets = [1, 0, 0], sizes = [15, 16, 3], strides = [1, 1, 1]} : vector<16x16x3xf32> to vector<15x16x3xf32>
    %cst_38 = arith.constant 0.000000e+00 : f32
    %55 = vector.broadcast %cst_38 : f32 to vector<1x16x3xf32>
    %56 = tpu.concatenate %54, %55 in 0 : vector<15x16x3xf32>, vector<1x16x3xf32> -> vector<16x16x3xf32>
    %cst_39 = arith.constant 0.000000e+00 : f32
    %57 = vector.broadcast %cst_39 : f32 to vector<16x1x3xf32>
    %58 = vector.extract_strided_slice %56 {offsets = [0, 0, 0], sizes = [16, 15, 3], strides = [1, 1, 1]} : vector<16x16x3xf32> to vector<16x15x3xf32>
    %59 = tpu.concatenate %57, %58 in 1 : vector<16x1x3xf32>, vector<16x15x3xf32> -> vector<16x16x3xf32>
    %60 = vector.shape_cast %59 : vector<16x16x3xf32> to vector<256x3xf32>
    %c2_40 = arith.constant 2 : index
    %c0_41 = arith.constant 0 : index
    %c0_42 = arith.constant 0 : index
    %c0_43 = arith.constant 0 : index
    %61 = vector.load %arg2[%c2_40, %c0_41, %c0_42, %c0_43] : memref<3x3x3x32xf32, #tpu.memory_space<vmem>>, vector<1x1x3x32xf32>
    %62 = vector.shape_cast %61 : vector<1x1x3x32xf32> to vector<3x32xf32>
    %cst_44 = arith.constant dense<0.000000e+00> : vector<256x32xf32>
    %63 = tpu.matmul %60, %62, %cst_44 {dimension_numbers = #tpu.dot_dimension_numbers<[1], [0], [0], [1], [0, 0, 1, 1], [], []>} : vector<256x3xf32>, vector<3x32xf32>, vector<256x32xf32> -> vector<256x32xf32>
    %64 = arith.addf %53, %63 : vector<256x32xf32>
    %65 = vector.extract_strided_slice %1 {offsets = [1, 0, 0], sizes = [15, 16, 3], strides = [1, 1, 1]} : vector<16x16x3xf32> to vector<15x16x3xf32>
    %cst_45 = arith.constant 0.000000e+00 : f32
    %66 = vector.broadcast %cst_45 : f32 to vector<1x16x3xf32>
    %67 = tpu.concatenate %65, %66 in 0 : vector<15x16x3xf32>, vector<1x16x3xf32> -> vector<16x16x3xf32>
    %68 = vector.shape_cast %67 : vector<16x16x3xf32> to vector<256x3xf32>
    %c2_46 = arith.constant 2 : index
    %c1_47 = arith.constant 1 : index
    %c0_48 = arith.constant 0 : index
    %c0_49 = arith.constant 0 : index
    %69 = vector.load %arg2[%c2_46, %c1_47, %c0_48, %c0_49] : memref<3x3x3x32xf32, #tpu.memory_space<vmem>>, vector<1x1x3x32xf32>
    %70 = vector.shape_cast %69 : vector<1x1x3x32xf32> to vector<3x32xf32>
    %cst_50 = arith.constant dense<0.000000e+00> : vector<256x32xf32>
    %71 = tpu.matmul %68, %70, %cst_50 {dimension_numbers = #tpu.dot_dimension_numbers<[1], [0], [0], [1], [0, 0, 1, 1], [], []>} : vector<256x3xf32>, vector<3x32xf32>, vector<256x32xf32> -> vector<256x32xf32>
    %72 = arith.addf %64, %71 : vector<256x32xf32>
    %73 = vector.extract_strided_slice %1 {offsets = [1, 0, 0], sizes = [15, 16, 3], strides = [1, 1, 1]} : vector<16x16x3xf32> to vector<15x16x3xf32>
    %cst_51 = arith.constant 0.000000e+00 : f32
    %74 = vector.broadcast %cst_51 : f32 to vector<1x16x3xf32>
    %75 = tpu.concatenate %73, %74 in 0 : vector<15x16x3xf32>, vector<1x16x3xf32> -> vector<16x16x3xf32>
    %76 = vector.extract_strided_slice %75 {offsets = [0, 1, 0], sizes = [16, 15, 3], strides = [1, 1, 1]} : vector<16x16x3xf32> to vector<16x15x3xf32>
    %cst_52 = arith.constant 0.000000e+00 : f32
    %77 = vector.broadcast %cst_52 : f32 to vector<16x1x3xf32>
    %78 = tpu.concatenate %76, %77 in 1 : vector<16x15x3xf32>, vector<16x1x3xf32> -> vector<16x16x3xf32>
    %79 = vector.shape_cast %78 : vector<16x16x3xf32> to vector<256x3xf32>
    %c2_53 = arith.constant 2 : index
    %c2_54 = arith.constant 2 : index
    %c0_55 = arith.constant 0 : index
    %c0_56 = arith.constant 0 : index
    %80 = vector.load %arg2[%c2_53, %c2_54, %c0_55, %c0_56] : memref<3x3x3x32xf32, #tpu.memory_space<vmem>>, vector<1x1x3x32xf32>
    %81 = vector.shape_cast %80 : vector<1x1x3x32xf32> to vector<3x32xf32>
    %cst_57 = arith.constant dense<0.000000e+00> : vector<256x32xf32>
    %82 = tpu.matmul %79, %81, %cst_57 {dimension_numbers = #tpu.dot_dimension_numbers<[1], [0], [0], [1], [0, 0, 1, 1], [], []>} : vector<256x3xf32>, vector<3x32xf32>, vector<256x32xf32> -> vector<256x32xf32>
    %83 = arith.addf %72, %82 : vector<256x32xf32>
    %c0_58 = arith.constant 0 : index
    %c0_59 = arith.constant 0 : index
    %84 = vector.load %arg3[%c0_58, %c0_59] : memref<1x32xf32, #tpu.memory_space<vmem>>, vector<1x32xf32>
    %85 = vector.shape_cast %84 : vector<1x32xf32> to vector<32xf32>
    %86 = vector.shape_cast %85 : vector<32xf32> to vector<1x32xf32>
    %87 = vector.broadcast %86 : vector<1x32xf32> to vector<256x32xf32>
    %88 = arith.addf %83, %87 : vector<256x32xf32>
    %cst_60 = arith.constant 0.000000e+00 : f32
    %89 = vector.broadcast %cst_60 : f32 to vector<256x32xf32>
    %90 = arith.maximumf %88, %89 : vector<256x32xf32>
    %91 = vector.shape_cast %90 : vector<256x32xf32> to vector<16x16x32xf32>
    %cst_61 = arith.constant 0.000000e+00 : f32
    %92 = vector.broadcast %cst_61 : f32 to vector<16x16x32xf32>
    %cst_62 = arith.constant 0.000000e+00 : f32
    %93 = vector.broadcast %cst_62 : f32 to vector<1x16x32xf32>
    %94 = vector.extract_strided_slice %91 {offsets = [0, 0, 0], sizes = [15, 16, 32], strides = [1, 1, 1]} : vector<16x16x32xf32> to vector<15x16x32xf32>
    %95 = tpu.concatenate %93, %94 in 0 : vector<1x16x32xf32>, vector<15x16x32xf32> -> vector<16x16x32xf32>
    %cst_63 = arith.constant 0.000000e+00 : f32
    %96 = vector.broadcast %cst_63 : f32 to vector<16x1x32xf32>
    %97 = vector.extract_strided_slice %95 {offsets = [0, 0, 0], sizes = [16, 15, 32], strides = [1, 1, 1]} : vector<16x16x32xf32> to vector<16x15x32xf32>
    %98 = tpu.concatenate %96, %97 in 1 : vector<16x1x32xf32>, vector<16x15x32xf32> -> vector<16x16x32xf32>
    %c0_64 = arith.constant 0 : index
    %c0_65 = arith.constant 0 : index
    %c0_66 = arith.constant 0 : index
    %99 = vector.load %arg4[%c0_64, %c0_65, %c0_66] : memref<3x3x32xf32, #tpu.memory_space<vmem>>, vector<1x1x32xf32>
    %100 = vector.shape_cast %99 : vector<1x1x32xf32> to vector<32xf32>
    %101 = vector.shape_cast %100 : vector<32xf32> to vector<1x1x32xf32>
    %102 = vector.broadcast %101 : vector<1x1x32xf32> to vector<16x16x32xf32>
    %103 = arith.mulf %98, %102 : vector<16x16x32xf32>
    %104 = arith.addf %92, %103 : vector<16x16x32xf32>
    %cst_67 = arith.constant 0.000000e+00 : f32
    %105 = vector.broadcast %cst_67 : f32 to vector<1x16x32xf32>
    %106 = vector.extract_strided_slice %91 {offsets = [0, 0, 0], sizes = [15, 16, 32], strides = [1, 1, 1]} : vector<16x16x32xf32> to vector<15x16x32xf32>
    %107 = tpu.concatenate %105, %106 in 0 : vector<1x16x32xf32>, vector<15x16x32xf32> -> vector<16x16x32xf32>
    %c0_68 = arith.constant 0 : index
    %c1_69 = arith.constant 1 : index
    %c0_70 = arith.constant 0 : index
    %108 = vector.load %arg4[%c0_68, %c1_69, %c0_70] : memref<3x3x32xf32, #tpu.memory_space<vmem>>, vector<1x1x32xf32>
    %109 = vector.shape_cast %108 : vector<1x1x32xf32> to vector<32xf32>
    %110 = vector.shape_cast %109 : vector<32xf32> to vector<1x1x32xf32>
    %111 = vector.broadcast %110 : vector<1x1x32xf32> to vector<16x16x32xf32>
    %112 = arith.mulf %107, %111 : vector<16x16x32xf32>
    %113 = arith.addf %104, %112 : vector<16x16x32xf32>
    %cst_71 = arith.constant 0.000000e+00 : f32
    %114 = vector.broadcast %cst_71 : f32 to vector<1x16x32xf32>
    %115 = vector.extract_strided_slice %91 {offsets = [0, 0, 0], sizes = [15, 16, 32], strides = [1, 1, 1]} : vector<16x16x32xf32> to vector<15x16x32xf32>
    %116 = tpu.concatenate %114, %115 in 0 : vector<1x16x32xf32>, vector<15x16x32xf32> -> vector<16x16x32xf32>
    %117 = vector.extract_strided_slice %116 {offsets = [0, 1, 0], sizes = [16, 15, 32], strides = [1, 1, 1]} : vector<16x16x32xf32> to vector<16x15x32xf32>
    %cst_72 = arith.constant 0.000000e+00 : f32
    %118 = vector.broadcast %cst_72 : f32 to vector<16x1x32xf32>
    %119 = tpu.concatenate %117, %118 in 1 : vector<16x15x32xf32>, vector<16x1x32xf32> -> vector<16x16x32xf32>
    %c0_73 = arith.constant 0 : index
    %c2_74 = arith.constant 2 : index
    %c0_75 = arith.constant 0 : index
    %120 = vector.load %arg4[%c0_73, %c2_74, %c0_75] : memref<3x3x32xf32, #tpu.memory_space<vmem>>, vector<1x1x32xf32>
    %121 = vector.shape_cast %120 : vector<1x1x32xf32> to vector<32xf32>
    %122 = vector.shape_cast %121 : vector<32xf32> to vector<1x1x32xf32>
    %123 = vector.broadcast %122 : vector<1x1x32xf32> to vector<16x16x32xf32>
    %124 = arith.mulf %119, %123 : vector<16x16x32xf32>
    %125 = arith.addf %113, %124 : vector<16x16x32xf32>
    %cst_76 = arith.constant 0.000000e+00 : f32
    %126 = vector.broadcast %cst_76 : f32 to vector<16x1x32xf32>
    %127 = vector.extract_strided_slice %91 {offsets = [0, 0, 0], sizes = [16, 15, 32], strides = [1, 1, 1]} : vector<16x16x32xf32> to vector<16x15x32xf32>
    %128 = tpu.concatenate %126, %127 in 1 : vector<16x1x32xf32>, vector<16x15x32xf32> -> vector<16x16x32xf32>
    %c1_77 = arith.constant 1 : index
    %c0_78 = arith.constant 0 : index
    %c0_79 = arith.constant 0 : index
    %129 = vector.load %arg4[%c1_77, %c0_78, %c0_79] : memref<3x3x32xf32, #tpu.memory_space<vmem>>, vector<1x1x32xf32>
    %130 = vector.shape_cast %129 : vector<1x1x32xf32> to vector<32xf32>
    %131 = vector.shape_cast %130 : vector<32xf32> to vector<1x1x32xf32>
    %132 = vector.broadcast %131 : vector<1x1x32xf32> to vector<16x16x32xf32>
    %133 = arith.mulf %128, %132 : vector<16x16x32xf32>
    %134 = arith.addf %125, %133 : vector<16x16x32xf32>
    %c1_80 = arith.constant 1 : index
    %c1_81 = arith.constant 1 : index
    %c0_82 = arith.constant 0 : index
    %135 = vector.load %arg4[%c1_80, %c1_81, %c0_82] : memref<3x3x32xf32, #tpu.memory_space<vmem>>, vector<1x1x32xf32>
    %136 = vector.shape_cast %135 : vector<1x1x32xf32> to vector<32xf32>
    %137 = vector.shape_cast %136 : vector<32xf32> to vector<1x1x32xf32>
    %138 = vector.broadcast %137 : vector<1x1x32xf32> to vector<16x16x32xf32>
    %139 = arith.mulf %91, %138 : vector<16x16x32xf32>
    %140 = arith.addf %134, %139 : vector<16x16x32xf32>
    %141 = vector.extract_strided_slice %91 {offsets = [0, 1, 0], sizes = [16, 15, 32], strides = [1, 1, 1]} : vector<16x16x32xf32> to vector<16x15x32xf32>
    %cst_83 = arith.constant 0.000000e+00 : f32
    %142 = vector.broadcast %cst_83 : f32 to vector<16x1x32xf32>
    %143 = tpu.concatenate %141, %142 in 1 : vector<16x15x32xf32>, vector<16x1x32xf32> -> vector<16x16x32xf32>
    %c1_84 = arith.constant 1 : index
    %c2_85 = arith.constant 2 : index
    %c0_86 = arith.constant 0 : index
    %144 = vector.load %arg4[%c1_84, %c2_85, %c0_86] : memref<3x3x32xf32, #tpu.memory_space<vmem>>, vector<1x1x32xf32>
    %145 = vector.shape_cast %144 : vector<1x1x32xf32> to vector<32xf32>
    %146 = vector.shape_cast %145 : vector<32xf32> to vector<1x1x32xf32>
    %147 = vector.broadcast %146 : vector<1x1x32xf32> to vector<16x16x32xf32>
    %148 = arith.mulf %143, %147 : vector<16x16x32xf32>
    %149 = arith.addf %140, %148 : vector<16x16x32xf32>
    %150 = vector.extract_strided_slice %91 {offsets = [1, 0, 0], sizes = [15, 16, 32], strides = [1, 1, 1]} : vector<16x16x32xf32> to vector<15x16x32xf32>
    %cst_87 = arith.constant 0.000000e+00 : f32
    %151 = vector.broadcast %cst_87 : f32 to vector<1x16x32xf32>
    %152 = tpu.concatenate %150, %151 in 0 : vector<15x16x32xf32>, vector<1x16x32xf32> -> vector<16x16x32xf32>
    %cst_88 = arith.constant 0.000000e+00 : f32
    %153 = vector.broadcast %cst_88 : f32 to vector<16x1x32xf32>
    %154 = vector.extract_strided_slice %152 {offsets = [0, 0, 0], sizes = [16, 15, 32], strides = [1, 1, 1]} : vector<16x16x32xf32> to vector<16x15x32xf32>
    %155 = tpu.concatenate %153, %154 in 1 : vector<16x1x32xf32>, vector<16x15x32xf32> -> vector<16x16x32xf32>
    %c2_89 = arith.constant 2 : index
    %c0_90 = arith.constant 0 : index
    %c0_91 = arith.constant 0 : index
    %156 = vector.load %arg4[%c2_89, %c0_90, %c0_91] : memref<3x3x32xf32, #tpu.memory_space<vmem>>, vector<1x1x32xf32>
    %157 = vector.shape_cast %156 : vector<1x1x32xf32> to vector<32xf32>
    %158 = vector.shape_cast %157 : vector<32xf32> to vector<1x1x32xf32>
    %159 = vector.broadcast %158 : vector<1x1x32xf32> to vector<16x16x32xf32>
    %160 = arith.mulf %155, %159 : vector<16x16x32xf32>
    %161 = arith.addf %149, %160 : vector<16x16x32xf32>
    %162 = vector.extract_strided_slice %91 {offsets = [1, 0, 0], sizes = [15, 16, 32], strides = [1, 1, 1]} : vector<16x16x32xf32> to vector<15x16x32xf32>
    %cst_92 = arith.constant 0.000000e+00 : f32
    %163 = vector.broadcast %cst_92 : f32 to vector<1x16x32xf32>
    %164 = tpu.concatenate %162, %163 in 0 : vector<15x16x32xf32>, vector<1x16x32xf32> -> vector<16x16x32xf32>
    %c2_93 = arith.constant 2 : index
    %c1_94 = arith.constant 1 : index
    %c0_95 = arith.constant 0 : index
    %165 = vector.load %arg4[%c2_93, %c1_94, %c0_95] : memref<3x3x32xf32, #tpu.memory_space<vmem>>, vector<1x1x32xf32>
    %166 = vector.shape_cast %165 : vector<1x1x32xf32> to vector<32xf32>
    %167 = vector.shape_cast %166 : vector<32xf32> to vector<1x1x32xf32>
    %168 = vector.broadcast %167 : vector<1x1x32xf32> to vector<16x16x32xf32>
    %169 = arith.mulf %164, %168 : vector<16x16x32xf32>
    %170 = arith.addf %161, %169 : vector<16x16x32xf32>
    %171 = vector.extract_strided_slice %91 {offsets = [1, 0, 0], sizes = [15, 16, 32], strides = [1, 1, 1]} : vector<16x16x32xf32> to vector<15x16x32xf32>
    %cst_96 = arith.constant 0.000000e+00 : f32
    %172 = vector.broadcast %cst_96 : f32 to vector<1x16x32xf32>
    %173 = tpu.concatenate %171, %172 in 0 : vector<15x16x32xf32>, vector<1x16x32xf32> -> vector<16x16x32xf32>
    %174 = vector.extract_strided_slice %173 {offsets = [0, 1, 0], sizes = [16, 15, 32], strides = [1, 1, 1]} : vector<16x16x32xf32> to vector<16x15x32xf32>
    %cst_97 = arith.constant 0.000000e+00 : f32
    %175 = vector.broadcast %cst_97 : f32 to vector<16x1x32xf32>
    %176 = tpu.concatenate %174, %175 in 1 : vector<16x15x32xf32>, vector<16x1x32xf32> -> vector<16x16x32xf32>
    %c2_98 = arith.constant 2 : index
    %c2_99 = arith.constant 2 : index
    %c0_100 = arith.constant 0 : index
    %177 = vector.load %arg4[%c2_98, %c2_99, %c0_100] : memref<3x3x32xf32, #tpu.memory_space<vmem>>, vector<1x1x32xf32>
    %178 = vector.shape_cast %177 : vector<1x1x32xf32> to vector<32xf32>
    %179 = vector.shape_cast %178 : vector<32xf32> to vector<1x1x32xf32>
    %180 = vector.broadcast %179 : vector<1x1x32xf32> to vector<16x16x32xf32>
    %181 = arith.mulf %176, %180 : vector<16x16x32xf32>
    %182 = arith.addf %170, %181 : vector<16x16x32xf32>
    %c0_101 = arith.constant 0 : index
    %c0_102 = arith.constant 0 : index
    %183 = vector.load %arg5[%c0_101, %c0_102] : memref<1x32xf32, #tpu.memory_space<vmem>>, vector<1x32xf32>
    %184 = vector.shape_cast %183 : vector<1x32xf32> to vector<32xf32>
    %185 = vector.shape_cast %184 : vector<32xf32> to vector<1x1x32xf32>
    %186 = vector.broadcast %185 : vector<1x1x32xf32> to vector<16x16x32xf32>
    %187 = arith.addf %182, %186 : vector<16x16x32xf32>
    %cst_103 = arith.constant 0.000000e+00 : f32
    %188 = vector.broadcast %cst_103 : f32 to vector<16x16x32xf32>
    %189 = arith.maximumf %187, %188 : vector<16x16x32xf32>
    %190 = vector.shape_cast %189 : vector<16x16x32xf32> to vector<256x32xf32>
    %c0_104 = arith.constant 0 : index
    %c0_105 = arith.constant 0 : index
    %191 = vector.load %arg6[%c0_104, %c0_105] : memref<32x64xf32, #tpu.memory_space<vmem>>, vector<32x64xf32>
    %cst_106 = arith.constant dense<0.000000e+00> : vector<256x64xf32>
    %192 = tpu.matmul %190, %191, %cst_106 {dimension_numbers = #tpu.dot_dimension_numbers<[1], [0], [0], [1], [0, 0, 1, 1], [], []>} : vector<256x32xf32>, vector<32x64xf32>, vector<256x64xf32> -> vector<256x64xf32>
    %c0_107 = arith.constant 0 : index
    %c0_108 = arith.constant 0 : index
    %193 = vector.load %arg7[%c0_107, %c0_108] : memref<1x64xf32, #tpu.memory_space<vmem>>, vector<1x64xf32>
    %194 = vector.shape_cast %193 : vector<1x64xf32> to vector<64xf32>
    %195 = vector.shape_cast %194 : vector<64xf32> to vector<1x64xf32>
    %196 = vector.broadcast %195 : vector<1x64xf32> to vector<256x64xf32>
    %197 = arith.addf %192, %196 : vector<256x64xf32>
    %cst_109 = arith.constant 0.000000e+00 : f32
    %198 = vector.broadcast %cst_109 : f32 to vector<256x64xf32>
    %199 = arith.maximumf %197, %198 : vector<256x64xf32>
    %200 = vector.shape_cast %199 : vector<256x64xf32> to vector<16x16x64xf32>
    %cst_110 = arith.constant 0.000000e+00 : f32
    %201 = vector.broadcast %cst_110 : f32 to vector<16x16x64xf32>
    %cst_111 = arith.constant 0.000000e+00 : f32
    %202 = vector.broadcast %cst_111 : f32 to vector<1x16x64xf32>
    %203 = vector.extract_strided_slice %200 {offsets = [0, 0, 0], sizes = [15, 16, 64], strides = [1, 1, 1]} : vector<16x16x64xf32> to vector<15x16x64xf32>
    %204 = tpu.concatenate %202, %203 in 0 : vector<1x16x64xf32>, vector<15x16x64xf32> -> vector<16x16x64xf32>
    %cst_112 = arith.constant 0.000000e+00 : f32
    %205 = vector.broadcast %cst_112 : f32 to vector<16x1x64xf32>
    %206 = vector.extract_strided_slice %204 {offsets = [0, 0, 0], sizes = [16, 15, 64], strides = [1, 1, 1]} : vector<16x16x64xf32> to vector<16x15x64xf32>
    %207 = tpu.concatenate %205, %206 in 1 : vector<16x1x64xf32>, vector<16x15x64xf32> -> vector<16x16x64xf32>
    %c0_113 = arith.constant 0 : index
    %c0_114 = arith.constant 0 : index
    %c0_115 = arith.constant 0 : index
    %208 = vector.load %arg8[%c0_113, %c0_114, %c0_115] : memref<3x3x64xf32, #tpu.memory_space<vmem>>, vector<1x1x64xf32>
    %209 = vector.shape_cast %208 : vector<1x1x64xf32> to vector<64xf32>
    %210 = vector.shape_cast %209 : vector<64xf32> to vector<1x1x64xf32>
    %211 = vector.broadcast %210 : vector<1x1x64xf32> to vector<16x16x64xf32>
    %212 = arith.mulf %207, %211 : vector<16x16x64xf32>
    %213 = arith.addf %201, %212 : vector<16x16x64xf32>
    %cst_116 = arith.constant 0.000000e+00 : f32
    %214 = vector.broadcast %cst_116 : f32 to vector<1x16x64xf32>
    %215 = vector.extract_strided_slice %200 {offsets = [0, 0, 0], sizes = [15, 16, 64], strides = [1, 1, 1]} : vector<16x16x64xf32> to vector<15x16x64xf32>
    %216 = tpu.concatenate %214, %215 in 0 : vector<1x16x64xf32>, vector<15x16x64xf32> -> vector<16x16x64xf32>
    %c0_117 = arith.constant 0 : index
    %c1_118 = arith.constant 1 : index
    %c0_119 = arith.constant 0 : index
    %217 = vector.load %arg8[%c0_117, %c1_118, %c0_119] : memref<3x3x64xf32, #tpu.memory_space<vmem>>, vector<1x1x64xf32>
    %218 = vector.shape_cast %217 : vector<1x1x64xf32> to vector<64xf32>
    %219 = vector.shape_cast %218 : vector<64xf32> to vector<1x1x64xf32>
    %220 = vector.broadcast %219 : vector<1x1x64xf32> to vector<16x16x64xf32>
    %221 = arith.mulf %216, %220 : vector<16x16x64xf32>
    %222 = arith.addf %213, %221 : vector<16x16x64xf32>
    %cst_120 = arith.constant 0.000000e+00 : f32
    %223 = vector.broadcast %cst_120 : f32 to vector<1x16x64xf32>
    %224 = vector.extract_strided_slice %200 {offsets = [0, 0, 0], sizes = [15, 16, 64], strides = [1, 1, 1]} : vector<16x16x64xf32> to vector<15x16x64xf32>
    %225 = tpu.concatenate %223, %224 in 0 : vector<1x16x64xf32>, vector<15x16x64xf32> -> vector<16x16x64xf32>
    %226 = vector.extract_strided_slice %225 {offsets = [0, 1, 0], sizes = [16, 15, 64], strides = [1, 1, 1]} : vector<16x16x64xf32> to vector<16x15x64xf32>
    %cst_121 = arith.constant 0.000000e+00 : f32
    %227 = vector.broadcast %cst_121 : f32 to vector<16x1x64xf32>
    %228 = tpu.concatenate %226, %227 in 1 : vector<16x15x64xf32>, vector<16x1x64xf32> -> vector<16x16x64xf32>
    %c0_122 = arith.constant 0 : index
    %c2_123 = arith.constant 2 : index
    %c0_124 = arith.constant 0 : index
    %229 = vector.load %arg8[%c0_122, %c2_123, %c0_124] : memref<3x3x64xf32, #tpu.memory_space<vmem>>, vector<1x1x64xf32>
    %230 = vector.shape_cast %229 : vector<1x1x64xf32> to vector<64xf32>
    %231 = vector.shape_cast %230 : vector<64xf32> to vector<1x1x64xf32>
    %232 = vector.broadcast %231 : vector<1x1x64xf32> to vector<16x16x64xf32>
    %233 = arith.mulf %228, %232 : vector<16x16x64xf32>
    %234 = arith.addf %222, %233 : vector<16x16x64xf32>
    %cst_125 = arith.constant 0.000000e+00 : f32
    %235 = vector.broadcast %cst_125 : f32 to vector<16x1x64xf32>
    %236 = vector.extract_strided_slice %200 {offsets = [0, 0, 0], sizes = [16, 15, 64], strides = [1, 1, 1]} : vector<16x16x64xf32> to vector<16x15x64xf32>
    %237 = tpu.concatenate %235, %236 in 1 : vector<16x1x64xf32>, vector<16x15x64xf32> -> vector<16x16x64xf32>
    %c1_126 = arith.constant 1 : index
    %c0_127 = arith.constant 0 : index
    %c0_128 = arith.constant 0 : index
    %238 = vector.load %arg8[%c1_126, %c0_127, %c0_128] : memref<3x3x64xf32, #tpu.memory_space<vmem>>, vector<1x1x64xf32>
    %239 = vector.shape_cast %238 : vector<1x1x64xf32> to vector<64xf32>
    %240 = vector.shape_cast %239 : vector<64xf32> to vector<1x1x64xf32>
    %241 = vector.broadcast %240 : vector<1x1x64xf32> to vector<16x16x64xf32>
    %242 = arith.mulf %237, %241 : vector<16x16x64xf32>
    %243 = arith.addf %234, %242 : vector<16x16x64xf32>
    %c1_129 = arith.constant 1 : index
    %c1_130 = arith.constant 1 : index
    %c0_131 = arith.constant 0 : index
    %244 = vector.load %arg8[%c1_129, %c1_130, %c0_131] : memref<3x3x64xf32, #tpu.memory_space<vmem>>, vector<1x1x64xf32>
    %245 = vector.shape_cast %244 : vector<1x1x64xf32> to vector<64xf32>
    %246 = vector.shape_cast %245 : vector<64xf32> to vector<1x1x64xf32>
    %247 = vector.broadcast %246 : vector<1x1x64xf32> to vector<16x16x64xf32>
    %248 = arith.mulf %200, %247 : vector<16x16x64xf32>
    %249 = arith.addf %243, %248 : vector<16x16x64xf32>
    %250 = vector.extract_strided_slice %200 {offsets = [0, 1, 0], sizes = [16, 15, 64], strides = [1, 1, 1]} : vector<16x16x64xf32> to vector<16x15x64xf32>
    %cst_132 = arith.constant 0.000000e+00 : f32
    %251 = vector.broadcast %cst_132 : f32 to vector<16x1x64xf32>
    %252 = tpu.concatenate %250, %251 in 1 : vector<16x15x64xf32>, vector<16x1x64xf32> -> vector<16x16x64xf32>
    %c1_133 = arith.constant 1 : index
    %c2_134 = arith.constant 2 : index
    %c0_135 = arith.constant 0 : index
    %253 = vector.load %arg8[%c1_133, %c2_134, %c0_135] : memref<3x3x64xf32, #tpu.memory_space<vmem>>, vector<1x1x64xf32>
    %254 = vector.shape_cast %253 : vector<1x1x64xf32> to vector<64xf32>
    %255 = vector.shape_cast %254 : vector<64xf32> to vector<1x1x64xf32>
    %256 = vector.broadcast %255 : vector<1x1x64xf32> to vector<16x16x64xf32>
    %257 = arith.mulf %252, %256 : vector<16x16x64xf32>
    %258 = arith.addf %249, %257 : vector<16x16x64xf32>
    %259 = vector.extract_strided_slice %200 {offsets = [1, 0, 0], sizes = [15, 16, 64], strides = [1, 1, 1]} : vector<16x16x64xf32> to vector<15x16x64xf32>
    %cst_136 = arith.constant 0.000000e+00 : f32
    %260 = vector.broadcast %cst_136 : f32 to vector<1x16x64xf32>
    %261 = tpu.concatenate %259, %260 in 0 : vector<15x16x64xf32>, vector<1x16x64xf32> -> vector<16x16x64xf32>
    %cst_137 = arith.constant 0.000000e+00 : f32
    %262 = vector.broadcast %cst_137 : f32 to vector<16x1x64xf32>
    %263 = vector.extract_strided_slice %261 {offsets = [0, 0, 0], sizes = [16, 15, 64], strides = [1, 1, 1]} : vector<16x16x64xf32> to vector<16x15x64xf32>
    %264 = tpu.concatenate %262, %263 in 1 : vector<16x1x64xf32>, vector<16x15x64xf32> -> vector<16x16x64xf32>
    %c2_138 = arith.constant 2 : index
    %c0_139 = arith.constant 0 : index
    %c0_140 = arith.constant 0 : index
    %265 = vector.load %arg8[%c2_138, %c0_139, %c0_140] : memref<3x3x64xf32, #tpu.memory_space<vmem>>, vector<1x1x64xf32>
    %266 = vector.shape_cast %265 : vector<1x1x64xf32> to vector<64xf32>
    %267 = vector.shape_cast %266 : vector<64xf32> to vector<1x1x64xf32>
    %268 = vector.broadcast %267 : vector<1x1x64xf32> to vector<16x16x64xf32>
    %269 = arith.mulf %264, %268 : vector<16x16x64xf32>
    %270 = arith.addf %258, %269 : vector<16x16x64xf32>
    %271 = vector.extract_strided_slice %200 {offsets = [1, 0, 0], sizes = [15, 16, 64], strides = [1, 1, 1]} : vector<16x16x64xf32> to vector<15x16x64xf32>
    %cst_141 = arith.constant 0.000000e+00 : f32
    %272 = vector.broadcast %cst_141 : f32 to vector<1x16x64xf32>
    %273 = tpu.concatenate %271, %272 in 0 : vector<15x16x64xf32>, vector<1x16x64xf32> -> vector<16x16x64xf32>
    %c2_142 = arith.constant 2 : index
    %c1_143 = arith.constant 1 : index
    %c0_144 = arith.constant 0 : index
    %274 = vector.load %arg8[%c2_142, %c1_143, %c0_144] : memref<3x3x64xf32, #tpu.memory_space<vmem>>, vector<1x1x64xf32>
    %275 = vector.shape_cast %274 : vector<1x1x64xf32> to vector<64xf32>
    %276 = vector.shape_cast %275 : vector<64xf32> to vector<1x1x64xf32>
    %277 = vector.broadcast %276 : vector<1x1x64xf32> to vector<16x16x64xf32>
    %278 = arith.mulf %273, %277 : vector<16x16x64xf32>
    %279 = arith.addf %270, %278 : vector<16x16x64xf32>
    %280 = vector.extract_strided_slice %200 {offsets = [1, 0, 0], sizes = [15, 16, 64], strides = [1, 1, 1]} : vector<16x16x64xf32> to vector<15x16x64xf32>
    %cst_145 = arith.constant 0.000000e+00 : f32
    %281 = vector.broadcast %cst_145 : f32 to vector<1x16x64xf32>
    %282 = tpu.concatenate %280, %281 in 0 : vector<15x16x64xf32>, vector<1x16x64xf32> -> vector<16x16x64xf32>
    %283 = vector.extract_strided_slice %282 {offsets = [0, 1, 0], sizes = [16, 15, 64], strides = [1, 1, 1]} : vector<16x16x64xf32> to vector<16x15x64xf32>
    %cst_146 = arith.constant 0.000000e+00 : f32
    %284 = vector.broadcast %cst_146 : f32 to vector<16x1x64xf32>
    %285 = tpu.concatenate %283, %284 in 1 : vector<16x15x64xf32>, vector<16x1x64xf32> -> vector<16x16x64xf32>
    %c2_147 = arith.constant 2 : index
    %c2_148 = arith.constant 2 : index
    %c0_149 = arith.constant 0 : index
    %286 = vector.load %arg8[%c2_147, %c2_148, %c0_149] : memref<3x3x64xf32, #tpu.memory_space<vmem>>, vector<1x1x64xf32>
    %287 = vector.shape_cast %286 : vector<1x1x64xf32> to vector<64xf32>
    %288 = vector.shape_cast %287 : vector<64xf32> to vector<1x1x64xf32>
    %289 = vector.broadcast %288 : vector<1x1x64xf32> to vector<16x16x64xf32>
    %290 = arith.mulf %285, %289 : vector<16x16x64xf32>
    %291 = arith.addf %279, %290 : vector<16x16x64xf32>
    %c0_150 = arith.constant 0 : index
    %c0_151 = arith.constant 0 : index
    %292 = vector.load %arg9[%c0_150, %c0_151] : memref<1x64xf32, #tpu.memory_space<vmem>>, vector<1x64xf32>
    %293 = vector.shape_cast %292 : vector<1x64xf32> to vector<64xf32>
    %294 = vector.shape_cast %293 : vector<64xf32> to vector<1x1x64xf32>
    %295 = vector.broadcast %294 : vector<1x1x64xf32> to vector<16x16x64xf32>
    %296 = arith.addf %291, %295 : vector<16x16x64xf32>
    %cst_152 = arith.constant 0.000000e+00 : f32
    %297 = vector.broadcast %cst_152 : f32 to vector<16x16x64xf32>
    %298 = arith.maximumf %296, %297 : vector<16x16x64xf32>
    %299 = vector.extract_strided_slice %298 {offsets = [0, 0, 0], sizes = [1, 16, 64], strides = [1, 1, 1]} : vector<16x16x64xf32> to vector<1x16x64xf32>
    %300 = vector.extract_strided_slice %298 {offsets = [2, 0, 0], sizes = [1, 16, 64], strides = [1, 1, 1]} : vector<16x16x64xf32> to vector<1x16x64xf32>
    %301 = vector.extract_strided_slice %298 {offsets = [4, 0, 0], sizes = [1, 16, 64], strides = [1, 1, 1]} : vector<16x16x64xf32> to vector<1x16x64xf32>
    %302 = vector.extract_strided_slice %298 {offsets = [6, 0, 0], sizes = [1, 16, 64], strides = [1, 1, 1]} : vector<16x16x64xf32> to vector<1x16x64xf32>
    %303 = vector.extract_strided_slice %298 {offsets = [8, 0, 0], sizes = [1, 16, 64], strides = [1, 1, 1]} : vector<16x16x64xf32> to vector<1x16x64xf32>
    %304 = vector.extract_strided_slice %298 {offsets = [10, 0, 0], sizes = [1, 16, 64], strides = [1, 1, 1]} : vector<16x16x64xf32> to vector<1x16x64xf32>
    %305 = vector.extract_strided_slice %298 {offsets = [12, 0, 0], sizes = [1, 16, 64], strides = [1, 1, 1]} : vector<16x16x64xf32> to vector<1x16x64xf32>
    %306 = vector.extract_strided_slice %298 {offsets = [14, 0, 0], sizes = [1, 16, 64], strides = [1, 1, 1]} : vector<16x16x64xf32> to vector<1x16x64xf32>
    %307 = tpu.concatenate %299, %300, %301, %302, %303, %304, %305, %306 in 0 : vector<1x16x64xf32>, vector<1x16x64xf32>, vector<1x16x64xf32>, vector<1x16x64xf32>, vector<1x16x64xf32>, vector<1x16x64xf32>, vector<1x16x64xf32>, vector<1x16x64xf32> -> vector<8x16x64xf32>
    %308 = vector.extract_strided_slice %307 {offsets = [0, 0, 0], sizes = [8, 1, 64], strides = [1, 1, 1]} : vector<8x16x64xf32> to vector<8x1x64xf32>
    %309 = vector.extract_strided_slice %307 {offsets = [0, 2, 0], sizes = [8, 1, 64], strides = [1, 1, 1]} : vector<8x16x64xf32> to vector<8x1x64xf32>
    %310 = vector.extract_strided_slice %307 {offsets = [0, 4, 0], sizes = [8, 1, 64], strides = [1, 1, 1]} : vector<8x16x64xf32> to vector<8x1x64xf32>
    %311 = vector.extract_strided_slice %307 {offsets = [0, 6, 0], sizes = [8, 1, 64], strides = [1, 1, 1]} : vector<8x16x64xf32> to vector<8x1x64xf32>
    %312 = vector.extract_strided_slice %307 {offsets = [0, 8, 0], sizes = [8, 1, 64], strides = [1, 1, 1]} : vector<8x16x64xf32> to vector<8x1x64xf32>
    %313 = vector.extract_strided_slice %307 {offsets = [0, 10, 0], sizes = [8, 1, 64], strides = [1, 1, 1]} : vector<8x16x64xf32> to vector<8x1x64xf32>
    %314 = vector.extract_strided_slice %307 {offsets = [0, 12, 0], sizes = [8, 1, 64], strides = [1, 1, 1]} : vector<8x16x64xf32> to vector<8x1x64xf32>
    %315 = vector.extract_strided_slice %307 {offsets = [0, 14, 0], sizes = [8, 1, 64], strides = [1, 1, 1]} : vector<8x16x64xf32> to vector<8x1x64xf32>
    %316 = tpu.concatenate %308, %309, %310, %311, %312, %313, %314, %315 in 1 : vector<8x1x64xf32>, vector<8x1x64xf32>, vector<8x1x64xf32>, vector<8x1x64xf32>, vector<8x1x64xf32>, vector<8x1x64xf32>, vector<8x1x64xf32>, vector<8x1x64xf32> -> vector<8x8x64xf32>
    %317 = vector.shape_cast %316 : vector<8x8x64xf32> to vector<64x64xf32>
    %c0_153 = arith.constant 0 : index
    %c0_154 = arith.constant 0 : index
    %318 = vector.load %arg10[%c0_153, %c0_154] : memref<64x128xf32, #tpu.memory_space<vmem>>, vector<64x128xf32>
    %cst_155 = arith.constant dense<0.000000e+00> : vector<64x128xf32>
    %319 = tpu.matmul %317, %318, %cst_155 {dimension_numbers = #tpu.dot_dimension_numbers<[1], [0], [0], [1], [0, 0, 1, 1], [], []>} : vector<64x64xf32>, vector<64x128xf32>, vector<64x128xf32> -> vector<64x128xf32>
    %c0_156 = arith.constant 0 : index
    %c0_157 = arith.constant 0 : index
    %320 = vector.load %arg11[%c0_156, %c0_157] : memref<1x128xf32, #tpu.memory_space<vmem>>, vector<1x128xf32>
    %321 = vector.shape_cast %320 : vector<1x128xf32> to vector<128xf32>
    %322 = vector.shape_cast %321 : vector<128xf32> to vector<1x128xf32>
    %323 = vector.broadcast %322 : vector<1x128xf32> to vector<64x128xf32>
    %324 = arith.addf %319, %323 : vector<64x128xf32>
    %cst_158 = arith.constant 0.000000e+00 : f32
    %325 = vector.broadcast %cst_158 : f32 to vector<64x128xf32>
    %326 = arith.maximumf %324, %325 : vector<64x128xf32>
    %327 = vector.shape_cast %326 : vector<64x128xf32> to vector<8x8x128xf32>
    %cst_159 = arith.constant 0.000000e+00 : f32
    %328 = vector.broadcast %cst_159 : f32 to vector<8x8x128xf32>
    %cst_160 = arith.constant 0.000000e+00 : f32
    %329 = vector.broadcast %cst_160 : f32 to vector<1x8x128xf32>
    %330 = vector.extract_strided_slice %327 {offsets = [0, 0, 0], sizes = [7, 8, 128], strides = [1, 1, 1]} : vector<8x8x128xf32> to vector<7x8x128xf32>
    %331 = tpu.concatenate %329, %330 in 0 : vector<1x8x128xf32>, vector<7x8x128xf32> -> vector<8x8x128xf32>
    %cst_161 = arith.constant 0.000000e+00 : f32
    %332 = vector.broadcast %cst_161 : f32 to vector<8x1x128xf32>
    %333 = vector.extract_strided_slice %331 {offsets = [0, 0, 0], sizes = [8, 7, 128], strides = [1, 1, 1]} : vector<8x8x128xf32> to vector<8x7x128xf32>
    %334 = tpu.concatenate %332, %333 in 1 : vector<8x1x128xf32>, vector<8x7x128xf32> -> vector<8x8x128xf32>
    %c0_162 = arith.constant 0 : index
    %c0_163 = arith.constant 0 : index
    %c0_164 = arith.constant 0 : index
    %335 = vector.load %arg12[%c0_162, %c0_163, %c0_164] : memref<3x3x128xf32, #tpu.memory_space<vmem>>, vector<1x1x128xf32>
    %336 = vector.shape_cast %335 : vector<1x1x128xf32> to vector<128xf32>
    %337 = vector.shape_cast %336 : vector<128xf32> to vector<1x1x128xf32>
    %338 = vector.broadcast %337 : vector<1x1x128xf32> to vector<8x8x128xf32>
    %339 = arith.mulf %334, %338 : vector<8x8x128xf32>
    %340 = arith.addf %328, %339 : vector<8x8x128xf32>
    %cst_165 = arith.constant 0.000000e+00 : f32
    %341 = vector.broadcast %cst_165 : f32 to vector<1x8x128xf32>
    %342 = vector.extract_strided_slice %327 {offsets = [0, 0, 0], sizes = [7, 8, 128], strides = [1, 1, 1]} : vector<8x8x128xf32> to vector<7x8x128xf32>
    %343 = tpu.concatenate %341, %342 in 0 : vector<1x8x128xf32>, vector<7x8x128xf32> -> vector<8x8x128xf32>
    %c0_166 = arith.constant 0 : index
    %c1_167 = arith.constant 1 : index
    %c0_168 = arith.constant 0 : index
    %344 = vector.load %arg12[%c0_166, %c1_167, %c0_168] : memref<3x3x128xf32, #tpu.memory_space<vmem>>, vector<1x1x128xf32>
    %345 = vector.shape_cast %344 : vector<1x1x128xf32> to vector<128xf32>
    %346 = vector.shape_cast %345 : vector<128xf32> to vector<1x1x128xf32>
    %347 = vector.broadcast %346 : vector<1x1x128xf32> to vector<8x8x128xf32>
    %348 = arith.mulf %343, %347 : vector<8x8x128xf32>
    %349 = arith.addf %340, %348 : vector<8x8x128xf32>
    %cst_169 = arith.constant 0.000000e+00 : f32
    %350 = vector.broadcast %cst_169 : f32 to vector<1x8x128xf32>
    %351 = vector.extract_strided_slice %327 {offsets = [0, 0, 0], sizes = [7, 8, 128], strides = [1, 1, 1]} : vector<8x8x128xf32> to vector<7x8x128xf32>
    %352 = tpu.concatenate %350, %351 in 0 : vector<1x8x128xf32>, vector<7x8x128xf32> -> vector<8x8x128xf32>
    %353 = vector.extract_strided_slice %352 {offsets = [0, 1, 0], sizes = [8, 7, 128], strides = [1, 1, 1]} : vector<8x8x128xf32> to vector<8x7x128xf32>
    %cst_170 = arith.constant 0.000000e+00 : f32
    %354 = vector.broadcast %cst_170 : f32 to vector<8x1x128xf32>
    %355 = tpu.concatenate %353, %354 in 1 : vector<8x7x128xf32>, vector<8x1x128xf32> -> vector<8x8x128xf32>
    %c0_171 = arith.constant 0 : index
    %c2_172 = arith.constant 2 : index
    %c0_173 = arith.constant 0 : index
    %356 = vector.load %arg12[%c0_171, %c2_172, %c0_173] : memref<3x3x128xf32, #tpu.memory_space<vmem>>, vector<1x1x128xf32>
    %357 = vector.shape_cast %356 : vector<1x1x128xf32> to vector<128xf32>
    %358 = vector.shape_cast %357 : vector<128xf32> to vector<1x1x128xf32>
    %359 = vector.broadcast %358 : vector<1x1x128xf32> to vector<8x8x128xf32>
    %360 = arith.mulf %355, %359 : vector<8x8x128xf32>
    %361 = arith.addf %349, %360 : vector<8x8x128xf32>
    %cst_174 = arith.constant 0.000000e+00 : f32
    %362 = vector.broadcast %cst_174 : f32 to vector<8x1x128xf32>
    %363 = vector.extract_strided_slice %327 {offsets = [0, 0, 0], sizes = [8, 7, 128], strides = [1, 1, 1]} : vector<8x8x128xf32> to vector<8x7x128xf32>
    %364 = tpu.concatenate %362, %363 in 1 : vector<8x1x128xf32>, vector<8x7x128xf32> -> vector<8x8x128xf32>
    %c1_175 = arith.constant 1 : index
    %c0_176 = arith.constant 0 : index
    %c0_177 = arith.constant 0 : index
    %365 = vector.load %arg12[%c1_175, %c0_176, %c0_177] : memref<3x3x128xf32, #tpu.memory_space<vmem>>, vector<1x1x128xf32>
    %366 = vector.shape_cast %365 : vector<1x1x128xf32> to vector<128xf32>
    %367 = vector.shape_cast %366 : vector<128xf32> to vector<1x1x128xf32>
    %368 = vector.broadcast %367 : vector<1x1x128xf32> to vector<8x8x128xf32>
    %369 = arith.mulf %364, %368 : vector<8x8x128xf32>
    %370 = arith.addf %361, %369 : vector<8x8x128xf32>
    %c1_178 = arith.constant 1 : index
    %c1_179 = arith.constant 1 : index
    %c0_180 = arith.constant 0 : index
    %371 = vector.load %arg12[%c1_178, %c1_179, %c0_180] : memref<3x3x128xf32, #tpu.memory_space<vmem>>, vector<1x1x128xf32>
    %372 = vector.shape_cast %371 : vector<1x1x128xf32> to vector<128xf32>
    %373 = vector.shape_cast %372 : vector<128xf32> to vector<1x1x128xf32>
    %374 = vector.broadcast %373 : vector<1x1x128xf32> to vector<8x8x128xf32>
    %375 = arith.mulf %327, %374 : vector<8x8x128xf32>
    %376 = arith.addf %370, %375 : vector<8x8x128xf32>
    %377 = vector.extract_strided_slice %327 {offsets = [0, 1, 0], sizes = [8, 7, 128], strides = [1, 1, 1]} : vector<8x8x128xf32> to vector<8x7x128xf32>
    %cst_181 = arith.constant 0.000000e+00 : f32
    %378 = vector.broadcast %cst_181 : f32 to vector<8x1x128xf32>
    %379 = tpu.concatenate %377, %378 in 1 : vector<8x7x128xf32>, vector<8x1x128xf32> -> vector<8x8x128xf32>
    %c1_182 = arith.constant 1 : index
    %c2_183 = arith.constant 2 : index
    %c0_184 = arith.constant 0 : index
    %380 = vector.load %arg12[%c1_182, %c2_183, %c0_184] : memref<3x3x128xf32, #tpu.memory_space<vmem>>, vector<1x1x128xf32>
    %381 = vector.shape_cast %380 : vector<1x1x128xf32> to vector<128xf32>
    %382 = vector.shape_cast %381 : vector<128xf32> to vector<1x1x128xf32>
    %383 = vector.broadcast %382 : vector<1x1x128xf32> to vector<8x8x128xf32>
    %384 = arith.mulf %379, %383 : vector<8x8x128xf32>
    %385 = arith.addf %376, %384 : vector<8x8x128xf32>
    %386 = vector.extract_strided_slice %327 {offsets = [1, 0, 0], sizes = [7, 8, 128], strides = [1, 1, 1]} : vector<8x8x128xf32> to vector<7x8x128xf32>
    %cst_185 = arith.constant 0.000000e+00 : f32
    %387 = vector.broadcast %cst_185 : f32 to vector<1x8x128xf32>
    %388 = tpu.concatenate %386, %387 in 0 : vector<7x8x128xf32>, vector<1x8x128xf32> -> vector<8x8x128xf32>
    %cst_186 = arith.constant 0.000000e+00 : f32
    %389 = vector.broadcast %cst_186 : f32 to vector<8x1x128xf32>
    %390 = vector.extract_strided_slice %388 {offsets = [0, 0, 0], sizes = [8, 7, 128], strides = [1, 1, 1]} : vector<8x8x128xf32> to vector<8x7x128xf32>
    %391 = tpu.concatenate %389, %390 in 1 : vector<8x1x128xf32>, vector<8x7x128xf32> -> vector<8x8x128xf32>
    %c2_187 = arith.constant 2 : index
    %c0_188 = arith.constant 0 : index
    %c0_189 = arith.constant 0 : index
    %392 = vector.load %arg12[%c2_187, %c0_188, %c0_189] : memref<3x3x128xf32, #tpu.memory_space<vmem>>, vector<1x1x128xf32>
    %393 = vector.shape_cast %392 : vector<1x1x128xf32> to vector<128xf32>
    %394 = vector.shape_cast %393 : vector<128xf32> to vector<1x1x128xf32>
    %395 = vector.broadcast %394 : vector<1x1x128xf32> to vector<8x8x128xf32>
    %396 = arith.mulf %391, %395 : vector<8x8x128xf32>
    %397 = arith.addf %385, %396 : vector<8x8x128xf32>
    %398 = vector.extract_strided_slice %327 {offsets = [1, 0, 0], sizes = [7, 8, 128], strides = [1, 1, 1]} : vector<8x8x128xf32> to vector<7x8x128xf32>
    %cst_190 = arith.constant 0.000000e+00 : f32
    %399 = vector.broadcast %cst_190 : f32 to vector<1x8x128xf32>
    %400 = tpu.concatenate %398, %399 in 0 : vector<7x8x128xf32>, vector<1x8x128xf32> -> vector<8x8x128xf32>
    %c2_191 = arith.constant 2 : index
    %c1_192 = arith.constant 1 : index
    %c0_193 = arith.constant 0 : index
    %401 = vector.load %arg12[%c2_191, %c1_192, %c0_193] : memref<3x3x128xf32, #tpu.memory_space<vmem>>, vector<1x1x128xf32>
    %402 = vector.shape_cast %401 : vector<1x1x128xf32> to vector<128xf32>
    %403 = vector.shape_cast %402 : vector<128xf32> to vector<1x1x128xf32>
    %404 = vector.broadcast %403 : vector<1x1x128xf32> to vector<8x8x128xf32>
    %405 = arith.mulf %400, %404 : vector<8x8x128xf32>
    %406 = arith.addf %397, %405 : vector<8x8x128xf32>
    %407 = vector.extract_strided_slice %327 {offsets = [1, 0, 0], sizes = [7, 8, 128], strides = [1, 1, 1]} : vector<8x8x128xf32> to vector<7x8x128xf32>
    %cst_194 = arith.constant 0.000000e+00 : f32
    %408 = vector.broadcast %cst_194 : f32 to vector<1x8x128xf32>
    %409 = tpu.concatenate %407, %408 in 0 : vector<7x8x128xf32>, vector<1x8x128xf32> -> vector<8x8x128xf32>
    %410 = vector.extract_strided_slice %409 {offsets = [0, 1, 0], sizes = [8, 7, 128], strides = [1, 1, 1]} : vector<8x8x128xf32> to vector<8x7x128xf32>
    %cst_195 = arith.constant 0.000000e+00 : f32
    %411 = vector.broadcast %cst_195 : f32 to vector<8x1x128xf32>
    %412 = tpu.concatenate %410, %411 in 1 : vector<8x7x128xf32>, vector<8x1x128xf32> -> vector<8x8x128xf32>
    %c2_196 = arith.constant 2 : index
    %c2_197 = arith.constant 2 : index
    %c0_198 = arith.constant 0 : index
    %413 = vector.load %arg12[%c2_196, %c2_197, %c0_198] : memref<3x3x128xf32, #tpu.memory_space<vmem>>, vector<1x1x128xf32>
    %414 = vector.shape_cast %413 : vector<1x1x128xf32> to vector<128xf32>
    %415 = vector.shape_cast %414 : vector<128xf32> to vector<1x1x128xf32>
    %416 = vector.broadcast %415 : vector<1x1x128xf32> to vector<8x8x128xf32>
    %417 = arith.mulf %412, %416 : vector<8x8x128xf32>
    %418 = arith.addf %406, %417 : vector<8x8x128xf32>
    %c0_199 = arith.constant 0 : index
    %c0_200 = arith.constant 0 : index
    %419 = vector.load %arg13[%c0_199, %c0_200] : memref<1x128xf32, #tpu.memory_space<vmem>>, vector<1x128xf32>
    %420 = vector.shape_cast %419 : vector<1x128xf32> to vector<128xf32>
    %421 = vector.shape_cast %420 : vector<128xf32> to vector<1x1x128xf32>
    %422 = vector.broadcast %421 : vector<1x1x128xf32> to vector<8x8x128xf32>
    %423 = arith.addf %418, %422 : vector<8x8x128xf32>
    %cst_201 = arith.constant 0.000000e+00 : f32
    %424 = vector.broadcast %cst_201 : f32 to vector<8x8x128xf32>
    %425 = arith.maximumf %423, %424 : vector<8x8x128xf32>
    %426 = vector.shape_cast %425 : vector<8x8x128xf32> to vector<64x128xf32>
    %c0_202 = arith.constant 0 : index
    %c0_203 = arith.constant 0 : index
    %427 = vector.load %arg14[%c0_202, %c0_203] : memref<128x128xf32, #tpu.memory_space<vmem>>, vector<128x128xf32>
    %cst_204 = arith.constant dense<0.000000e+00> : vector<64x128xf32>
    %428 = tpu.matmul %426, %427, %cst_204 {dimension_numbers = #tpu.dot_dimension_numbers<[1], [0], [0], [1], [0, 0, 1, 1], [], []>} : vector<64x128xf32>, vector<128x128xf32>, vector<64x128xf32> -> vector<64x128xf32>
    %c0_205 = arith.constant 0 : index
    %c0_206 = arith.constant 0 : index
    %429 = vector.load %arg15[%c0_205, %c0_206] : memref<1x128xf32, #tpu.memory_space<vmem>>, vector<1x128xf32>
    %430 = vector.shape_cast %429 : vector<1x128xf32> to vector<128xf32>
    %431 = vector.shape_cast %430 : vector<128xf32> to vector<1x128xf32>
    %432 = vector.broadcast %431 : vector<1x128xf32> to vector<64x128xf32>
    %433 = arith.addf %428, %432 : vector<64x128xf32>
    %cst_207 = arith.constant 0.000000e+00 : f32
    %434 = vector.broadcast %cst_207 : f32 to vector<64x128xf32>
    %435 = arith.maximumf %433, %434 : vector<64x128xf32>
    %436 = vector.shape_cast %435 : vector<64x128xf32> to vector<8x8x128xf32>
    %437 = vector.shape_cast %436 : vector<8x8x128xf32> to vector<1x8x8x128xf32>
    %c0_208 = arith.constant 0 : index
    %c0_209 = arith.constant 0 : index
    %c0_210 = arith.constant 0 : index
    %c0_211 = arith.constant 0 : index
    %438 = vector.load %arg16[%c0_208, %c0_209, %c0_210, %c0_211] : memref<1x8x8x128xf32, #tpu.memory_space<vmem>>, vector<1x8x8x128xf32>
    tpu.vector_store %arg16[%c0_208, %c0_209, %c0_210, %c0_211], %437 {strides = array<i32>} : memref<1x8x8x128xf32, #tpu.memory_space<vmem>>, vector<1x8x8x128xf32>,
    return
  }
  func.func @transform_0(%arg0: i32) -> (i32, i32, i32, i32) {
    %c0_i32 = arith.constant 0 : i32
    %c0_i32_0 = arith.constant 0 : i32
    %c0_i32_1 = arith.constant 0 : i32
    %c0_i32_2 = arith.constant 0 : i32
    return %arg0, %c0_i32, %c0_i32_0, %c0_i32_1 : i32, i32, i32, i32
  }
  func.func @transform_1(%arg0: i32) -> (i32, i32, i32, i32) {
    %c0_i32 = arith.constant 0 : i32
    %c0_i32_0 = arith.constant 0 : i32
    %c0_i32_1 = arith.constant 0 : i32
    %c0_i32_2 = arith.constant 0 : i32
    %c0_i32_3 = arith.constant 0 : i32
    return %c0_i32, %c0_i32_0, %c0_i32_1, %c0_i32_2 : i32, i32, i32, i32
  }
  func.func @transform_2(%arg0: i32) -> (i32, i32) {
    %c0_i32 = arith.constant 0 : i32
    %c0_i32_0 = arith.constant 0 : i32
    %c0_i32_1 = arith.constant 0 : i32
    return %c0_i32, %c0_i32_0 : i32, i32
  }
  func.func @transform_3(%arg0: i32) -> (i32, i32, i32) {
    %c0_i32 = arith.constant 0 : i32
    %c0_i32_0 = arith.constant 0 : i32
    %c0_i32_1 = arith.constant 0 : i32
    %c0_i32_2 = arith.constant 0 : i32
    return %c0_i32, %c0_i32_0, %c0_i32_1 : i32, i32, i32
  }
  func.func @transform_4(%arg0: i32) -> (i32, i32) {
    %c0_i32 = arith.constant 0 : i32
    %c0_i32_0 = arith.constant 0 : i32
    %c0_i32_1 = arith.constant 0 : i32
    return %c0_i32, %c0_i32_0 : i32, i32
  }
  func.func @transform_5(%arg0: i32) -> (i32, i32) {
    %c0_i32 = arith.constant 0 : i32
    %c0_i32_0 = arith.constant 0 : i32
    %c0_i32_1 = arith.constant 0 : i32
    return %c0_i32, %c0_i32_0 : i32, i32
  }
  func.func @transform_6(%arg0: i32) -> (i32, i32) {
    %c0_i32 = arith.constant 0 : i32
    %c0_i32_0 = arith.constant 0 : i32
    %c0_i32_1 = arith.constant 0 : i32
    return %c0_i32, %c0_i32_0 : i32, i32
  }
  func.func @transform_7(%arg0: i32) -> (i32, i32, i32) {
    %c0_i32 = arith.constant 0 : i32
    %c0_i32_0 = arith.constant 0 : i32
    %c0_i32_1 = arith.constant 0 : i32
    %c0_i32_2 = arith.constant 0 : i32
    return %c0_i32, %c0_i32_0, %c0_i32_1 : i32, i32, i32
  }
  func.func @transform_8(%arg0: i32) -> (i32, i32) {
    %c0_i32 = arith.constant 0 : i32
    %c0_i32_0 = arith.constant 0 : i32
    %c0_i32_1 = arith.constant 0 : i32
    return %c0_i32, %c0_i32_0 : i32, i32
  }
  func.func @transform_9(%arg0: i32) -> (i32, i32) {
    %c0_i32 = arith.constant 0 : i32
    %c0_i32_0 = arith.constant 0 : i32
    %c0_i32_1 = arith.constant 0 : i32
    return %c0_i32, %c0_i32_0 : i32, i32
  }
  func.func @transform_10(%arg0: i32) -> (i32, i32) {
    %c0_i32 = arith.constant 0 : i32
    %c0_i32_0 = arith.constant 0 : i32
    %c0_i32_1 = arith.constant 0 : i32
    return %c0_i32, %c0_i32_0 : i32, i32
  }
  func.func @transform_11(%arg0: i32) -> (i32, i32, i32) {
    %c0_i32 = arith.constant 0 : i32
    %c0_i32_0 = arith.constant 0 : i32
    %c0_i32_1 = arith.constant 0 : i32
    %c0_i32_2 = arith.constant 0 : i32
    return %c0_i32, %c0_i32_0, %c0_i32_1 : i32, i32, i32
  }
  func.func @transform_12(%arg0: i32) -> (i32, i32) {
    %c0_i32 = arith.constant 0 : i32
    %c0_i32_0 = arith.constant 0 : i32
    %c0_i32_1 = arith.constant 0 : i32
    return %c0_i32, %c0_i32_0 : i32, i32
  }
  func.func @transform_13(%arg0: i32) -> (i32, i32) {
    %c0_i32 = arith.constant 0 : i32
    %c0_i32_0 = arith.constant 0 : i32
    %c0_i32_1 = arith.constant 0 : i32
    return %c0_i32, %c0_i32_0 : i32, i32
  }
  func.func @transform_14(%arg0: i32) -> (i32, i32) {
    %c0_i32 = arith.constant 0 : i32
    %c0_i32_0 = arith.constant 0 : i32
    %c0_i32_1 = arith.constant 0 : i32
    return %c0_i32, %c0_i32_0 : i32, i32
  }
  func.func @transform_15(%arg0: i32) -> (i32, i32, i32, i32) {
    %c0_i32 = arith.constant 0 : i32
    %c0_i32_0 = arith.constant 0 : i32
    %c0_i32_1 = arith.constant 0 : i32
    %c0_i32_2 = arith.constant 0 : i32
    return %arg0, %c0_i32, %c0_i32_0, %c0_i32_1 : i32, i32, i32, i32
  }
}

</mosaic_0001>

<bundles_post_ra>
// kernel: mobile_tree_root_net.1
= control target key start
LH: loop header
LB: loop body
LE: loop exit
PB: predicated region body
PF: predicated region fallthrough
CT: control target
= control target key end

     0   :  { %s8927_s0 = inlined_call_operand.vmem [shape: f32[2,16,16,3], index: 0, kind: input, shape index: {}]   ;;  %s8928_s1 = inlined_call_operand.vmem [shape: f32[3,3,3,32], index: 1, kind: input, shape index: {}]   ;;  %s8929_s2 = inlined_call_operand.vmem [shape: f32[1,32], index: 2, kind: input, shape index: {}]   ;;  %s8930_s3 = inlined_call_operand.vmem [shape: f32[3,3,32], index: 3, kind: input, shape index: {}]   ;;  %s8931_s4 = inlined_call_operand.vmem [shape: f32[1,32], index: 4, kind: input, shape index: {}]   ;;  %s8932_s5 = inlined_call_operand.vmem [shape: f32[32,64], index: 5, kind: input, shape index: {}]   ;;  %s8933_s6 = inlined_call_operand.vmem [shape: f32[1,64], index: 6, kind: input, shape index: {}]   ;;  %s8934_s7 = inlined_call_operand.vmem [shape: f32[3,3,64], index: 7, kind: input, shape index: {}]   ;;  %s8935_s8 = inlined_call_operand.vmem [shape: f32[1,64], index: 8, kind: input, shape index: {}]   ;;  %s8936_s9 = inlined_call_operand.vmem [shape: f32[64,128], index: 9, kind: input, shape index: {}]   ;;  %s8937_s10 = inlined_call_operand.vmem [shape: f32[1,128], index: 10, kind: input, shape index: {}]   ;;  %s8938_s11 = inlined_call_operand.vmem [shape: f32[3,3,128], index: 11, kind: input, shape index: {}]   ;;  %s8939_s12 = inlined_call_operand.vmem [shape: f32[1,128], index: 12, kind: input, shape index: {}]   ;;  %s8940_s13 = inlined_call_operand.vmem [shape: f32[128,128], index: 13, kind: input, shape index: {}]   ;;  %s8941_s14 = inlined_call_operand.vmem [shape: f32[1,128], index: 14, kind: input, shape index: {}]   ;;  %s8942_s15 = inlined_call_operand.hbm [shape: f32[2,8,8,128], index: 15, kind: output, shape index: {}]  }
   0x1   :  { %9031 = sst [smem:[#allocation79_spill]] %s8927_s0 }
   0x2   :  { %9032 = sst [smem:[#allocation80_spill]] %s8928_s1 }
   0x3   :  { %9033 = sst [smem:[#allocation81_spill]] %s8929_s2 }
   0x4   :  { %9034 = sst [smem:[#allocation82_spill]] %s8930_s3 }
   0x5   :  { %9035 = sst [smem:[#allocation83_spill]] %s8931_s4 }
   0x6   :  { %20 = vsyncpa [#allocation3], 0 }
   0x7   :  { %22 = vsyncpa [#allocation3 + $0x1], 0  ;;  %s5351_s18 = smov 0   ;;  %s5353_s19 = smov 0  }
   0x8   :  { %s5355_s20 = smov 0   ;;  %s5357_s21 = smov 0  }
   0x9 LB: > { %s5372_s22 = sadd.s32 4294967295, %s5266_s21   ;;  %s4693_s23 = sadd.s32 4294967294, %s5266_s21   ;;  %s5266_s21 = sphi %s5357_s21, %s9352_s21   ;;  %s5262_s20 = sphi %s5355_s20, %s9351_s20   ;;  %s5258_s19 = sphi %s5353_s19, %s9350_s19   ;;  %s5254_s18 = sphi %s5351_s18, %s9349_s18  }
   0xa   : > { %s5376_s24 = sadd.s32 1, %s5266_s21   ;;  %s355_s25 = sadd.s32 1, %s5262_s20 }
   0xb   : > { %s352_s26 = ssub.s32 %s5266_s21, %s5376_s24  ;;  %p365_p0 = scmp.ne.s32.totalorder %s5262_s20, %s5258_s19 }
   0xc   : > { %p353_p1 = scmp.eq.s32.totalorder %s352_s26, 0  ;;  %p366_p2 = scmp.eq.s32.totalorder %s5372_s22, 1 }
   0xd   : > { %p371_p3 = scmp.ne.s32.totalorder %s5258_s19, %s5254_s18  ;;  %p372_p4 = scmp.eq.s32.totalorder %s4693_s23, 1 }
   0xe   : > { %s5387_s27 = scalar_select %p353_p1, %s5262_s20, %s355_s25  }
   0xf   : > { %p5389_p5 = por %p366_p2, %p365_p0  ;;  %p5393_p6 = por %p372_p4, %p371_p3 }
  0x10   : > { %p4696_p7 = scmp.ge.s32.totalorder %s5266_s21, 1  ;;  %p440_p8 = scmp.lt.s32.totalorder %s5266_s21, 3 }
  0x12   : > { %p441_p9 = pnand %p4696_p7, %p440_p8 }
  0x14   : > { %444 = sbr.rel (%p441_p9) target bundleno = 1359 (0x54f), region = 80 }
  0x19   : > { %s9038_s1 = sld [smem:[#allocation80_spill]]  ;;  %vm702_vm0 = vcmask 1042432   ;;  %v8943_v2 = vmov 0.0   ;;  %vm556_vm1 = vcmask 1040384   ;;  %vm639_vm2 = vcmask 23552   ;;  %p488_p10 = scmp.lt.s32.totalorder %s5372_s22, 1 }
  0x1a   : > { %v5407_v3 = vrot.slane %v8943_v2, 7  ;;  %s9041_s0 = sld [smem:[#allocation79_spill]]  ;;  %vm1015_vm3 = vcmask 1046528   ;;  %vm3215_vm4 = vcmask 261120   ;;  %vm4160_vm5 = vcmask 1041408   ;;  %s9030_s17 = sand.u32 1, %s5258_s19  }
  0x1b   : > { %s489_s30 = scalar_select %p488_p10, %s5372_s22, 1  ;;  %vm4177_vm6 = vcmask 1043456   ;;  %vm4186_vm7 = vcmask 1044480   ;;  %vm4195_vm8 = vcmask 1045504   ;;  %vm4224_vm9 = vcmask 523264  }
  0x1c   : > { %9039 = vst [vmem:[#allocation5_spill] sm:$0xff] %v5407_v3  ;;  %v5419_v5 = vsel %vm556_vm1, 0.0, %v5407_v3  ;;  %s9215_s2 = sld [smem:[#allocation81_spill]]  ;;  %s5224_s23 = scalar_lea.hbm %s8942_s15, 128 }
  0x1d   : > { %9040 = vst [vmem:[#allocation6_spill] sm:$0xff] %v5419_v5  ;;  %s5064_s16 = sshll.u32 %s489_s30, 8  ;;  %s9216_s3 = sld [smem:[#allocation82_spill]] }
  0x1e   : > { %s9243_s4 = sld [smem:[#allocation83_spill]]  ;;  %s4697_s30 = sshll.u32 %s9030_s17, 6 }
  0x1f   : > { %v4700_v0 = vld [vmem:[%s9038_s1 + $0x4] sm:$0x7]  ;;  %v4833_v1 = vld [vmem:[%s9038_s1 + $0x10] sm:$0x7]  ;;  %v636_v4 = vld [vmem:[%s9038_s1] sm:$0x7] }
  0x20   : > { %4701 = vmatpush.msk.msra.mxu0 %vm702_vm0, %v4700_v0  ;;  %5066 = vmatpush.msk.msra.mxu2 %vm702_vm0, %v4700_v0  ;;  %s5428_s25 = scalar_lea.vmem %s9041_s0, %s5064_s16  ;;  %v4765_v20 = vld [vmem:[%s9038_s1 + $0x8] sm:$0x7]  ;;  %v4799_v24 = vld [vmem:[%s9038_s1 + $0xc] sm:$0x7]  ;;  %s8841_s0 = scalar_lea.vmem [#allocation2], %s4697_s30 }
  0x21   : > { %722 = vmatmul.f32.vlgmr.msra.gmra.mxu0 %v8943_v2  ;;  %4732 = vmatpush.msk.msra.mxu1 %vm702_vm0, %v636_v4  ;;  %v5431_v6 = vld [vmem:[%s5428_s25 + $0x90] sm:$0xff]  ;;  %v5437_v8 = vld [vmem:[%s5428_s25 + $0x98] sm:$0xff]  ;;  %v5440_v9 = vld [vmem:[%s5428_s25] sm:$0xff]  ;;  %s5065_s16 = sshll.u32 %s5372_s22, 6  ;;  %s4628_s30 = sshll.u32 %s8841_s0, 4  ;;  %s4629_s30 = int_to_ptr.vmem [resolvable:$true] %s4628_s30 }
  0x22   : > { %4834 = vmatpush.msk.msrb.mxu0 %vm702_vm0, %v4833_v1  ;;  %5067 = vmatpush.msk.msra.mxu3 %vm702_vm0, %v636_v4  ;;  %v586_v7 = vrot.slane %v5431_v6, 7  ;;  %v587_v11 = vrot.slane %v5437_v8, 7  ;;  %v559_v12 = vrot.slane %v5440_v9, 7  ;;  %v5461_v15 = vld [vmem:[%s5428_s25 + $0xa0] sm:$0xff]  ;;  %v5466_v16 = vld [vmem:[%s5428_s25 + $0x8] sm:$0xff]  ;;  %v5492_v23 = vld [vmem:[%s5428_s25 + $0x10] sm:$0xff]  ;;  %s4627_s26 = scalar_lea.hbm %s8942_s15, %s5065_s16 }
  0x23   : > { %4733 = vmatmul.msk.f32.vlgmr.msra.gmra.mxu1 %vm639_vm2, %v5419_v5  ;;  %4720 = vmatmul.msk.f32.vlgmr.msra.gmra.mxu2 %vm639_vm2, %v5431_v6  ;;  %v589_v17 = vrot.slane %v5461_v15, 7  ;;  %v560_v18 = vrot.slane %v5466_v16, 7  ;;  %v5486_v22 = vld [vmem:[%s5428_s25 + $0xa8] sm:$0xff]  ;;  %9042 = vst [vmem:[#allocation7_spill] sm:$0xff] %v5492_v23  ;;  %v562_v26 = vrot.slane %v5492_v23, 7  ;;  %v5513_v29 = vld [vmem:[%s5428_s25 + $0xb0] sm:$0xff] }
  0x24   : > { %v5444_v10 = vsel %vm556_vm1, 0.0, %v586_v7  ;;  %v5455_v13 = vsel %vm556_vm1, %v586_v7, %v587_v11  ;;  %v5458_v14 = vsel %vm556_vm1, 0.0, %v559_v12  ;;  %4766 = vmatpush.msk.msrb.mxu2 %vm702_vm0, %v4765_v20  ;;  %v590_v25 = vrot.slane %v5486_v22, 7  ;;  %4800 = vmatpush.msk.msrb.mxu3 %vm702_vm0, %v4799_v24  ;;  %v5518_v30 = vld [vmem:[%s5428_s25 + $0x18] sm:$0xff]  ;;  %v5540_v36 = vld [vmem:[%s5428_s25 + $0x20] sm:$0xff]  ;;  %v5562_v42 = vld [vmem:[%s5428_s25 + $0x28] sm:$0xff] }
  0x25   : > { %4753 = vmatmul.msk.f32.vlgmr.msra.gmra.mxu3 %vm639_vm2, %v5444_v10  ;;  %v5477_v19 = vsel %vm556_vm1, 0.0, %v589_v17  ;;  %v5483_v21 = vsel %vm556_vm1, %v559_v12, %v560_v18  ;;  %v5510_v28 = vsel %vm556_vm1, 0.0, %v562_v26  ;;  %9044 = vst [vmem:[#allocation9_spill] sm:$0xff] %v5518_v30  ;;  %v592_v31 = vrot.slane %v5513_v29, 7  ;;  %v5535_v35 = vld [vmem:[%s5428_s25 + $0xb8] sm:$0xff]  ;;  %v5557_v41 = vld [vmem:[%s5428_s25 + $0xc0] sm:$0xff] }
  0x26   : > { %v5507_v27 = vsel %vm556_vm1, %v589_v17, %v590_v25  ;;  %9043 = vst [vmem:[#allocation8_spill] sm:$0xff] %v5510_v28  ;;  %v563_v32 = vrot.slane %v5518_v30, 7  ;;  %v593_v37 = vrot.slane %v5535_v35, 7  ;;  %v565_v38 = vrot.slane %v5540_v36, 7  ;;  %v5579_v47 = vld [vmem:[%s5428_s25 + $0xc8] sm:$0xff]  ;;  %v5584_v48 = vld [vmem:[%s5428_s25 + $0x30] sm:$0xff] }
  0x27   : > { %v5529_v33 = vsel %vm556_vm1, 0.0, %v592_v31  ;;  %9046 = vst [vmem:[#allocation11_spill] sm:$0xff] %v5540_v36  ;;  %v595_v43 = vrot.slane %v5557_v41, 7  ;;  %v566_v44 = vrot.slane %v5562_v42, 7  ;;  %v596_v49 = vrot.slane %v5579_v47, 7  ;;  %v5601_v53 = vld [vmem:[%s5428_s25 + $0xd0] sm:$0xff] }
  0x28   : > { %v5532_v34 = vsel %vm556_vm1, %v562_v26, %v563_v32  ;;  %v5551_v39 = vsel %vm556_vm1, %v592_v31, %v593_v37  ;;  %v5554_v40 = vsel %vm556_vm1, 0.0, %v565_v38  ;;  %9049 = vst [vmem:[#allocation14_spill] sm:$0xff] %v5557_v41  ;;  %v568_v50 = vrot.slane %v5584_v48, 7  ;;  %v5606_v54 = vld [vmem:[%s5428_s25 + $0x38] sm:$0xff]  ;;  %v5628_v60 = vld [vmem:[%s5428_s25 + $0x40] sm:$0xff]  ;;  %v5650_v4 = vld [vmem:[%s5428_s25 + $0x48] sm:$0xff] }
  0x29   : > { %725 = vmatmul.f32.gmra.mxu0 %v8943_v2  ;;  %9045 = vst [vmem:[#allocation10_spill] sm:$0xff] %v5532_v34  ;;  %v5573_v45 = vsel %vm556_vm1, 0.0, %v595_v43  ;;  %v5576_v46 = vsel %vm556_vm1, %v565_v38, %v566_v44  ;;  %v5595_v51 = vsel %vm556_vm1, %v595_v43, %v596_v49  ;;  %v598_v55 = vrot.slane %v5601_v53, 7  ;;  %v5623_v59 = vld [vmem:[%s5428_s25 + $0xd8] sm:$0xff]  ;;  %v5645_v1 = vld [vmem:[%s5428_s25 + $0xe0] sm:$0xff]  ;;  %v5667_v18 = vld [vmem:[%s5428_s25 + $0xe8] sm:$0xff] }
  0x2a   : > { %9047 = vst [vmem:[#allocation12_spill] sm:$0xff] %v5551_v39  ;;  %v5598_v52 = vsel %vm556_vm1, 0.0, %v568_v50  ;;  %v569_v56 = vrot.slane %v5606_v54, 7  ;;  %v599_v61 = vrot.slane %v5623_v59, 7  ;;  %v571_v62 = vrot.slane %v5628_v60, 7  ;;  %v5672_v20 = vld [vmem:[%s5428_s25 + $0x50] sm:$0xff] }
  0x2b   : > { %4734 = vmatmul.msk.f32.gmra.mxu1 %vm639_vm2, %v5407_v3  ;;  %4721 = vmatmul.msk.f32.gmra.mxu2 %vm639_vm2, %v5437_v8  ;;  %9048 = vst [vmem:[#allocation13_spill] sm:$0xff] %v5554_v40  ;;  %v5617_v57 = vsel %vm556_vm1, 0.0, %v598_v55  ;;  %v601_v7 = vrot.slane %v5645_v1, 7  ;;  %v572_v11 = vrot.slane %v5650_v4, 7  ;;  %v602_v24 = vrot.slane %v5667_v18, 7  ;;  %v5691_v32 = vld [vmem:[%s5428_s25 + $0x58] sm:$0xff] }
  0x2c   : > { %9050 = vst [vmem:[#allocation15_spill] sm:$0xff] %v5573_v45  ;;  %v5620_v58 = vsel %vm556_vm1, %v568_v50, %v569_v56  ;;  %v5639_v63 = vsel %vm556_vm1, %v598_v55, %v599_v61  ;;  %v5642_v0 = vsel %vm556_vm1, 0.0, %v571_v62  ;;  %v574_v25 = vrot.slane %v5672_v20, 7  ;;  %v5709_v44 = vld [vmem:[%s5428_s25 + $0x60] sm:$0xff]  ;;  %v5730_v61 = vld [vmem:[%s5428_s25 + $0x68] sm:$0xff]  ;;  %s4630_s17 = sshll.u32 %s4627_s26, 4  ;;  %s4631_s17 = int_to_ptr.hbm [resolvable:$true] %s4630_s17 }
  0x2d   : > { %4754 = vmatmul.msk.f32.gmra.mxu3 %vm639_vm2, %v5455_v13  ;;  %9051 = vst [vmem:[#allocation16_spill] sm:$0xff] %v5576_v46  ;;  %v5661_v12 = vsel %vm556_vm1, 0.0, %v601_v7  ;;  %v5664_v17 = vsel %vm556_vm1, %v571_v62, %v572_v11  ;;  %v5683_v26 = vsel %vm556_vm1, %v601_v7, %v602_v24  ;;  %v5698_v37 = vrot.slane %v8943_v2, 1  ;;  %v4901_v11 = vld [vmem:[%s9038_s1 + $0x18] sm:$0x7] }
  0x2e   : > { %9052 = vst [vmem:[#allocation17_spill] sm:$0xff] %v5579_v47  ;;  %v5686_v31 = vsel %vm556_vm1, 0.0, %v574_v25  ;;  %v575_v38 = vrot.slane %v5691_v32, 7  ;;  %v577_v50 = vrot.slane %v5709_v44, 7  ;;  %v1018_v56 = vrot.slane %v5440_v9, 1  ;;  %4902 = vmatpush.msk.msra.mxu2 %vm702_vm0, %v4901_v11 }
  0x2f   : > { %9053 = vst [vmem:[#allocation18_spill] sm:$0xff] %v5595_v51  ;;  %v5717_v49 = vsel %vm1015_vm3, %v5698_v37, 0.0  ;;  %v578_v7 = vrot.slane %v5730_v61, 7  ;;  %v1021_v2 = vrot.slane %v5492_v23, 1  ;;  %v4867_v3 = vld [vmem:[%s9038_s1 + $0x14] sm:$0x7] }
  0x30   : > { %9054 = vst [vmem:[#allocation19_spill] sm:$0xff] %v5598_v52  ;;  %v5704_v43 = vsel %vm556_vm1, %v574_v25, %v575_v38  ;;  %v5723_v55 = vsel %vm556_vm1, 0.0, %v577_v50  ;;  %v4935_v25 = vld [vmem:[%s9038_s1 + $0x1c] sm:$0x7]  ;;  %4868 = vmatpush.msk.msrb.mxu1 %vm702_vm0, %v4867_v3 }
  0x31   : > { %4702 = vmatmul.msk.f32.gmra.mxu0 %vm639_vm2, %v5440_v9  ;;  %9055 = vst [vmem:[#allocation20_spill] sm:$0xff] %v5601_v53  ;;  %v5746_v24 = vsel %vm556_vm1, %v577_v50, %v578_v7  ;;  %4936 = vmatpush.msk.msra.mxu3 %vm702_vm0, %v4935_v25  ;;  %v4967_v25 = vld [vmem:[%s9038_s1 + $0x20] sm:$0x7]  ;;  %s9348_s1 = sand.u32 1, %s5258_s19  }
  0x32   : > { %9056 = vst [vmem:[#allocation21_spill] sm:$0xff] %v5617_v57  ;;  %4968 = vmatpush.msk.msra.mxu0 %vm702_vm0, %v4967_v25 }
  0x33   : > { %4735 = vmatmul.msk.f32.gmra.mxu1 %vm639_vm2, %v5458_v14  ;;  %4722 = vmatmul.msk.f32.gmra.mxu2 %vm639_vm2, %v5461_v15  ;;  %9057 = vst [vmem:[#allocation22_spill] sm:$0xff] %v5620_v58 }
  0x34   : > { %9058 = vst [vmem:[#allocation23_spill] sm:$0xff] %v5623_v59 }
  0x35   : > { %4755 = vmatmul.msk.f32.gmra.mxu3 %vm639_vm2, %v5477_v19  ;;  %9059 = vst [vmem:[#allocation24_spill] sm:$0xff] %v5639_v63 }
  0x36   : > { %9060 = vst [vmem:[#allocation25_spill] sm:$0xff] %v5642_v0 }
  0x37   : > { %9061 = vst [vmem:[#allocation26_spill] sm:$0xff] %v5645_v1 }
  0x38   : > { %9062 = vst [vmem:[#allocation27_spill] sm:$0xff] %v5661_v12 }
  0x39   : > { %4703 = vmatmul.msk.f32.gmra.mxu0 %vm639_vm2, %v5466_v16  ;;  %9063 = vst [vmem:[#allocation28_spill] sm:$0xff] %v5664_v17 }
  0x3a   : > { %9064 = vst [vmem:[#allocation29_spill] sm:$0xff] %v5667_v18 }
  0x3b   : > { %4736 = vmatmul.msk.f32.gmra.mxu1 %vm639_vm2, %v5483_v21  ;;  %4723 = vmatmul.msk.f32.gmra.mxu2 %vm639_vm2, %v5486_v22  ;;  %9065 = vst [vmem:[#allocation30_spill] sm:$0xff] %v5683_v26 }
  0x3c   : > { %9066 = vst [vmem:[#allocation31_spill] sm:$0xff] %v5686_v31 }
  0x3d   : > { %4756 = vmatmul.msk.f32.gmra.mxu3 %vm639_vm2, %v5507_v27  ;;  %9067 = vst [vmem:[#allocation32_spill] sm:$0xff] %v5698_v37 }
  0x3e   : > { %9068 = vst [vmem:[#allocation33_spill] sm:$0xff] %v5704_v43 }
  0x3f   : > { %9069 = vst [vmem:[#allocation34_spill] sm:$0xff] %v5717_v49 }
  0x40   : > { %9070 = vst [vmem:[#allocation35_spill] sm:$0xff] %v5723_v55 }
  0x41   : > { %4704 = vmatmul.msk.f32.gmra.mxu0 %vm639_vm2, %v5492_v23  ;;  %9071 = vst [vmem:[#allocation36_spill] sm:$0xff] %v5746_v24 }
  0x43   : > { %4737 = vmatmul.msk.f32.gmra.mxu1 %vm639_vm2, %v5510_v28  ;;  %4724 = vmatmul.msk.f32.gmra.mxu2 %vm639_vm2, %v5513_v29 }
  0x45   : > { %4757 = vmatmul.msk.f32.gmra.mxu3 %vm639_vm2, %v5529_v33 }
  0x49   : > { %4705 = vmatmul.msk.f32.gmra.mxu0 %vm639_vm2, %v5518_v30 }
  0x4b   : > { %4738 = vmatmul.msk.f32.gmra.mxu1 %vm639_vm2, %v5532_v34  ;;  %4725 = vmatmul.msk.f32.gmra.mxu2 %vm639_vm2, %v5535_v35 }
  0x4d   : > { %4758 = vmatmul.msk.f32.gmra.mxu3 %vm639_vm2, %v5551_v39 }
  0x51   : > { %4706 = vmatmul.msk.f32.gmra.mxu0 %vm639_vm2, %v5540_v36 }
  0x53   : > { %4739 = vmatmul.msk.f32.gmra.mxu1 %vm639_vm2, %v5554_v40  ;;  %4726 = vmatmul.msk.f32.gmra.mxu2 %vm639_vm2, %v5557_v41 }
  0x55   : > { %4759 = vmatmul.msk.f32.gmra.mxu3 %vm639_vm2, %v5573_v45 }
  0x59   : > { %4707 = vmatmul.msk.f32.gmra.mxu0 %vm639_vm2, %v5562_v42 }
  0x5b   : > { %4740 = vmatmul.msk.f32.gmra.mxu1 %vm639_vm2, %v5576_v46  ;;  %4727 = vmatmul.msk.f32.gmra.mxu2 %vm639_vm2, %v5579_v47 }
  0x5d   : > { %4760 = vmatmul.msk.f32.gmra.mxu3 %vm639_vm2, %v5595_v51 }
  0x61   : > { %4708 = vmatmul.msk.f32.gmra.mxu0 %vm639_vm2, %v5584_v48 }
  0x63   : > { %4741 = vmatmul.msk.f32.gmra.mxu1 %vm639_vm2, %v5598_v52  ;;  %4728 = vmatmul.msk.f32.gmra.mxu2 %vm639_vm2, %v5601_v53 }
  0x65   : > { %4761 = vmatmul.msk.f32.gmra.mxu3 %vm639_vm2, %v5617_v57 }
  0x69   : > { %4709 = vmatmul.msk.f32.gmra.mxu0 %vm639_vm2, %v5606_v54 }
  0x6b   : > { %4742 = vmatmul.msk.f32.gmra.mxu1 %vm639_vm2, %v5620_v58  ;;  %4729 = vmatmul.msk.f32.gmra.mxu2 %vm639_vm2, %v5623_v59  ;;  %v5836_v59 = vld [vmem:[%s5428_s25 + $0x88] sm:$0xff] }
  0x6d   : > { %4762 = vmatmul.msk.f32.gmra.mxu3 %vm639_vm2, %v5639_v63  ;;  %v1024_v63 = vrot.slane %v5540_v36, 1 }
  0x71   : > { %4710 = vmatmul.msk.f32.gmra.mxu0 %vm639_vm2, %v5628_v60 }
  0x73   : > { %4743 = vmatmul.msk.f32.gmra.mxu1 %vm639_vm2, %v5642_v0  ;;  %4730 = vmatmul.msk.f32.gmra.mxu2 %vm639_vm2, %v5645_v1 }
  0x75   : > { %4763 = vmatmul.msk.f32.gmra.mxu3 %vm639_vm2, %v5661_v12 }
  0x79   : > { %4711 = vmatmul.msk.f32.gmra.mxu0 %vm639_vm2, %v5650_v4 }
  0x7b   : > { %4744 = vmatmul.msk.f32.gmra.mxu1 %vm639_vm2, %v5664_v17  ;;  %4731 = vmatmul.msk.f32.gmra.mxu2 %vm639_vm2, %v5667_v18 }
  0x7d   : > { %4764 = vmatmul.msk.f32.gmra.mxu3 %vm639_vm2, %v5683_v26 }
  0x81   : > { %4712 = vmatmul.msk.f32.gmra.mxu0 %vm639_vm2, %v5672_v20 }
  0x83   : > { %4745 = vmatmul.msk.f32.gmra.mxu1 %vm639_vm2, %v5686_v31  ;;  %4767 = vmatmul.msk.f32.vlgmr.msrb.gmra.mxu2 %vm639_vm2, %v5698_v37 }
  0x85   : > { %4801 = vmatmul.msk.f32.vlgmr.msrb.gmra.mxu3 %vm639_vm2, %v5458_v14  ;;  %v1019_v14 = vrot.slane %v5466_v16, 1 }
  0x87   : > { %v5737_v62 = vsel %vm1015_vm3, %v1018_v56, %v1019_v14  ;;  %v5763_v38 = vsel %vm1015_vm3, %v1019_v14, 0.0  ;;  %v5780_v14 = vld [vmem:[%s5428_s25 + $0x78] sm:$0xff] }
  0x88   : > { %v581_v5 = vrot.slane %v5780_v14, 7 }
  0x89   : > { %4713 = vmatmul.msk.f32.gmra.mxu0 %vm639_vm2, %v5691_v32 }
  0x8b   : > { %4746 = vmatmul.msk.f32.gmra.mxu1 %vm639_vm2, %v5704_v43  ;;  %4768 = vmatmul.msk.f32.gmra.mxu2 %vm639_vm2, %v5717_v49  ;;  %v1022_v49 = vrot.slane %v5518_v30, 1 }
  0x8d   : > { %4802 = vmatmul.msk.f32.gmra.mxu3 %vm639_vm2, %v5483_v21  ;;  %v5752_v21 = vld [vmem:[%s5428_s25 + $0x70] sm:$0xff]  ;;  %v5794_v37 = vsel %vm1015_vm3, %v1021_v2, %v1022_v49  ;;  %v5810_v2 = vld [vmem:[%s5428_s25 + $0x80] sm:$0xff]  ;;  %v5817_v3 = vsel %vm1015_vm3, %v1022_v49, 0.0  ;;  %v1025_v49 = vrot.slane %v5562_v42, 1 }
  0x8e   : > { %v580_v50 = vrot.slane %v5752_v21, 7  ;;  %9073 = vst [vmem:[#allocation38_spill] sm:$0xff] %v5794_v37  ;;  %v583_v18 = vrot.slane %v5810_v2, 7 }
  0x8f   : > { %9075 = vst [vmem:[#allocation40_spill] sm:$0xff] %v5817_v3 }
  0x90   : > { %v5773_v11 = vsel %vm556_vm1, 0.0, %v580_v50  ;;  %v5805_v26 = vsel %vm556_vm1, %v580_v50, %v581_v5 }
  0x91   : > { %4714 = vmatmul.msk.f32.gmra.mxu0 %vm639_vm2, %v5709_v44  ;;  %9072 = vst [vmem:[#allocation37_spill] sm:$0xff] %v5773_v11 }
  0x92   : > { %9074 = vst [vmem:[#allocation39_spill] sm:$0xff] %v5805_v26 }
  0x93   : > { %4747 = vmatmul.msk.f32.gmra.mxu1 %vm639_vm2, %v5723_v55  ;;  %4769 = vmatmul.msk.f32.gmra.mxu2 %vm639_vm2, %v5737_v62 }
  0x95   : > { %4803 = vmatmul.msk.f32.gmra.mxu3 %vm639_vm2, %v5510_v28 }
  0x99   : > { %4715 = vmatmul.msk.f32.gmra.mxu0 %vm639_vm2, %v5730_v61 }
  0x9b   : > { %4748 = vmatmul.msk.f32.gmra.mxu1 %vm639_vm2, %v5746_v24  ;;  %4770 = vmatmul.msk.f32.gmra.mxu2 %vm639_vm2, %v5763_v38 }
  0x9d   : > { %4804 = vmatmul.msk.f32.gmra.mxu3 %vm639_vm2, %v5532_v34 }
  0x9e   : > { %v5766_v56 = vpop.f32.mrf.mxu0 }
  0xa0   : > { %v5770_v7 = vpop.f32.mrf.mxu1 }
  0xa1   : > { %4716 = vmatmul.msk.f32.gmra.mxu0 %vm639_vm2, %v5752_v21 }
  0xa3   : > { %4749 = vmatmul.msk.f32.gmra.mxu1 %vm639_vm2, %v5773_v11  ;;  %4771 = vmatmul.msk.f32.gmra.mxu2 %vm639_vm2, %v5794_v37 }
  0xa5   : > { %4805 = vmatmul.msk.f32.gmra.mxu3 %vm639_vm2, %v5554_v40  ;;  %v5829_v40 = vsel %vm556_vm1, 0.0, %v583_v18 }
  0xa6   : > { %v5798_v34 = vpop.f32.mrf.mxu0  ;;  %v783_v25 = vpop.f32.mrf.mxu2 }
  0xa8   : > { %v5802_v28 = vpop.f32.mrf.mxu1  ;;  %v979_v5 = vpop.f32.mrf.mxu3 }
  0xa9   : > { %4717 = vmatmul.msk.f32.gmra.mxu0 %vm639_vm2, %v5780_v14  ;;  %v5820_v50 = vadd.f32 %v979_v5, %v783_v25  ;;  %v5843_v5 = vsel %vm1015_vm3, %v1024_v63, %v1025_v49 }
  0xaa   : > { %9077 = vst [vmem:[#allocation42_spill] sm:$0xff] %v5843_v5 }
  0xab   : > { %4750 = vmatmul.msk.f32.gmra.mxu1 %vm639_vm2, %v5805_v26  ;;  %9076 = vst [vmem:[#allocation41_spill] sm:$0xff] %v5820_v50  ;;  %4772 = vmatmul.msk.f32.gmra.mxu2 %vm639_vm2, %v5817_v3  ;;  %v584_v50 = vrot.slane %v5836_v59, 7 }
  0xad   : > { %4806 = vmatmul.msk.f32.gmra.mxu3 %vm639_vm2, %v5576_v46  ;;  %v5855_v46 = vsel %vm556_vm1, %v583_v18, %v584_v50  ;;  %v1027_v50 = vrot.slane %v5584_v48, 1 }
  0xae   : > { %v5822_v1 = vpop.f32.mrf.mxu0  ;;  %v786_v25 = vpop.f32.mrf.mxu2 }
  0xb0   : > { %v5826_v12 = vpop.f32.mrf.mxu1  ;;  %v982_v53 = vpop.f32.mrf.mxu3 }
  0xb1   : > { %4718 = vmatmul.msk.f32.gmra.mxu0 %vm639_vm2, %v5810_v2  ;;  %v5846_v57 = vadd.f32 %v982_v53, %v786_v25  ;;  %v5864_v53 = vsel %vm1015_vm3, %v1025_v49, 0.0 }
  0xb2   : > { %9079 = vst [vmem:[#allocation44_spill] sm:$0xff] %v5864_v53 }
  0xb3   : > { %4751 = vmatmul.msk.f32.gmra.mxu1 %vm639_vm2, %v5829_v40  ;;  %9078 = vst [vmem:[#allocation43_spill] sm:$0xff] %v5846_v57  ;;  %4773 = vmatmul.msk.f32.gmra.mxu2 %vm639_vm2, %v5843_v5 }
  0xb5   : > { %4807 = vmatmul.msk.f32.gmra.mxu3 %vm639_vm2, %v5598_v52  ;;  %v1028_v52 = vrot.slane %v5606_v54, 1 }
  0xb6   : > { %v5848_v51 = vpop.f32.mrf.mxu0  ;;  %v789_v63 = vpop.f32.mrf.mxu2 }
  0xb7   : > { %v5883_v49 = vsel %vm1015_vm3, %v1027_v50, %v1028_v52 }
  0xb8   : > { %v5852_v47 = vpop.f32.mrf.mxu1  ;;  %v985_v25 = vpop.f32.mrf.mxu3  ;;  %9081 = vst [vmem:[#allocation46_spill] sm:$0xff] %v5883_v49 }
  0xb9   : > { %4719 = vmatmul.msk.f32.gmra.mxu0 %vm639_vm2, %v5836_v59  ;;  %v5866_v57 = vadd.f32 %v985_v25, %v789_v63 }
  0xbb   : > { %4752 = vmatmul.msk.f32.gmra.mxu1 %vm639_vm2, %v5855_v46  ;;  %9080 = vst [vmem:[#allocation45_spill] sm:$0xff] %v5866_v57  ;;  %4774 = vmatmul.msk.f32.gmra.mxu2 %vm639_vm2, %v5864_v53 }
  0xbd   : > { %4808 = vmatmul.msk.f32.gmra.mxu3 %vm639_vm2, %v5620_v58 }
  0xbe   : > { %v5868_v41 = vpop.f32.mrf.mxu0  ;;  %v792_v45 = vpop.f32.mrf.mxu2 }
  0xc0   : > { %v5872_v18 = vpop.f32.mrf.mxu1  ;;  %v988_v63 = vpop.f32.mrf.mxu3 }
  0xc1   : > { %4835 = vmatmul.msk.f32.vlgmr.msrb.gmra.mxu0 %vm639_vm2, %v5440_v9  ;;  %v5885_v25 = vadd.f32 %v988_v63, %v792_v45  ;;  %v5900_v45 = vsel %vm1015_vm3, %v1028_v52, 0.0 }
  0xc2   : > { %9083 = vst [vmem:[#allocation48_spill] sm:$0xff] %v5900_v45 }
  0xc3   : > { %4869 = vmatmul.msk.f32.vlgmr.msrb.gmra.mxu1 %vm639_vm2, %v5737_v62  ;;  %9082 = vst [vmem:[#allocation47_spill] sm:$0xff] %v5885_v25  ;;  %4775 = vmatmul.msk.f32.gmra.mxu2 %vm639_vm2, %v5883_v49 }
  0xc5   : > { %4809 = vmatmul.msk.f32.gmra.mxu3 %vm639_vm2, %v5642_v0  ;;  %v1031_v0 = vrot.slane %v5650_v4, 1 }
  0xc6   : > { %v5887_v57 = vpop.f32.mrf.mxu0  ;;  %v795_v9 = vpop.f32.mrf.mxu2 }
  0xc8   : > { %v5891_v39 = vpop.f32.mrf.mxu1  ;;  %v991_v62 = vpop.f32.mrf.mxu3 }
  0xc9   : > { %4836 = vmatmul.msk.f32.gmra.mxu0 %vm639_vm2, %v5466_v16  ;;  %v5902_v50 = vadd.f32 %v991_v62, %v795_v9  ;;  %v1030_v16 = vrot.slane %v5628_v60, 1 }
  0xcb   : > { %4870 = vmatmul.msk.f32.gmra.mxu1 %vm639_vm2, %v5763_v38  ;;  %9084 = vst [vmem:[#allocation49_spill] sm:$0xff] %v5902_v50  ;;  %4776 = vmatmul.msk.f32.gmra.mxu2 %vm639_vm2, %v5900_v45  ;;  %v5919_v52 = vsel %vm1015_vm3, %v1030_v16, %v1031_v0  ;;  %v5936_v16 = vsel %vm1015_vm3, %v1031_v0, 0.0 }
  0xcc   : > { %9085 = vst [vmem:[#allocation50_spill] sm:$0xff] %v5919_v52 }
  0xcd   : > { %4810 = vmatmul.msk.f32.gmra.mxu3 %vm639_vm2, %v5664_v17  ;;  %9087 = vst [vmem:[#allocation52_spill] sm:$0xff] %v5936_v16 }
  0xce   : > { %v5904_v63 = vpop.f32.mrf.mxu0  ;;  %v798_v38 = vpop.f32.mrf.mxu2 }
  0xd0   : > { %v5908_v25 = vpop.f32.mrf.mxu1  ;;  %v994_v9 = vpop.f32.mrf.mxu3 }
  0xd1   : > { %4837 = vmatmul.msk.f32.gmra.mxu0 %vm639_vm2, %v5492_v23  ;;  %v5921_v62 = vadd.f32 %v994_v9, %v798_v38 }
  0xd3   : > { %4871 = vmatmul.msk.f32.gmra.mxu1 %vm639_vm2, %v5794_v37  ;;  %9086 = vst [vmem:[#allocation51_spill] sm:$0xff] %v5921_v62  ;;  %4777 = vmatmul.msk.f32.gmra.mxu2 %vm639_vm2, %v5919_v52 }
  0xd5   : > { %4811 = vmatmul.msk.f32.gmra.mxu3 %vm639_vm2, %v5686_v31  ;;  %v1034_v31 = vrot.slane %v5691_v32, 1 }
  0xd6   : > { %v5923_v50 = vpop.f32.mrf.mxu0  ;;  %v801_v17 = vpop.f32.mrf.mxu2 }
  0xd8   : > { %v5927_v58 = vpop.f32.mrf.mxu1  ;;  %v997_v38 = vpop.f32.mrf.mxu3 }
  0xd9   : > { %4838 = vmatmul.msk.f32.gmra.mxu0 %vm639_vm2, %v5518_v30  ;;  %v5938_v9 = vadd.f32 %v997_v38, %v801_v17  ;;  %v1033_v30 = vrot.slane %v5672_v20, 1 }
  0xdb   : > { %4872 = vmatmul.msk.f32.gmra.mxu1 %vm639_vm2, %v5817_v3  ;;  %9088 = vst [vmem:[#allocation53_spill] sm:$0xff] %v5938_v9  ;;  %4778 = vmatmul.msk.f32.gmra.mxu2 %vm639_vm2, %v5936_v16  ;;  %v5955_v0 = vsel %vm1015_vm3, %v1033_v30, %v1034_v31  ;;  %v5972_v30 = vsel %vm1015_vm3, %v1034_v31, 0.0 }
  0xdd   : > { %4812 = vmatmul.msk.f32.gmra.mxu3 %vm639_vm2, %v5704_v43 }
  0xde   : > { %v5940_v62 = vpop.f32.mrf.mxu0  ;;  %v804_v3 = vpop.f32.mrf.mxu2 }
  0xe0   : > { %v5944_v37 = vpop.f32.mrf.mxu1  ;;  %v1000_v17 = vpop.f32.mrf.mxu3 }
  0xe1   : > { %4839 = vmatmul.msk.f32.gmra.mxu0 %vm639_vm2, %v5540_v36  ;;  %v5957_v38 = vadd.f32 %v1000_v17, %v804_v3 }
  0xe3   : > { %4873 = vmatmul.msk.f32.gmra.mxu1 %vm639_vm2, %v5843_v5  ;;  %9089 = vst [vmem:[#allocation54_spill] sm:$0xff] %v5957_v38  ;;  %4779 = vmatmul.msk.f32.gmra.mxu2 %vm639_vm2, %v5955_v0 }
  0xe5   : > { %4813 = vmatmul.msk.f32.gmra.mxu3 %vm639_vm2, %v5723_v55  ;;  %v1037_v55 = vrot.slane %v5730_v61, 1 }
  0xe6   : > { %v5959_v9 = vpop.f32.mrf.mxu0  ;;  %v807_v43 = vpop.f32.mrf.mxu2 }
  0xe8   : > { %v5963_v23 = vpop.f32.mrf.mxu1  ;;  %v1003_v3 = vpop.f32.mrf.mxu3 }
  0xe9   : > { %4840 = vmatmul.msk.f32.gmra.mxu0 %vm639_vm2, %v5562_v42  ;;  %v5974_v17 = vadd.f32 %v1003_v3, %v807_v43  ;;  %v1036_v42 = vrot.slane %v5709_v44, 1 }
  0xeb   : > { %4874 = vmatmul.msk.f32.gmra.mxu1 %vm639_vm2, %v5864_v53  ;;  %9090 = vst [vmem:[#allocation55_spill] sm:$0xff] %v5974_v17  ;;  %4780 = vmatmul.msk.f32.gmra.mxu2 %vm639_vm2, %v5972_v30  ;;  %v5991_v31 = vsel %vm1015_vm3, %v1036_v42, %v1037_v55 }
  0xed   : > { %4814 = vmatmul.msk.f32.gmra.mxu3 %vm639_vm2, %v5746_v24 }
  0xee   : > { %v5976_v38 = vpop.f32.mrf.mxu0  ;;  %v810_v53 = vpop.f32.mrf.mxu2 }
  0xf0   : > { %v5980_v5 = vpop.f32.mrf.mxu1  ;;  %v1006_v43 = vpop.f32.mrf.mxu3 }
  0xf1   : > { %4841 = vmatmul.msk.f32.gmra.mxu0 %vm639_vm2, %v5584_v48  ;;  %v5993_v3 = vadd.f32 %v1006_v43, %v810_v53  ;;  %v6008_v53 = vsel %vm1015_vm3, %v1037_v55, 0.0 }
  0xf3   : > { %4875 = vmatmul.msk.f32.gmra.mxu1 %vm639_vm2, %v5883_v49  ;;  %9091 = vst [vmem:[#allocation56_spill] sm:$0xff] %v5993_v3  ;;  %4781 = vmatmul.msk.f32.gmra.mxu2 %vm639_vm2, %v5991_v31 }
  0xf5   : > { %4815 = vmatmul.msk.f32.gmra.mxu3 %vm639_vm2, %v5773_v11  ;;  %v1040_v11 = vrot.slane %v5780_v14, 1 }
  0xf6   : > { %v5995_v17 = vpop.f32.mrf.mxu0  ;;  %v813_v48 = vpop.f32.mrf.mxu2 }
  0xf8   : > { %v5999_v36 = vpop.f32.mrf.mxu1  ;;  %v1009_v42 = vpop.f32.mrf.mxu3 }
  0xf9   : > { %4842 = vmatmul.msk.f32.gmra.mxu0 %vm639_vm2, %v5606_v54  ;;  %v6010_v43 = vadd.f32 %v1009_v42, %v813_v48  ;;  %v1039_v54 = vrot.slane %v5752_v21, 1 }
  0xfb   : > { %4876 = vmatmul.msk.f32.gmra.mxu1 %vm639_vm2, %v5900_v45  ;;  %9092 = vst [vmem:[#allocation57_spill] sm:$0xff] %v6010_v43  ;;  %4782 = vmatmul.msk.f32.gmra.mxu2 %vm639_vm2, %v6008_v53  ;;  %v6027_v55 = vsel %vm1015_vm3, %v1039_v54, %v1040_v11 }
  0xfd   : > { %4816 = vmatmul.msk.f32.gmra.mxu3 %vm639_vm2, %v5805_v26 }
  0xfe   : > { %v6012_v3 = vpop.f32.mrf.mxu0  ;;  %v816_v45 = vpop.f32.mrf.mxu2 }
 0x100   : > { %v6016_v49 = vpop.f32.mrf.mxu1  ;;  %v1012_v48 = vpop.f32.mrf.mxu3 }
 0x101   : > { %4843 = vmatmul.msk.f32.gmra.mxu0 %vm639_vm2, %v5628_v60  ;;  %v6029_v42 = vadd.f32 %v1012_v48, %v816_v45  ;;  %v920_v60 = vadd.f32 %v5770_v7, %v5766_v56  ;;  %v6046_v45 = vsel %vm1015_vm3, %v1040_v11, 0.0  ;;  %v1042_v56 = vrot.slane %v5810_v2, 1 }
 0x102   : > { %v1043_v7 = vrot.slane %v5836_v59, 1 }
 0x103   : > { %4877 = vmatmul.msk.f32.gmra.mxu1 %vm639_vm2, %v5919_v52  ;;  %9093 = vst [vmem:[#allocation58_spill] sm:$0xff] %v6029_v42  ;;  %4783 = vmatmul.msk.f32.gmra.mxu2 %vm639_vm2, %v6027_v55 }
 0x105   : > { %4817 = vmatmul.msk.f32.gmra.mxu3 %vm639_vm2, %v5829_v40 }
 0x106   : > { %v6031_v43 = vpop.f32.mrf.mxu0  ;;  %v1197_v52 = vpop.f32.mrf.mxu2 }
 0x107   : > { %v1293_v54 = vadd.f32 %v1197_v52, %v920_v60  ;;  %v923_v52 = vadd.f32 %v5802_v28, %v5798_v34  ;;  %v926_v34 = vadd.f32 %v5826_v12, %v5822_v1  ;;  %v1045_v12 = vrot.slane %v5431_v6, 1 }
 0x108   : > { %v6035_v24 = vpop.f32.mrf.mxu1  ;;  %v1359_v48 = vpop.f32.mrf.mxu3 }
 0x109   : > { %4844 = vmatmul.msk.f32.gmra.mxu0 %vm639_vm2, %v5650_v4  ;;  %v6048_v42 = vadd.f32 %v1359_v48, %v1293_v54  ;;  %v6067_v54 = vsel %vm1015_vm3, %v1042_v56, %v1043_v7 }
 0x10b   : > { %4878 = vmatmul.msk.f32.gmra.mxu1 %vm639_vm2, %v5936_v16  ;;  %9094 = vst [vmem:[#allocation59_spill] sm:$0xff] %v6048_v42  ;;  %4784 = vmatmul.msk.f32.gmra.mxu2 %vm639_vm2, %v6046_v45 }
 0x10d   : > { %4818 = vmatmul.msk.f32.gmra.mxu3 %vm639_vm2, %v5855_v46 }
 0x10e   : > { %v6050_v26 = vpop.f32.mrf.mxu0  ;;  %v1200_v11 = vpop.f32.mrf.mxu2 }
 0x10f   : > { %v1294_v60 = vadd.f32 %v1200_v11, %v923_v52  ;;  %v6086_v52 = vsel %vm1015_vm3, %v1043_v7, 0.0 }
 0x110   : > { %v6054_v4 = vpop.f32.mrf.mxu1  ;;  %v1362_v48 = vpop.f32.mrf.mxu3  ;;  %9096 = vst [vmem:[#allocation61_spill] sm:$0xff] %v6086_v52 }
 0x111   : > { %4845 = vmatmul.msk.f32.gmra.mxu0 %vm639_vm2, %v5672_v20  ;;  %v6069_v42 = vadd.f32 %v1362_v48, %v1294_v60 }
 0x113   : > { %4879 = vmatmul.msk.f32.gmra.mxu1 %vm639_vm2, %v5955_v0  ;;  %9095 = vst [vmem:[#allocation60_spill] sm:$0xff] %v6069_v42  ;;  %4785 = vmatmul.msk.f32.gmra.mxu2 %vm639_vm2, %v6067_v54 }
 0x115   : > { %4819 = vmatmul.msk.f32.gmra.mxu3 %vm639_vm2, %v5444_v10 }
 0x116   : > { %v6071_v16 = vpop.f32.mrf.mxu0  ;;  %v1203_v20 = vpop.f32.mrf.mxu2 }
 0x117   : > { %v1295_v56 = vadd.f32 %v1203_v20, %v926_v34  ;;  %v929_v34 = vadd.f32 %v5852_v47, %v5848_v51  ;;  %v932_v51 = vadd.f32 %v5872_v18, %v5868_v41  ;;  %v1049_v18 = vrot.slane %v5486_v22, 1 }
 0x118   : > { %v6075_v28 = vpop.f32.mrf.mxu1  ;;  %v1365_v11 = vpop.f32.mrf.mxu3 }
 0x119   : > { %4846 = vmatmul.msk.f32.gmra.mxu0 %vm639_vm2, %v5691_v32  ;;  %v6088_v60 = vadd.f32 %v1365_v11, %v1295_v56  ;;  %v1046_v32 = vrot.slane %v5437_v8, 1 }
 0x11b   : > { %4880 = vmatmul.msk.f32.gmra.mxu1 %vm639_vm2, %v5972_v30  ;;  %9097 = vst [vmem:[#allocation62_spill] sm:$0xff] %v6088_v60  ;;  %4786 = vmatmul.msk.f32.gmra.mxu2 %vm639_vm2, %v6086_v52  ;;  %v6107_v56 = vsel %vm1015_vm3, %v1045_v12, %v1046_v32 }
 0x11d   : > { %4820 = vmatmul.msk.f32.gmra.mxu3 %vm639_vm2, %v5455_v13 }
 0x11e   : > { %v6090_v48 = vpop.f32.mrf.mxu0  ;;  %v1206_v7 = vpop.f32.mrf.mxu2 }
 0x11f   : > { %v1296_v20 = vadd.f32 %v1206_v7, %v929_v34  ;;  %v6126_v34 = vsel %vm1015_vm3, %v1046_v32, 0.0 }
 0x120   : > { %v6094_v1 = vpop.f32.mrf.mxu1  ;;  %v1368_v11 = vpop.f32.mrf.mxu3  ;;  %9099 = vst [vmem:[#allocation64_spill] sm:$0xff] %v6126_v34 }
 0x121   : > { %4847 = vmatmul.msk.f32.gmra.mxu0 %vm639_vm2, %v5709_v44  ;;  %v6109_v60 = vadd.f32 %v1368_v11, %v1296_v20 }
 0x123   : > { %4881 = vmatmul.msk.f32.gmra.mxu1 %vm639_vm2, %v5991_v31  ;;  %9098 = vst [vmem:[#allocation63_spill] sm:$0xff] %v6109_v60  ;;  %4787 = vmatmul.msk.f32.gmra.mxu2 %vm639_vm2, %v6107_v56 }
 0x125   : > { %4821 = vmatmul.msk.f32.gmra.mxu3 %vm639_vm2, %v5477_v19 }
 0x126   : > { %v6111_v42 = vpop.f32.mrf.mxu0  ;;  %v1209_v44 = vpop.f32.mrf.mxu2 }
 0x127   : > { %v1297_v12 = vadd.f32 %v1209_v44, %v932_v51  ;;  %v935_v51 = vadd.f32 %v5891_v39, %v5887_v57  ;;  %v938_v57 = vadd.f32 %v5908_v25, %v5904_v63  ;;  %v1051_v25 = vrot.slane %v5513_v29, 1 }
 0x128   : > { %v6115_v47 = vpop.f32.mrf.mxu1  ;;  %v1371_v7 = vpop.f32.mrf.mxu3  ;;  %v1052_v63 = vrot.slane %v5535_v35, 1 }
 0x129   : > { %4848 = vmatmul.msk.f32.gmra.mxu0 %vm639_vm2, %v5730_v61  ;;  %v6128_v20 = vadd.f32 %v1371_v7, %v1297_v12  ;;  %v1048_v61 = vrot.slane %v5461_v15, 1 }
 0x12b   : > { %4882 = vmatmul.msk.f32.gmra.mxu1 %vm639_vm2, %v6008_v53  ;;  %9100 = vst [vmem:[#allocation65_spill] sm:$0xff] %v6128_v20  ;;  %4788 = vmatmul.msk.f32.gmra.mxu2 %vm639_vm2, %v6126_v34  ;;  %v6147_v12 = vsel %vm1015_vm3, %v1048_v61, %v1049_v18 }
 0x12c   : > { %9101 = vst [vmem:[#allocation66_spill] sm:$0xff] %v6147_v12 }
 0x12d   : > { %4822 = vmatmul.msk.f32.gmra.mxu3 %vm639_vm2, %v5507_v27 }
 0x12e   : > { %v6130_v11 = vpop.f32.mrf.mxu0  ;;  %v1212_v32 = vpop.f32.mrf.mxu2 }
 0x12f   : > { %v1298_v44 = vadd.f32 %v1212_v32, %v935_v51  ;;  %v6166_v51 = vsel %vm1015_vm3, %v1049_v18, 0.0 }
 0x130   : > { %v6134_v41 = vpop.f32.mrf.mxu1  ;;  %v1374_v7 = vpop.f32.mrf.mxu3  ;;  %9103 = vst [vmem:[#allocation68_spill] sm:$0xff] %v6166_v51 }
 0x131   : > { %4849 = vmatmul.msk.f32.gmra.mxu0 %vm639_vm2, %v5752_v21  ;;  %v6149_v20 = vadd.f32 %v1374_v7, %v1298_v44 }
 0x133   : > { %4883 = vmatmul.msk.f32.gmra.mxu1 %vm639_vm2, %v6027_v55  ;;  %9102 = vst [vmem:[#allocation67_spill] sm:$0xff] %v6149_v20  ;;  %4789 = vmatmul.msk.f32.gmra.mxu2 %vm639_vm2, %v6147_v12 }
 0x135   : > { %4823 = vmatmul.msk.f32.gmra.mxu3 %vm639_vm2, %v5529_v33 }
 0x136   : > { %v6151_v60 = vpop.f32.mrf.mxu0  ;;  %v1215_v21 = vpop.f32.mrf.mxu2 }
 0x137   : > { %v1299_v61 = vadd.f32 %v1215_v21, %v938_v57  ;;  %v941_v57 = vadd.f32 %v5927_v58, %v5923_v50  ;;  %v9106_v21 = vld [vmem:[#allocation12_spill] sm:$0xff] }
 0x138   : > { %v6155_v39 = vpop.f32.mrf.mxu1  ;;  %v1377_v32 = vpop.f32.mrf.mxu3  ;;  %v3210_v50 = vld [vmem:[%s8932_s5 + $0x18] sm:$0xff] }
 0x139   : > { %4850 = vmatmul.msk.f32.gmra.mxu0 %vm639_vm2, %v5780_v14  ;;  %v6168_v44 = vadd.f32 %v1377_v32, %v1299_v61  ;;  %v6187_v32 = vsel %vm1015_vm3, %v1051_v25, %v1052_v63  ;;  %3324 = vmatpush.msra.mxu1 %v3210_v50  ;;  %v9116_v50 = vld [vmem:[#allocation17_spill] sm:$0xff] }
 0x13a   : > { %9107 = vst [vmem:[#allocation12_spill] sm:$0xff] %v6187_v32 }
 0x13b   : > { %4884 = vmatmul.msk.f32.gmra.mxu1 %vm639_vm2, %v6046_v45  ;;  %9104 = vst [vmem:[#allocation69_spill] sm:$0xff] %v6168_v44  ;;  %4790 = vmatmul.msk.f32.gmra.mxu2 %vm639_vm2, %v6166_v51 }
 0x13d   : > { %4824 = vmatmul.msk.f32.gmra.mxu3 %vm639_vm2, %v9106_v21 }
 0x13e   : > { %v6170_v7 = vpop.f32.mrf.mxu0  ;;  %v1218_v18 = vpop.f32.mrf.mxu2 }
 0x13f   : > { %v1300_v61 = vadd.f32 %v1218_v18, %v941_v57  ;;  %v6209_v18 = vsel %vm1015_vm3, %v1052_v63, 0.0 }
 0x140   : > { %v6174_v14 = vpop.f32.mrf.mxu1  ;;  %v1380_v44 = vpop.f32.mrf.mxu3 }
 0x141   : > { %9105 = vst [vmem:[#allocation70_spill] sm:$0xff] %v6174_v14  ;;  %4851 = vmatmul.msk.f32.gmra.mxu0 %vm639_vm2, %v5810_v2  ;;  %v6189_v20 = vadd.f32 %v1380_v44, %v1300_v61  ;;  %v944_v2 = vadd.f32 %v5944_v37, %v5940_v62  ;;  %v9111_v44 = vld [vmem:[#allocation15_spill] sm:$0xff] }
 0x142   : > { %9112 = vst [vmem:[#allocation15_spill] sm:$0xff] %v6209_v18 }
 0x143   : > { %4885 = vmatmul.msk.f32.gmra.mxu1 %vm639_vm2, %v6067_v54  ;;  %9108 = vst [vmem:[#allocation71_spill] sm:$0xff] %v6189_v20  ;;  %4791 = vmatmul.msk.f32.gmra.mxu2 %vm639_vm2, %v6187_v32  ;;  %v9115_v20 = vld [vmem:[#allocation14_spill] sm:$0xff] }
 0x145   : > { %4825 = vmatmul.msk.f32.gmra.mxu3 %vm639_vm2, %v9111_v44 }
 0x146   : > { %v6191_v14 = vpop.f32.mrf.mxu0  ;;  %v1221_v25 = vpop.f32.mrf.mxu2 }
 0x147   : > { %9109 = vst [vmem:[#allocation72_spill] sm:$0xff] %v6191_v14  ;;  %v1301_v57 = vadd.f32 %v1221_v25, %v944_v2  ;;  %v1055_v2 = vrot.slane %v9116_v50, 1  ;;  %v947_v25 = vadd.f32 %v5963_v23, %v5959_v9  ;;  %v950_v23 = vadd.f32 %v5980_v5, %v5976_v38  ;;  %v9123_v5 = vld [vmem:[#allocation20_spill] sm:$0xff] }
 0x148   : > { %v6195_v58 = vpop.f32.mrf.mxu1  ;;  %v1383_v37 = vpop.f32.mrf.mxu3  ;;  %v1057_v38 = vrot.slane %v9123_v5, 1 }
 0x149   : > { %9110 = vst [vmem:[#allocation73_spill] sm:$0xff] %v6195_v58  ;;  %4852 = vmatmul.msk.f32.gmra.mxu0 %vm639_vm2, %v5836_v59  ;;  %v6211_v62 = vadd.f32 %v1383_v37, %v1301_v57  ;;  %v1054_v58 = vrot.slane %v9115_v20, 1  ;;  %v9117_v57 = vld [vmem:[#allocation18_spill] sm:$0xff] }
 0x14b   : > { %4886 = vmatmul.msk.f32.gmra.mxu1 %vm639_vm2, %v6086_v52  ;;  %4792 = vmatmul.msk.f32.gmra.mxu2 %vm639_vm2, %v6209_v18 }
 0x14d   : > { %4826 = vmatmul.msk.f32.gmra.mxu3 %vm639_vm2, %v9117_v57 }
 0x14e   : > { %v6213_v59 = vpop.f32.mrf.mxu0  ;;  %v1224_v63 = vpop.f32.mrf.mxu2 }
 0x14f   : > { %9113 = vst [vmem:[#allocation74_spill] sm:$0xff] %v6213_v59  ;;  %v1302_v37 = vadd.f32 %v1224_v63, %v947_v25  ;;  %v9120_v25 = vld [vmem:[#allocation21_spill] sm:$0xff] }
 0x150   : > { %v6217_v61 = vpop.f32.mrf.mxu1  ;;  %v1386_v59 = vpop.f32.mrf.mxu3 }
 0x151   : > { %9114 = vst [vmem:[#allocation75_spill] sm:$0xff] %v6217_v61  ;;  %4853 = vmatmul.msk.f32.gmra.mxu0 %vm639_vm2, %v5431_v6  ;;  %v6230_v61 = vsel %vm1015_vm3, %v1054_v58, %v1055_v2  ;;  %v6232_v14 = vadd.f32 %v1386_v59, %v1302_v37  ;;  %v6249_v59 = vsel %vm1015_vm3, %v1055_v2, 0.0 }
 0x153   : > { %4887 = vmatmul.msk.f32.gmra.mxu1 %vm639_vm2, %v6107_v56  ;;  %4793 = vmatmul.msk.f32.gmra.mxu2 %vm639_vm2, %v6230_v61 }
 0x155   : > { %4827 = vmatmul.msk.f32.gmra.mxu3 %vm639_vm2, %v9120_v25 }
 0x156   : > { %v6234_v52 = vpop.f32.mrf.mxu0  ;;  %v1227_v9 = vpop.f32.mrf.mxu2 }
 0x157   : > { %9118 = vst [vmem:[#allocation14_spill] sm:$0xff] %v6234_v52  ;;  %v1303_v58 = vadd.f32 %v1227_v9, %v950_v23  ;;  %v9124_v52 = vld [vmem:[#allocation23_spill] sm:$0xff]  ;;  %v953_v9 = vadd.f32 %v5999_v36, %v5995_v17  ;;  %v956_v36 = vadd.f32 %v6016_v49, %v6012_v3  ;;  %v9131_v49 = vld [vmem:[#allocation26_spill] sm:$0xff] }
 0x158   : > { %v6238_v6 = vpop.f32.mrf.mxu1  ;;  %v1389_v63 = vpop.f32.mrf.mxu3  ;;  %v1058_v23 = vrot.slane %v9124_v52, 1  ;;  %v1060_v3 = vrot.slane %v9131_v49, 1 }
 0x159   : > { %9119 = vst [vmem:[#allocation17_spill] sm:$0xff] %v6238_v6  ;;  %4854 = vmatmul.msk.f32.gmra.mxu0 %vm639_vm2, %v5437_v8  ;;  %v6251_v37 = vadd.f32 %v1389_v63, %v1303_v58  ;;  %v9125_v58 = vld [vmem:[#allocation24_spill] sm:$0xff] }
 0x15b   : > { %4888 = vmatmul.msk.f32.gmra.mxu1 %vm639_vm2, %v6126_v34  ;;  %4794 = vmatmul.msk.f32.gmra.mxu2 %vm639_vm2, %v6249_v59 }
 0x15d   : > { %4828 = vmatmul.msk.f32.gmra.mxu3 %vm639_vm2, %v9125_v58 }
 0x15e   : > { %v6253_v6 = vpop.f32.mrf.mxu0  ;;  %v1230_v2 = vpop.f32.mrf.mxu2 }
 0x15f   : > { %9121 = vst [vmem:[#allocation18_spill] sm:$0xff] %v6253_v6  ;;  %v1304_v63 = vadd.f32 %v1230_v2, %v953_v9  ;;  %v6289_v9 = vsel %vm1015_vm3, %v1058_v23, 0.0 }
 0x160   : > { %v6257_v8 = vpop.f32.mrf.mxu1  ;;  %v1392_v6 = vpop.f32.mrf.mxu3 }
 0x161   : > { %9122 = vst [vmem:[#allocation76_spill] sm:$0xff] %v6257_v8  ;;  %4855 = vmatmul.msk.f32.gmra.mxu0 %vm639_vm2, %v5461_v15  ;;  %v6270_v8 = vsel %vm1015_vm3, %v1057_v38, %v1058_v23  ;;  %v6272_v34 = vadd.f32 %v1392_v6, %v1304_v63  ;;  %v9128_v38 = vld [vmem:[#allocation27_spill] sm:$0xff]  ;;  %v959_v23 = vadd.f32 %v6035_v24, %v6031_v43 }
 0x163   : > { %4889 = vmatmul.msk.f32.gmra.mxu1 %vm639_vm2, %v6147_v12  ;;  %4795 = vmatmul.msk.f32.gmra.mxu2 %vm639_vm2, %v6270_v8 }
 0x165   : > { %4829 = vmatmul.msk.f32.gmra.mxu3 %vm639_vm2, %v9128_v38 }
 0x166   : > { %v6274_v25 = vpop.f32.mrf.mxu0  ;;  %v1233_v17 = vpop.f32.mrf.mxu2 }
 0x167   : > { %9126 = vst [vmem:[#allocation20_spill] sm:$0xff] %v6274_v25  ;;  %v1305_v6 = vadd.f32 %v1233_v17, %v956_v36  ;;  %v9132_v25 = vld [vmem:[#allocation29_spill] sm:$0xff]  ;;  %v6302_v17 = vld [vmem:[%s5428_s25 + $0xf0] sm:$0xff] }
 0x168   : > { %v6278_v15 = vpop.f32.mrf.mxu1  ;;  %v1395_v2 = vpop.f32.mrf.mxu3  ;;  %v1061_v36 = vrot.slane %v9132_v25, 1 }
 0x169   : > { %9127 = vst [vmem:[#allocation23_spill] sm:$0xff] %v6278_v15  ;;  %4856 = vmatmul.msk.f32.gmra.mxu0 %vm639_vm2, %v5486_v22  ;;  %v6291_v63 = vadd.f32 %v1395_v2, %v1305_v6  ;;  %v9133_v2 = vld [vmem:[#allocation30_spill] sm:$0xff] }
 0x16b   : > { %4890 = vmatmul.msk.f32.gmra.mxu1 %vm639_vm2, %v6166_v51  ;;  %4796 = vmatmul.msk.f32.gmra.mxu2 %vm639_vm2, %v6289_v9 }
 0x16d   : > { %4830 = vmatmul.msk.f32.gmra.mxu3 %vm639_vm2, %v9133_v2 }
 0x16e   : > { %v6293_v15 = vpop.f32.mrf.mxu0  ;;  %v1236_v6 = vpop.f32.mrf.mxu2 }
 0x16f   : > { %9129 = vst [vmem:[#allocation24_spill] sm:$0xff] %v6293_v15  ;;  %v1306_v51 = vadd.f32 %v1236_v6, %v959_v23  ;;  %v6314_v15 = vsel %vm1015_vm3, %v1060_v3, %v1061_v36  ;;  %v6328_v23 = vld [vmem:[%s5428_s25 + $0xf8] sm:$0xff]  ;;  %v962_v6 = vadd.f32 %v6054_v4, %v6050_v26 }
 0x170   : > { %v6297_v22 = vpop.f32.mrf.mxu1  ;;  %9134 = vst [vmem:[#allocation26_spill] sm:$0xff] %v6314_v15  ;;  %v1398_v38 = vpop.f32.mrf.mxu3  ;;  %v1328_v3 = vrot.slane %v6328_v23, 7 }
 0x171   : > { %9130 = vst [vmem:[#allocation77_spill] sm:$0xff] %v6297_v22  ;;  %4857 = vmatmul.msk.f32.gmra.mxu0 %vm639_vm2, %v5513_v29  ;;  %v1327_v22 = vrot.slane %v6302_v17, 7  ;;  %v6316_v12 = vadd.f32 %v1398_v38, %v1306_v51 }
 0x173   : > { %4891 = vmatmul.msk.f32.gmra.mxu1 %vm639_vm2, %v6187_v32  ;;  %4797 = vmatmul.msk.f32.gmra.mxu2 %vm639_vm2, %v6314_v15  ;;  %v6323_v29 = vsel %vm556_vm1, 0.0, %v1327_v22  ;;  %v6348_v4 = vsel %vm556_vm1, %v1327_v22, %v1328_v3 }
 0x175   : > { %4831 = vmatmul.msk.f32.gmra.mxu3 %vm639_vm2, %v6323_v29 }
 0x176   : > { %v6318_v24 = vpop.f32.mrf.mxu0  ;;  %v1239_v51 = vpop.f32.mrf.mxu2 }
 0x177   : > { %9135 = vst [vmem:[#allocation29_spill] sm:$0xff] %v6318_v24  ;;  %v1307_v38 = vadd.f32 %v1239_v51, %v962_v6  ;;  %v965_v51 = vadd.f32 %v6075_v28, %v6071_v16  ;;  %v9138_v16 = vld [vmem:[#allocation8_spill] sm:$0xff] }
 0x178   : > { %v6325_v43 = vpop.f32.mrf.mxu1  ;;  %v1401_v24 = vpop.f32.mrf.mxu3 }
 0x179   : > { %9136 = vst [vmem:[#allocation30_spill] sm:$0xff] %v6325_v43  ;;  %4858 = vmatmul.msk.f32.gmra.mxu0 %vm639_vm2, %v5535_v35  ;;  %v6340_v43 = vsel %vm1015_vm3, %v1061_v36, 0.0  ;;  %v6342_v32 = vadd.f32 %v1401_v24, %v1307_v38 }
 0x17a   : > { %9137 = vst [vmem:[#allocation78_spill] sm:$0xff] %v6340_v43 }
 0x17b   : > { %4892 = vmatmul.msk.f32.gmra.mxu1 %vm639_vm2, %v6209_v18  ;;  %4798 = vmatmul.msk.f32.gmra.mxu2 %vm639_vm2, %v6340_v43 }
 0x17d   : > { %4832 = vmatmul.msk.f32.gmra.mxu3 %vm639_vm2, %v6348_v4 }
 0x17e   : > { %v1537_v26 = vpop.f32.mrf.mxu0  ;;  %v1242_v36 = vpop.f32.mrf.mxu2 }
 0x17f   : > { %v1617_v35 = vadd.f32 %v1537_v26, %v6211_v62  ;;  %v1308_v24 = vadd.f32 %v1242_v36, %v965_v51  ;;  %v9139_v51 = vld [vmem:[#allocation7_spill] sm:$0xff] }
 0x180   : > { %v1697_v6 = vpop.f32.mrf.mxu1  ;;  %v1404_v62 = vpop.f32.mrf.mxu3 }
 0x181   : > { %v6352_v18 = vadd.f32 %v1697_v6, %v1617_v35  ;;  %4859 = vmatmul.msk.f32.gmra.mxu0 %vm639_vm2, %v9115_v20  ;;  %v6360_v22 = vadd.f32 %v1404_v62, %v1308_v24  ;;  %v968_v20 = vadd.f32 %v6094_v1, %v6090_v48  ;;  %v3209_v35 = vld [vmem:[%s8932_s5 + $0x10] sm:$0xff] }
 0x182   : > { %3325 = vmatpush.msra.mxu1 %v3209_v35 }
 0x183   : > { %4893 = vmatmul.msk.f32.gmra.mxu1 %vm639_vm2, %v6230_v61  ;;  %4903 = vmatmul.msk.f32.vlgmr.msra.gmra.mxu2 %vm639_vm2, %v9138_v16 }
 0x185   : > { %4937 = vmatmul.msk.f32.vlgmr.msra.gmra.mxu3 %vm639_vm2, %v9139_v51 }
 0x186   : > { %v1540_v38 = vpop.f32.mrf.mxu0  ;;  %v1245_v6 = vpop.f32.mrf.mxu2 }
 0x187   : > { %v1618_v3 = vadd.f32 %v1540_v38, %v6232_v14  ;;  %v1309_v14 = vadd.f32 %v1245_v6, %v968_v20  ;;  %v971_v38 = vadd.f32 %v6115_v47, %v6111_v42  ;;  %v9142_v42 = vld [vmem:[#allocation13_spill] sm:$0xff] }
 0x188   : > { %v1700_v28 = vpop.f32.mrf.mxu1  ;;  %v1407_v36 = vpop.f32.mrf.mxu3 }
 0x189   : > { %v6367_v26 = vadd.f32 %v1700_v28, %v1618_v3  ;;  %4860 = vmatmul.msk.f32.gmra.mxu0 %vm639_vm2, %v9116_v50  ;;  %v6378_v48 = vadd.f32 %v1407_v36, %v1309_v14  ;;  %v9140_v50 = vld [vmem:[#allocation10_spill] sm:$0xff]  ;;  %v9141_v28 = vld [vmem:[#allocation9_spill] sm:$0xff] }
 0x18b   : > { %4894 = vmatmul.msk.f32.gmra.mxu1 %vm639_vm2, %v6249_v59  ;;  %4904 = vmatmul.msk.f32.gmra.mxu2 %vm639_vm2, %v9140_v50 }
 0x18d   : > { %4938 = vmatmul.msk.f32.gmra.mxu3 %vm639_vm2, %v9141_v28 }
 0x18e   : > { %v1543_v1 = vpop.f32.mrf.mxu0  ;;  %v1248_v16 = vpop.f32.mrf.mxu2 }
 0x18f   : > { %v1619_v24 = vadd.f32 %v1543_v1, %v6251_v37  ;;  %v1310_v20 = vadd.f32 %v1248_v16, %v971_v38  ;;  %v9144_v1 = vld [vmem:[#allocation11_spill] sm:$0xff] }
 0x190   : > { %v1703_v62 = vpop.f32.mrf.mxu1  ;;  %v1410_v37 = vpop.f32.mrf.mxu3 }
 0x191   : > { %v6385_v3 = vadd.f32 %v1703_v62, %v1619_v24  ;;  %4861 = vmatmul.msk.f32.gmra.mxu0 %vm639_vm2, %v9123_v5  ;;  %v6393_v35 = vadd.f32 %v1410_v37, %v1310_v20  ;;  %v974_v5 = vadd.f32 %v6134_v41, %v6130_v11  ;;  %v9145_v41 = vld [vmem:[#allocation16_spill] sm:$0xff]  ;;  %v5144_v20 = vld [vmem:[%s5428_s25 + $0x28] sm:$0xff] }
 0x193   : > { %4895 = vmatmul.msk.f32.gmra.mxu1 %vm639_vm2, %v6270_v8  ;;  %4905 = vmatmul.msk.f32.gmra.mxu2 %vm639_vm2, %v9142_v42 }
 0x195   : > { %4939 = vmatmul.msk.f32.gmra.mxu3 %vm639_vm2, %v9144_v1 }
 0x196   : > { %v1546_v6 = vpop.f32.mrf.mxu0  ;;  %v1251_v36 = vpop.f32.mrf.mxu2 }
 0x197   : > { %v1620_v51 = vadd.f32 %v1546_v6, %v6272_v34  ;;  %v1311_v24 = vadd.f32 %v1251_v36, %v974_v5  ;;  %v5145_v5 = vld [vmem:[%s5428_s25 + $0x30] sm:$0xff]  ;;  %v9149_v36 = vld [vmem:[#allocation41_spill] sm:$0xff] }
 0x198   : > { %v1706_v47 = vpop.f32.mrf.mxu1  ;;  %v1413_v34 = vpop.f32.mrf.mxu3 }
 0x199   : > { %v6400_v14 = vadd.f32 %v1706_v47, %v1620_v51  ;;  %4862 = vmatmul.msk.f32.gmra.mxu0 %vm639_vm2, %v9124_v52  ;;  %v6408_v50 = vadd.f32 %v1413_v34, %v1311_v24  ;;  %v977_v52 = vadd.f32 %v6155_v39, %v6151_v60  ;;  %v9147_v39 = vld [vmem:[#allocation19_spill] sm:$0xff]  ;;  %v1642_v24 = vrot.slane %v6328_v23, 1 }
 0x19b   : > { %9143 = vst [vmem:[#allocation8_spill] sm:$0xff] %v6400_v14  ;;  %4896 = vmatmul.msk.f32.gmra.mxu1 %vm639_vm2, %v6289_v9  ;;  %4906 = vmatmul.msk.f32.gmra.mxu2 %vm639_vm2, %v9145_v41  ;;  %v9151_v41 = vld [vmem:[#allocation22_spill] sm:$0xff] }
 0x19d   : > { %4940 = vmatmul.msk.f32.gmra.mxu3 %vm639_vm2, %v5144_v20 }
 0x19e   : > { %v1549_v62 = vpop.f32.mrf.mxu0  ;;  %v1254_v28 = vpop.f32.mrf.mxu2 }
 0x19f   : > { %v1621_v11 = vadd.f32 %v1549_v62, %v6291_v63  ;;  %v1312_v37 = vadd.f32 %v1254_v28, %v977_v52 }
 0x1a0   : > { %v1709_v38 = vpop.f32.mrf.mxu1  ;;  %v1416_v63 = vpop.f32.mrf.mxu3 }
 0x1a1   : > { %v6415_v16 = vadd.f32 %v1709_v38, %v1621_v11  ;;  %4863 = vmatmul.msk.f32.gmra.mxu0 %vm639_vm2, %v9131_v49  ;;  %v6423_v6 = vadd.f32 %v1416_v63, %v1312_v37  ;;  %v5146_v37 = vld [vmem:[%s5428_s25 + $0x38] sm:$0xff]  ;;  %v9154_v63 = vld [vmem:[#allocation43_spill] sm:$0xff] }
 0x1a3   : > { %9146 = vst [vmem:[#allocation7_spill] sm:$0xff] %v6415_v16  ;;  %4897 = vmatmul.msk.f32.gmra.mxu1 %vm639_vm2, %v6314_v15  ;;  %4907 = vmatmul.msk.f32.gmra.mxu2 %vm639_vm2, %v9147_v39 }
 0x1a5   : > { %4941 = vmatmul.msk.f32.gmra.mxu3 %vm639_vm2, %v5145_v5 }
 0x1a6   : > { %v1552_v51 = vpop.f32.mrf.mxu0  ;;  %v1257_v49 = vpop.f32.mrf.mxu2 }
 0x1a7   : > { %v1622_v60 = vadd.f32 %v1552_v51, %v6316_v12  ;;  %v1313_v1 = vadd.f32 %v1257_v49, %v9149_v36  ;;  %v1641_v12 = vrot.slane %v6302_v17, 1  ;;  %v9155_v49 = vld [vmem:[#allocation25_spill] sm:$0xff]  ;;  %v6462_v36 = vsel %vm1015_vm3, %v1642_v24, 0.0 }
 0x1a8   : > { %v1712_v42 = vpop.f32.mrf.mxu1  ;;  %v1419_v34 = vpop.f32.mrf.mxu3  ;;  %9156 = vst [vmem:[#allocation16_spill] sm:$0xff] %v6462_v36 }
 0x1a9   : > { %v6428_v47 = vadd.f32 %v1712_v42, %v1622_v60  ;;  %4864 = vmatmul.msk.f32.gmra.mxu0 %vm639_vm2, %v9132_v25  ;;  %v6439_v62 = vadd.f32 %v1419_v34, %v1313_v1  ;;  %v6445_v52 = vsel %vm1015_vm3, %v1641_v12, %v1642_v24  ;;  %v5147_v34 = vld [vmem:[%s5428_s25 + $0x40] sm:$0xff] }
 0x1aa   : > { %9152 = vst [vmem:[#allocation13_spill] sm:$0xff] %v6445_v52 }
 0x1ab   : > { %9148 = vst [vmem:[#allocation10_spill] sm:$0xff] %v6428_v47  ;;  %4898 = vmatmul.msk.f32.gmra.mxu1 %vm639_vm2, %v6340_v43  ;;  %4908 = vmatmul.msk.f32.gmra.mxu2 %vm639_vm2, %v9151_v41 }
 0x1ac   : > { %9150 = vst [vmem:[#allocation9_spill] sm:$0xff] %v6439_v62 }
 0x1ad   : > { %4942 = vmatmul.msk.f32.gmra.mxu3 %vm639_vm2, %v5146_v37 }
 0x1ae   : > { %v1555_v11 = vpop.f32.mrf.mxu0  ;;  %v1260_v20 = vpop.f32.mrf.mxu2 }
 0x1af   : > { %v1623_v25 = vadd.f32 %v1555_v11, %v6342_v32  ;;  %v1314_v51 = vadd.f32 %v1260_v20, %v9154_v63  ;;  %v9158_v11 = vld [vmem:[#allocation45_spill] sm:$0xff]  ;;  %v9160_v20 = vld [vmem:[#allocation28_spill] sm:$0xff] }
 0x1b0   : > { %v1715_v38 = vpop.f32.mrf.mxu1  ;;  %v1422_v32 = vpop.f32.mrf.mxu3 }
 0x1b1   : > { %v6447_v28 = vadd.f32 %v1715_v38, %v1623_v25  ;;  %4865 = vmatmul.msk.f32.gmra.mxu0 %vm639_vm2, %v6302_v17  ;;  %v6456_v60 = vadd.f32 %v1422_v32, %v1314_v51  ;;  %v9162_v51 = vld [vmem:[#allocation38_spill] sm:$0xff] }
 0x1b3   : > { %9153 = vst [vmem:[#allocation11_spill] sm:$0xff] %v6447_v28  ;;  %4899 = vmatmul.msk.f32.gmra.mxu1 %vm639_vm2, %v6445_v52  ;;  %4909 = vmatmul.msk.f32.gmra.mxu2 %vm639_vm2, %v9155_v49 }
 0x1b5   : > { %4943 = vmatmul.msk.f32.gmra.mxu3 %vm639_vm2, %v5147_v34 }
 0x1b6   : > { %v1558_v39 = vpop.f32.mrf.mxu0  ;;  %v1263_v12 = vpop.f32.mrf.mxu2 }
 0x1b7   : > { %v1624_v42 = vadd.f32 %v1558_v39, %v6360_v22  ;;  %v1315_v25 = vadd.f32 %v1263_v12, %v9158_v11  ;;  %v5148_v39 = vld [vmem:[%s5428_s25 + $0x48] sm:$0xff]  ;;  %v9165_v11 = vld [vmem:[#allocation31_spill] sm:$0xff] }
 0x1b8   : > { %v1718_v5 = vpop.f32.mrf.mxu1  ;;  %v1425_v22 = vpop.f32.mrf.mxu3 }
 0x1b9   : > { %v6464_v1 = vadd.f32 %v1718_v5, %v1624_v42  ;;  %4866 = vmatmul.msk.f32.gmra.mxu0 %vm639_vm2, %v6328_v23  ;;  %v6473_v41 = vadd.f32 %v1425_v22, %v1315_v25  ;;  %v9163_v42 = vld [vmem:[#allocation47_spill] sm:$0xff] }
 0x1bb   : > { %9157 = vst [vmem:[#allocation19_spill] sm:$0xff] %v6464_v1  ;;  %4900 = vmatmul.msk.f32.gmra.mxu1 %vm639_vm2, %v6462_v36  ;;  %4910 = vmatmul.msk.f32.gmra.mxu2 %vm639_vm2, %v9160_v20  ;;  %v9223_v36 = vld [vmem:[#allocation5_spill] sm:$0xff] }
 0x1bc   : > { %9159 = vst [vmem:[#allocation41_spill] sm:$0xff] %v6473_v41 }
 0x1bd   : > { %4944 = vmatmul.msk.f32.gmra.mxu3 %vm639_vm2, %v5148_v39 }
 0x1be   : > { %v1561_v24 = vpop.f32.mrf.mxu0  ;;  %v1266_v32 = vpop.f32.mrf.mxu2 }
 0x1bf   : > { %v1625_v38 = vadd.f32 %v1561_v24, %v6378_v48  ;;  %v1316_v49 = vadd.f32 %v1266_v32, %v9163_v42  ;;  %v9167_v24 = vld [vmem:[#allocation40_spill] sm:$0xff] }
 0x1c0   : > { %v1721_v37 = vpop.f32.mrf.mxu1  ;;  %v1428_v5 = vpop.f32.mrf.mxu3 }
 0x1c1   : > { %v6478_v63 = vadd.f32 %v1721_v37, %v1625_v38  ;;  %4969 = vmatmul.msk.f32.vlgmr.msra.gmra.mxu0 %vm639_vm2, %v9162_v51  ;;  %v6485_v12 = vadd.f32 %v1428_v5, %v1316_v49  ;;  %v3208_v38 = vld [vmem:[%s8932_s5 + $0x8] sm:$0xff]  ;;  %v5149_v37 = vld [vmem:[%s5428_s25 + $0x50] sm:$0xff]  ;;  %v9170_v5 = vld [vmem:[#allocation33_spill] sm:$0xff] }
 0x1c2   : > { %3326 = vmatpush.msra.mxu1 %v3208_v38  ;;  %v9173_v38 = vld [vmem:[#allocation51_spill] sm:$0xff] }
 0x1c3   : > { %9161 = vst [vmem:[#allocation22_spill] sm:$0xff] %v6478_v63  ;;  %4911 = vmatmul.msk.f32.gmra.mxu2 %vm639_vm2, %v9165_v11  ;;  %v9172_v11 = vld [vmem:[#allocation42_spill] sm:$0xff] }
 0x1c4   : > { %9164 = vst [vmem:[#allocation43_spill] sm:$0xff] %v6485_v12 }
 0x1c5   : > { %4945 = vmatmul.msk.f32.gmra.mxu3 %vm639_vm2, %v5149_v37 }
 0x1c6   : > { %v1564_v48 = vpop.f32.mrf.mxu0  ;;  %v1269_v20 = vpop.f32.mrf.mxu2 }
 0x1c7   : > { %v1626_v34 = vadd.f32 %v1564_v48, %v6393_v35  ;;  %v9168_v35 = vld [vmem:[#allocation49_spill] sm:$0xff] }
 0x1c8   : > { %v1724_v25 = vpop.f32.mrf.mxu1  ;;  %v1317_v51 = vadd.f32 %v1269_v20, %v9168_v35  ;;  %v1431_v32 = vpop.f32.mrf.mxu3 }
 0x1c9   : > { %v6490_v22 = vadd.f32 %v1724_v25, %v1626_v34  ;;  %4970 = vmatmul.msk.f32.gmra.mxu0 %vm639_vm2, %v9167_v24  ;;  %v5150_v24 = vld [vmem:[%s5428_s25 + $0x58] sm:$0xff] }
 0x1ca   : > { %v6500_v39 = vadd.f32 %v1431_v32, %v1317_v51  ;;  %v9175_v32 = vld [vmem:[#allocation35_spill] sm:$0xff] }
 0x1cb   : > { %9166 = vst [vmem:[#allocation25_spill] sm:$0xff] %v6490_v22  ;;  %4912 = vmatmul.msk.f32.gmra.mxu2 %vm639_vm2, %v9170_v5  ;;  %v9177_v5 = vld [vmem:[#allocation44_spill] sm:$0xff] }
 0x1cc   : > { %9169 = vst [vmem:[#allocation45_spill] sm:$0xff] %v6500_v39 }
 0x1cd   : > { %4946 = vmatmul.msk.f32.gmra.mxu3 %vm639_vm2, %v5150_v24 }
 0x1ce   : > { %v1567_v42 = vpop.f32.mrf.mxu0  ;;  %v1272_v25 = vpop.f32.mrf.mxu2 }
 0x1cf   : > { %v1627_v49 = vadd.f32 %v1567_v42, %v6408_v50  ;;  %v1318_v20 = vadd.f32 %v1272_v25, %v9173_v38  ;;  %v9178_v25 = vld [vmem:[#allocation53_spill] sm:$0xff] }
 0x1d0   : > { %v1727_v48 = vpop.f32.mrf.mxu1  ;;  %v1434_v37 = vpop.f32.mrf.mxu3 }
 0x1d1   : > { %v6505_v34 = vadd.f32 %v1727_v48, %v1627_v49  ;;  %4971 = vmatmul.msk.f32.gmra.mxu0 %vm639_vm2, %v9172_v11  ;;  %v6512_v35 = vadd.f32 %v1434_v37, %v1318_v20  ;;  %v5151_v11 = vld [vmem:[%s5428_s25 + $0x60] sm:$0xff]  ;;  %v9181_v37 = vld [vmem:[#allocation36_spill] sm:$0xff] }
 0x1d3   : > { %9171 = vst [vmem:[#allocation28_spill] sm:$0xff] %v6505_v34  ;;  %4913 = vmatmul.msk.f32.gmra.mxu2 %vm639_vm2, %v9175_v32 }
 0x1d4   : > { %9174 = vst [vmem:[#allocation38_spill] sm:$0xff] %v6512_v35 }
 0x1d5   : > { %4947 = vmatmul.msk.f32.gmra.mxu3 %vm639_vm2, %v5151_v11 }
 0x1d6   : > { %v1570_v50 = vpop.f32.mrf.mxu0  ;;  %v1275_v48 = vpop.f32.mrf.mxu2 }
 0x1d7   : > { %v1628_v51 = vadd.f32 %v1570_v50, %v6423_v6  ;;  %v1319_v24 = vadd.f32 %v1275_v48, %v9178_v25 }
 0x1d8   : > { %v1730_v42 = vpop.f32.mrf.mxu1  ;;  %v1437_v38 = vpop.f32.mrf.mxu3 }
 0x1d9   : > { %v6517_v49 = vadd.f32 %v1730_v42, %v1628_v51  ;;  %4972 = vmatmul.msk.f32.gmra.mxu0 %vm639_vm2, %v9177_v5  ;;  %v6524_v20 = vadd.f32 %v1437_v38, %v1319_v24  ;;  %v9183_v51 = vld [vmem:[#allocation46_spill] sm:$0xff] }
 0x1da   : > { %v5152_v42 = vld [vmem:[%s5428_s25 + $0x68] sm:$0xff] }
 0x1db   : > { %9176 = vst [vmem:[#allocation47_spill] sm:$0xff] %v6517_v49  ;;  %4914 = vmatmul.msk.f32.gmra.mxu2 %vm639_vm2, %v9181_v37  ;;  %v9184_v5 = vld [vmem:[#allocation54_spill] sm:$0xff]  ;;  %v9186_v37 = vld [vmem:[#allocation37_spill] sm:$0xff] }
 0x1dc   : > { %9179 = vst [vmem:[#allocation31_spill] sm:$0xff] %v6524_v20  ;;  %v9221_v20 = vld [vmem:[#allocation32_spill] sm:$0xff] }
 0x1dd   : > { %4948 = vmatmul.msk.f32.gmra.mxu3 %vm639_vm2, %v5152_v42  ;;  %v5153_v42 = vld [vmem:[%s5428_s25 + $0x70] sm:$0xff] }
 0x1de   : > { %v6526_v6 = vpop.f32.mrf.mxu0  ;;  %v1278_v32 = vpop.f32.mrf.mxu2 }
 0x1df   : > { %9180 = vst [vmem:[#allocation40_spill] sm:$0xff] %v6526_v6  ;;  %v1320_v48 = vadd.f32 %v1278_v32, %v9184_v5  ;;  %v9189_v32 = vld [vmem:[#allocation55_spill] sm:$0xff] }
 0x1e0   : > { %v6530_v50 = vpop.f32.mrf.mxu1  ;;  %v1440_v11 = vpop.f32.mrf.mxu3  ;;  %v9240_v6 = vld [vmem:[#allocation23_spill] sm:$0xff] }
 0x1e1   : > { %9182 = vst [vmem:[#allocation49_spill] sm:$0xff] %v6530_v50  ;;  %4973 = vmatmul.msk.f32.gmra.mxu0 %vm639_vm2, %v9183_v51  ;;  %v6537_v25 = vadd.f32 %v1440_v11, %v1320_v48  ;;  %v9188_v51 = vld [vmem:[#allocation48_spill] sm:$0xff] }
 0x1e3   : > { %9185 = vst [vmem:[#allocation33_spill] sm:$0xff] %v6537_v25  ;;  %4915 = vmatmul.msk.f32.gmra.mxu2 %vm639_vm2, %v9186_v37  ;;  %v5154_v37 = vld [vmem:[%s5428_s25 + $0x78] sm:$0xff]  ;;  %v6693_v25 = vld [vmem:[%s9216_s3 + $0x2] ss:$0 sm:$0xff] }
 0x1e4   : > { %v2664_v1 = vmul.f32 %v6693_v25, %v9221_v20  ;;  %v9226_v20 = vld [vmem:[#allocation14_spill] sm:$0xff] }
 0x1e5   : > { %4949 = vmatmul.msk.f32.gmra.mxu3 %vm639_vm2, %v5153_v42 }
 0x1e6   : > { %v1576_v24 = vpop.f32.mrf.mxu0  ;;  %v1281_v22 = vpop.f32.mrf.mxu2 }
 0x1e7   : > { %v1630_v38 = vadd.f32 %v1576_v24, %v6456_v60  ;;  %v1321_v5 = vadd.f32 %v1281_v22, %v9189_v32  ;;  %v9192_v24 = vld [vmem:[#allocation39_spill] sm:$0xff] }
 0x1e8   : > { %v1736_v49 = vpop.f32.mrf.mxu1  ;;  %v1443_v48 = vpop.f32.mrf.mxu3 }
 0x1e9   : > { %v6542_v34 = vadd.f32 %v1736_v49, %v1630_v38  ;;  %4974 = vmatmul.msk.f32.gmra.mxu0 %vm639_vm2, %v9188_v51  ;;  %v6549_v11 = vadd.f32 %v1443_v48, %v1321_v5  ;;  %v9193_v49 = vld [vmem:[#allocation50_spill] sm:$0xff]  ;;  %v9194_v51 = vld [vmem:[#allocation56_spill] sm:$0xff] }
 0x1ea   : > { %v9197_v48 = vld [vmem:[#allocation52_spill] sm:$0xff] }
 0x1eb   : > { %9187 = vst [vmem:[#allocation42_spill] sm:$0xff] %v6542_v34  ;;  %4916 = vmatmul.msk.f32.gmra.mxu2 %vm639_vm2, %v9192_v24  ;;  %v9198_v34 = vld [vmem:[#allocation57_spill] sm:$0xff] }
 0x1ec   : > { %9190 = vst [vmem:[#allocation51_spill] sm:$0xff] %v6549_v11 }
 0x1ed   : > { %4950 = vmatmul.msk.f32.gmra.mxu3 %vm639_vm2, %v5154_v37 }
 0x1ee   : > { %v6551_v60 = vpop.f32.mrf.mxu0  ;;  %v1284_v38 = vpop.f32.mrf.mxu2 }
 0x1ef   : > { %9191 = vst [vmem:[#allocation35_spill] sm:$0xff] %v6551_v60  ;;  %v1322_v42 = vadd.f32 %v1284_v38, %v9194_v51 }
 0x1f0   : > { %v1446_v22 = vpop.f32.mrf.mxu3 }
 0x1f1   : > { %4975 = vmatmul.msk.f32.gmra.mxu0 %vm639_vm2, %v9193_v49  ;;  %v6560_v32 = vadd.f32 %v1446_v22, %v1322_v42  ;;  %v5155_v49 = vld [vmem:[%s5428_s25 + $0x80] sm:$0xff]  ;;  %v5156_v42 = vld [vmem:[%s5428_s25 + $0x88] sm:$0xff] }
 0x1f2   : > { %v9201_v22 = vld [vmem:[#allocation58_spill] sm:$0xff] }
 0x1f3   : > { %9195 = vst [vmem:[#allocation44_spill] sm:$0xff] %v6560_v32  ;;  %4917 = vmatmul.msk.f32.gmra.mxu2 %vm639_vm2, %v5829_v40  ;;  %v9212_v32 = vld [vmem:[#allocation61_spill] sm:$0xff] }
 0x1f5   : > { %4951 = vmatmul.msk.f32.gmra.mxu3 %vm639_vm2, %v5155_v49  ;;  %v5157_v49 = vld [vmem:[%s5428_s25 + $0x90] sm:$0xff] }
 0x1f6   : > { %v6562_v5 = vpop.f32.mrf.mxu0  ;;  %v1287_v24 = vpop.f32.mrf.mxu2 }
 0x1f7   : > { %9196 = vst [vmem:[#allocation53_spill] sm:$0xff] %v6562_v5  ;;  %v1323_v37 = vadd.f32 %v1287_v24, %v9198_v34 }
 0x1f8   : > { %v1449_v63 = vpop.f32.mrf.mxu3 }
 0x1f9   : > { %4976 = vmatmul.msk.f32.gmra.mxu0 %vm639_vm2, %v9197_v48  ;;  %v6571_v38 = vadd.f32 %v1449_v63, %v1323_v37 }
 0x1fb   : > { %9199 = vst [vmem:[#allocation36_spill] sm:$0xff] %v6571_v38  ;;  %4918 = vmatmul.msk.f32.gmra.mxu2 %vm639_vm2, %v5855_v46  ;;  %v3207_v46 = vld [vmem:[%s8932_s5] sm:$0xff] }
 0x1fc   : > { %3327 = vmatpush.msra.mxu1 %v3207_v46 }
 0x1fd   : > { %4952 = vmatmul.msk.f32.gmra.mxu3 %vm639_vm2, %v5156_v42 }
 0x1fe   : > { %v6573_v51 = vpop.f32.mrf.mxu0  ;;  %v1290_v40 = vpop.f32.mrf.mxu2 }
 0x1ff   : > { %9200 = vst [vmem:[#allocation46_spill] sm:$0xff] %v6573_v51  ;;  %v1324_v48 = vadd.f32 %v1290_v40, %v9201_v22 }
 0x200   : > { %v1452_v34 = vpop.f32.mrf.mxu3 }
 0x201   : > { %4977 = vmatmul.msk.f32.gmra.mxu0 %vm639_vm2, %v5955_v0  ;;  %v6582_v24 = vadd.f32 %v1452_v34, %v1324_v48 }
 0x203   : > { %9202 = vst [vmem:[#allocation54_spill] sm:$0xff] %v6582_v24  ;;  %4919 = vmatmul.msk.f32.gmra.mxu2 %vm639_vm2, %v5444_v10 }
 0x205   : > { %4953 = vmatmul.msk.f32.gmra.mxu3 %vm639_vm2, %v5157_v49 }
 0x206   : > { %v6584_v63 = vpop.f32.mrf.mxu0  ;;  %v1823_v0 = vpop.f32.mrf.mxu2 }
 0x207   : > { %9203 = vst [vmem:[#allocation37_spill] sm:$0xff] %v6584_v63  ;;  %v6708_v63 = vld [vmem:[%s9216_s3 + $0x4] ss:$0 sm:$0xff] }
 0x208   : > { %v1973_v37 = vpop.f32.mrf.mxu3 }
 0x209   : > { %4978 = vmatmul.msk.f32.gmra.mxu0 %vm639_vm2, %v5972_v30  ;;  %v5158_v30 = vld [vmem:[%s5428_s25 + $0x98] sm:$0xff] }
 0x20b   : > { %4920 = vmatmul.msk.f32.gmra.mxu2 %vm639_vm2, %v5455_v13  ;;  %v5159_v13 = vld [vmem:[%s5428_s25 + $0xa0] sm:$0xff] }
 0x20d   : > { %4954 = vmatmul.msk.f32.gmra.mxu3 %vm639_vm2, %v5158_v30  ;;  %v5161_v30 = vld [vmem:[%s5428_s25 + $0xb0] sm:$0xff] }
 0x20e   : > { %v6595_v40 = vpop.f32.mrf.mxu0  ;;  %v1826_v10 = vpop.f32.mrf.mxu2 }
 0x20f   : > { %9204 = vst [vmem:[#allocation48_spill] sm:$0xff] %v6595_v40 }
 0x210   : > { %v1976_v42 = vpop.f32.mrf.mxu3 }
 0x211   : > { %4979 = vmatmul.msk.f32.gmra.mxu0 %vm639_vm2, %v5991_v31 }
 0x213   : > { %4921 = vmatmul.msk.f32.gmra.mxu2 %vm639_vm2, %v5477_v19 }
 0x215   : > { %4955 = vmatmul.msk.f32.gmra.mxu3 %vm639_vm2, %v5159_v13 }
 0x216   : > { %v6603_v22 = vpop.f32.mrf.mxu0  ;;  %v6609_v48 = vpop.f32.mrf.mxu2 }
 0x217   : > { %9205 = vst [vmem:[#allocation55_spill] sm:$0xff] %v6603_v22 }
 0x218   : > { %v6613_v31 = vpop.f32.mrf.mxu3 }
 0x219   : > { %4980 = vmatmul.msk.f32.gmra.mxu0 %vm639_vm2, %v6008_v53  ;;  %v5160_v53 = vld [vmem:[%s5428_s25 + $0xa8] sm:$0xff] }
 0x21b   : > { %4922 = vmatmul.msk.f32.gmra.mxu2 %vm639_vm2, %v5507_v27 }
 0x21d   : > { %4956 = vmatmul.msk.f32.gmra.mxu3 %vm639_vm2, %v5160_v53  ;;  %v5162_v53 = vld [vmem:[%s5428_s25 + $0xb8] sm:$0xff] }
 0x21e   : > { %v6615_v34 = vpop.f32.mrf.mxu0  ;;  %v6621_v19 = vpop.f32.mrf.mxu2 }
 0x21f   : > { %9206 = vst [vmem:[#allocation39_spill] sm:$0xff] %v6615_v34  ;;  %v5163_v34 = vld [vmem:[%s5428_s25 + $0xc0] sm:$0xff] }
 0x220   : > { %v6625_v46 = vpop.f32.mrf.mxu3 }
 0x221   : > { %4981 = vmatmul.msk.f32.gmra.mxu0 %vm639_vm2, %v6027_v55 }
 0x223   : > { %4923 = vmatmul.msk.f32.gmra.mxu2 %vm639_vm2, %v5529_v33 }
 0x225   : > { %4957 = vmatmul.msk.f32.gmra.mxu3 %vm639_vm2, %v5161_v30 }
 0x226   : > { %v6627_v49 = vpop.f32.mrf.mxu0  ;;  %v6633_v27 = vpop.f32.mrf.mxu2 }
 0x227   : > { %9207 = vst [vmem:[#allocation50_spill] sm:$0xff] %v6627_v49  ;;  %v9211_v49 = vld [vmem:[#allocation70_spill] sm:$0xff] }
 0x228   : > { %v6637_v55 = vpop.f32.mrf.mxu3 }
 0x229   : > { %4982 = vmatmul.msk.f32.gmra.mxu0 %vm639_vm2, %v6046_v45  ;;  %v9209_v45 = vld [vmem:[#allocation59_spill] sm:$0xff] }
 0x22a   : > { %v1609_v24 = vadd.f32 %v6170_v7, %v9209_v45  ;;  %v9214_v7 = vld [vmem:[#allocation72_spill] sm:$0xff] }
 0x22b   : > { %4924 = vmatmul.msk.f32.gmra.mxu2 %vm639_vm2, %v9106_v21 }
 0x22d   : > { %4958 = vmatmul.msk.f32.gmra.mxu3 %vm639_vm2, %v5162_v53  ;;  %v9213_v53 = vld [vmem:[#allocation60_spill] sm:$0xff] }
 0x22e   : > { %v6639_v13 = vpop.f32.mrf.mxu0  ;;  %v6645_v33 = vpop.f32.mrf.mxu2  ;;  %v1610_v45 = vadd.f32 %v9214_v7, %v9213_v53  ;;  %v9218_v53 = vld [vmem:[#allocation6_spill] sm:$0xff] }
 0x22f   : > { %9208 = vst [vmem:[#allocation56_spill] sm:$0xff] %v6639_v13  ;;  %v1769_v13 = vadd.f32 %v9211_v49, %v1609_v24  ;;  %v6681_v24 = vld [vmem:[%s9216_s3 + $0x1] ss:$0 sm:$0xff] }
 0x230   : > { %v6651_v30 = vpop.f32.mrf.mxu3 }
 0x231   : > { %4983 = vmatmul.msk.f32.gmra.mxu0 %vm639_vm2, %v6067_v54  ;;  %v1919_v21 = vadd.f32 %v1823_v0, %v1769_v13 }
 0x233   : > { %4925 = vmatmul.msk.f32.gmra.mxu2 %vm639_vm2, %v9111_v44  ;;  %v2069_v11 = vadd.f32 %v1973_v37, %v1919_v21  ;;  %v6671_v44 = vld [vmem:[%s9215_s2] ss:$0 sm:$0xff] }
 0x234   : > { %v9217_v37 = vld [vmem:[#allocation73_spill] sm:$0xff] }
 0x235   : > { %4959 = vmatmul.msk.f32.gmra.mxu3 %vm639_vm2, %v5163_v34  ;;  %v1770_v34 = vadd.f32 %v9217_v37, %v1610_v45  ;;  %v9219_v45 = vld [vmem:[#allocation62_spill] sm:$0xff] }
 0x236   : > { %v6653_v38 = vpop.f32.mrf.mxu0  ;;  %v6660_v54 = vpop.f32.mrf.mxu2  ;;  %v9220_v37 = vld [vmem:[#allocation74_spill] sm:$0xff] }
 0x237   : > { %9210 = vst [vmem:[#allocation52_spill] sm:$0xff] %v6653_v38  ;;  %v1920_v13 = vadd.f32 %v1826_v10, %v1770_v34  ;;  %v2508_v38 = vmul.f32 0.0, %v6681_v24  ;;  %v5164_v10 = vld [vmem:[%s5428_s25 + $0xc8] sm:$0xff] }
 0x238   : > { %v6666_v22 = vpop.f32.mrf.mxu3 }
 0x239   : > { %4984 = vmatmul.msk.f32.gmra.mxu0 %vm639_vm2, %v9212_v32  ;;  %v6676_v32 = vld [vmem:[%s9216_s3] ss:$0 sm:$0xff]  ;;  %v2070_v34 = vadd.f32 %v1976_v42, %v1920_v13 }
 0x23a   : > { %v2442_v7 = vmul.f32 %v6676_v32, %v9218_v53  ;;  %v9224_v13 = vld [vmem:[#allocation21_spill] sm:$0xff] }
 0x23b   : > { %4926 = vmatmul.msk.f32.gmra.mxu2 %vm639_vm2, %v9117_v57  ;;  %v1611_v57 = vadd.f32 %v9220_v37, %v9219_v45  ;;  %v9222_v45 = vld [vmem:[#allocation75_spill] sm:$0xff] }
 0x23c   : > { %v2539_v40 = vadd.f32 %v2508_v38, %v2442_v7 }
 0x23d   : > { %4960 = vmatmul.msk.f32.gmra.mxu3 %vm639_vm2, %v5164_v10  ;;  %v1771_v37 = vadd.f32 %v9222_v45, %v1611_v57  ;;  %v9225_v10 = vld [vmem:[#allocation63_spill] sm:$0xff]  ;;  %v9227_v45 = vld [vmem:[#allocation64_spill] sm:$0xff] }
 0x23e   : > { %v2123_v0 = vpop.f32.mrf.mxu0  ;;  %v1612_v28 = vadd.f32 %v9226_v20, %v9225_v10  ;;  %v2696_v39 = vadd.f32 %v2664_v1, %v2539_v40  ;;  %v5165_v1 = vld [vmem:[%s5428_s25 + $0xd0] sm:$0xff]  ;;  %v9230_v10 = vld [vmem:[#allocation65_spill] sm:$0xff] }
 0x23f   : > { %v2219_v49 = vadd.f32 %v2123_v0, %v2069_v11  ;;  %v6699_v11 = vpop.f32.mrf.mxu2  ;;  %v1921_v51 = vadd.f32 %v6609_v48, %v1771_v37  ;;  %v9229_v37 = vld [vmem:[#allocation17_spill] sm:$0xff] }
 0x241   : > { %v2255_v21 = vadd.f32 %v6671_v44, %v2219_v49  ;;  %4985 = vmatmul.msk.f32.gmra.mxu0 %vm639_vm2, %v6107_v56  ;;  %v6710_v56 = vpop.f32.mrf.mxu3  ;;  %v2071_v60 = vadd.f32 %v6613_v31, %v1921_v51 }
 0x243   : > { %v2287_v0 = vmax.f32 %v2255_v21, 0.0  ;;  %v2443_v21 = vmul.f32 %v6676_v32, %v9223_v36  ;;  %4927 = vmatmul.msk.f32.gmra.mxu2 %vm639_vm2, %v9224_v13  ;;  %v6729_v13 = vld [vmem:[%s9216_s3 + $0x5] ss:$0 sm:$0xff] }
 0x245   : > { %v2349_v49 = vrot.slane %v2287_v0, 7  ;;  %4961 = vmatmul.msk.f32.gmra.mxu3 %vm639_vm2, %v5165_v1  ;;  %v2509_v41 = vmul.f32 %v6681_v24, %v2287_v0  ;;  %v2571_v52 = vrot.slane %v2287_v0, 1 }
 0x246   : > { %v2126_v35 = vpop.f32.mrf.mxu0 }
 0x247   : > { %v2425_v42 = vsel %vm556_vm1, 0.0, %v2349_v49  ;;  %v2220_v7 = vadd.f32 %v2126_v35, %v2070_v34  ;;  %v2540_v35 = vadd.f32 %v2508_v38, %v2443_v21  ;;  %v9228_v34 = vld [vmem:[#allocation34_spill] sm:$0xff]  ;;  %v6733_v48 = vpop.f32.mrf.mxu2 }
 0x248   : > { %v2739_v5 = vmul.f32 %v6708_v63, %v2425_v42  ;;  %v2444_v12 = vmul.f32 %v6676_v32, %v2425_v42  ;;  %v2665_v20 = vmul.f32 %v6693_v25, %v9228_v34  ;;  %v6745_v34 = vld [vmem:[%s9216_s3 + $0x6] ss:$0 sm:$0xff] }
 0x249   : > { %v2256_v57 = vadd.f32 %v6671_v44, %v2220_v7  ;;  %4986 = vmatmul.msk.f32.gmra.mxu0 %vm639_vm2, %v9227_v45  ;;  %v1772_v7 = vadd.f32 %v9229_v37, %v1612_v28  ;;  %v9231_v45 = vld [vmem:[#allocation18_spill] sm:$0xff]  ;;  %v6747_v1 = vpop.f32.mrf.mxu3  ;;  %v2805_v37 = vmul.f32 %v6729_v13, %v2287_v0 }
 0x24a   : > { %v1613_v42 = vadd.f32 %v9231_v45, %v9230_v10  ;;  %v2771_v38 = vadd.f32 %v2739_v5, %v2696_v39  ;;  %v2697_v10 = vadd.f32 %v2665_v20, %v2540_v35  ;;  %v9232_v35 = vld [vmem:[#allocation66_spill] sm:$0xff] }
 0x24b   : > { %v2288_v40 = vmax.f32 %v2256_v57, 0.0  ;;  %v1922_v28 = vadd.f32 %v6621_v19, %v1772_v7  ;;  %v2541_v57 = vadd.f32 %v2509_v41, %v2444_v12  ;;  %4928 = vmatmul.msk.f32.gmra.mxu2 %vm639_vm2, %v9125_v58 }
 0x24c   : > { %v2837_v0 = vadd.f32 %v2805_v37, %v2771_v38 }
 0x24d   : > { %v2350_v21 = vrot.slane %v2288_v40, 7  ;;  %v2572_v47 = vrot.slane %v2288_v40, 1  ;;  %v2510_v19 = vmul.f32 %v6681_v24, %v2288_v40 }
 0x24e   : > { %v2129_v51 = vpop.f32.mrf.mxu0 }
 0x24f   : > { %v2351_v31 = vsel %vm556_vm1, %v2349_v49, %v2350_v21  ;;  %v2573_v39 = vsel %vm1015_vm3, %v2571_v52, %v2572_v47  ;;  %v2647_v5 = vsel %vm1015_vm3, %v2572_v47, 0.0  ;;  %v2221_v45 = vadd.f32 %v2129_v51, %v2071_v60  ;;  %v6766_v21 = vpop.f32.mrf.mxu2  ;;  %v5166_v51 = vld [vmem:[%s5428_s25 + $0xd8] sm:$0xff] }
 0x250   : > { %v2445_v50 = vmul.f32 %v6676_v32, %v2351_v31  ;;  %v2666_v41 = vmul.f32 %v6693_v25, %v2573_v39  ;;  %v2740_v12 = vmul.f32 %v6708_v63, %v2351_v31  ;;  %v2806_v49 = vmul.f32 %v6729_v13, %v2288_v40  ;;  %4962 = vmatmul.msk.f32.gmra.mxu3 %vm639_vm2, %v5166_v51  ;;  %v9238_v51 = vld [vmem:[#allocation24_spill] sm:$0xff] }
 0x251   : > { %v2877_v52 = vmul.f32 %v6745_v34, %v2573_v39  ;;  %v2257_v47 = vadd.f32 %v6671_v44, %v2221_v45  ;;  %4987 = vmatmul.msk.f32.gmra.mxu0 %vm639_vm2, %v9232_v35  ;;  %v2667_v60 = vmul.f32 %v6693_v25, %v2647_v5  ;;  %v2878_v39 = vmul.f32 %v6745_v34, %v2647_v5  ;;  %v6779_v45 = vpop.f32.mrf.mxu3 }
 0x252   : > { %v2542_v58 = vadd.f32 %v2510_v19, %v2445_v50  ;;  %v2698_v20 = vadd.f32 %v2666_v41, %v2541_v57  ;;  %v2772_v7 = vadd.f32 %v2740_v12, %v2697_v10  ;;  %v6776_v50 = vld [vmem:[%s9216_s3 + $0x8] ss:$0 sm:$0xff]  ;;  %v2072_v57 = vadd.f32 %v6625_v46, %v1922_v28  ;;  %v9233_v19 = vld [vmem:[#allocation76_spill] sm:$0xff]  ;;  %v6785_v12 = vld [vmem:[%s9216_s3 + $0x9] ss:$0 sm:$0xff] }
 0x253   : > { %v2909_v38 = vadd.f32 %v2877_v52, %v2837_v0  ;;  %v2289_v37 = vmax.f32 %v2257_v47, 0.0  ;;  %v1773_v41 = vadd.f32 %v9233_v19, %v1613_v42  ;;  %v9234_v52 = vld [vmem:[#allocation27_spill] sm:$0xff]  ;;  %v9236_v28 = vld [vmem:[#allocation20_spill] sm:$0xff] }
 0x254   : > { %v6770_v40 = vadd.f32 %v2667_v60, %v2542_v58  ;;  %v2838_v31 = vadd.f32 %v2806_v49, %v2772_v7  ;;  %4929 = vmatmul.msk.f32.gmra.mxu2 %vm639_vm2, %v9234_v52  ;;  %v9235_v46 = vld [vmem:[#allocation67_spill] sm:$0xff]  ;;  %v9237_v7 = vld [vmem:[#allocation69_spill] sm:$0xff] }
 0x255   : > { %v2352_v10 = vrot.slane %v2289_v37, 7  ;;  %v1614_v35 = vadd.f32 %v9236_v28, %v9235_v46  ;;  %v1923_v58 = vadd.f32 %v6633_v27, %v1773_v41  ;;  %v1615_v19 = vadd.f32 %v9238_v51, %v9237_v7  ;;  %v5167_v27 = vld [vmem:[%s5428_s25 + $0xe0] sm:$0xff]  ;;  %v6811_v51 = vld [vmem:[%s9216_s3 + $0xa] ss:$0 sm:$0xff] }
 0x256   : > { %v2132_v0 = vpop.f32.mrf.mxu0  ;;  %v2910_v5 = vadd.f32 %v2878_v39, %v2838_v31  ;;  %v9239_v39 = vld [vmem:[#allocation68_spill] sm:$0xff]  ;;  %v2807_v52 = vmul.f32 %v6729_v13, %v2289_v37 }
 0x257   : > { %v2426_v49 = vsel %vm556_vm1, 0.0, %v2352_v10  ;;  %v2222_v47 = vadd.f32 %v2132_v0, %v2072_v57  ;;  %v3010_v0 = vmul.f32 %v6785_v12, %v2289_v37  ;;  %v6802_v46 = vpop.f32.mrf.mxu2  ;;  %v1774_v62 = vadd.f32 %v9240_v6, %v1614_v35 }
 0x258   : > { %v2741_v42 = vmul.f32 %v6708_v63, %v2426_v49  ;;  %v2944_v60 = vmul.f32 %v6776_v50, %v2426_v49  ;;  %4963 = vmatmul.msk.f32.gmra.mxu3 %vm639_vm2, %v5167_v27  ;;  %v2073_v7 = vadd.f32 %v6637_v55, %v1923_v58  ;;  %v2511_v55 = vmul.f32 %v6681_v24, %v2289_v37  ;;  %v9244_v27 = vld [vmem:[#allocation12_spill] sm:$0xff] }
 0x259   : > { %v2258_v31 = vadd.f32 %v6671_v44, %v2222_v47  ;;  %4988 = vmatmul.msk.f32.gmra.mxu0 %vm639_vm2, %v9239_v39  ;;  %v2574_v39 = vrot.slane %v2289_v37, 1  ;;  %v6814_v15 = vpop.f32.mrf.mxu3  ;;  %v1924_v6 = vadd.f32 %v6645_v33, %v1774_v62  ;;  %v6830_v33 = vld [vmem:[%s9243_s4] ss:$0 sm:$0xff] }
 0x25a   : > { %v2976_v57 = vadd.f32 %v2944_v60, %v2909_v38  ;;  %v2773_v41 = vadd.f32 %v2741_v42, %v2698_v20  ;;  %v2446_v60 = vmul.f32 %v6676_v32, %v2426_v49  ;;  %9241 = vst [vmem:[#allocation57_spill] sm:$0xff] %v6814_v15  ;;  %v9242_v20 = vld [vmem:[#allocation77_spill] sm:$0xff] }
 0x25b   : > { %v2290_v28 = vmax.f32 %v2258_v31, 0.0  ;;  %v1775_v42 = vadd.f32 %v9242_v20, %v1615_v19 }
 0x25c   : > { %v3041_v47 = vadd.f32 %v3010_v0, %v2976_v57  ;;  %v2839_v38 = vadd.f32 %v2807_v52, %v2773_v41  ;;  %4930 = vmatmul.msk.f32.gmra.mxu2 %vm639_vm2, %v9133_v2  ;;  %v2543_v0 = vadd.f32 %v2511_v55, %v2446_v60  ;;  %v5168_v41 = vld [vmem:[%s5428_s25 + $0xe8] sm:$0xff] }
 0x25d   : > { %v2353_v43 = vrot.slane %v2290_v28, 7  ;;  %v2575_v16 = vrot.slane %v2290_v28, 1  ;;  %v2512_v57 = vmul.f32 %v6681_v24, %v2290_v28 }
 0x25e   : > { %v2135_v35 = vpop.f32.mrf.mxu0 }
 0x25f   : > { %v2576_v58 = vsel %vm1015_vm3, %v2574_v39, %v2575_v16  ;;  %v2223_v31 = vadd.f32 %v2135_v35, %v2073_v7  ;;  %v2354_v49 = vsel %vm556_vm1, %v2352_v10, %v2353_v43  ;;  %v2648_v52 = vsel %vm1015_vm3, %v2575_v16, 0.0  ;;  %v6838_v10 = vpop.f32.mrf.mxu2 }
 0x260   : > { %v2668_v19 = vmul.f32 %v6693_v25, %v2576_v58  ;;  %v3075_v62 = vmul.f32 %v6811_v51, %v2576_v58  ;;  %v2447_v37 = vmul.f32 %v6676_v32, %v2354_v49  ;;  %v2742_v43 = vmul.f32 %v6708_v63, %v2354_v49  ;;  %9245 = vst [vmem:[#allocation58_spill] sm:$0xff] %v6838_v10 }
 0x261   : > { %v2259_v2 = vadd.f32 %v6671_v44, %v2223_v31  ;;  %4989 = vmatmul.msk.f32.gmra.mxu0 %vm639_vm2, %v9244_v27  ;;  %v2945_v16 = vmul.f32 %v6776_v50, %v2354_v49  ;;  %4964 = vmatmul.msk.f32.gmra.mxu3 %vm639_vm2, %v5168_v41  ;;  %v2669_v20 = vmul.f32 %v6693_v25, %v2648_v52 }
 0x262   : > { %v3107_v7 = vadd.f32 %v3075_v62, %v3041_v47  ;;  %v2544_v39 = vadd.f32 %v2512_v57, %v2447_v37  ;;  %v2879_v60 = vmul.f32 %v6745_v34, %v2576_v58  ;;  %v3011_v31 = vmul.f32 %v6785_v12, %v2290_v28  ;;  %v6851_v62 = vpop.f32.mrf.mxu3  ;;  %v9246_v58 = vld [vmem:[#allocation71_spill] sm:$0xff] }
 0x263   : > { %v2291_v55 = vmax.f32 %v2259_v2, 0.0  ;;  %v2977_v35 = vadd.f32 %v2945_v16, %v2910_v5  ;;  %v2774_v27 = vadd.f32 %v2742_v43, %v6770_v40  ;;  %v2700_v15 = vadd.f32 %v2668_v19, %v2543_v0  ;;  %v9247_v5 = vld [vmem:[#allocation29_spill] sm:$0xff] }
 0x264   : > { %v3143_v14 = vadd.f32 %v6830_v33, %v3107_v7  ;;  %v6847_v49 = vadd.f32 %v2669_v20, %v2544_v39  ;;  %v2911_v10 = vadd.f32 %v2879_v60, %v2839_v38  ;;  %v2074_v41 = vadd.f32 %v6651_v30, %v1924_v6  ;;  %4931 = vmatmul.msk.f32.gmra.mxu2 %vm639_vm2, %v6323_v29  ;;  %v9248_v29 = vld [vmem:[#allocation15_spill] sm:$0xff] }
 0x265   : > { %v2808_v47 = vmul.f32 %v6729_v13, %v2290_v28  ;;  %v2355_v57 = vrot.slane %v2291_v55, 7  ;;  %v1616_v37 = vadd.f32 %v9247_v5, %v9246_v58  ;;  %v3042_v40 = vadd.f32 %v3011_v31, %v2977_v35 }
 0x266   : > { %v2138_v2 = vpop.f32.mrf.mxu0  ;;  %v3175_v16 = vmax.f32 %v3143_v14, 0.0  ;;  %v3076_v43 = vmul.f32 %v6811_v51, %v2648_v52  ;;  %v2880_v30 = vmul.f32 %v6745_v34, %v2648_v52  ;;  %v1925_v19 = vadd.f32 %v6660_v54, %v1775_v42 }
 0x267   : > { %v2224_v38 = vadd.f32 %v2138_v2, %v2074_v41  ;;  %v2427_v28 = vsel %vm556_vm1, 0.0, %v2355_v57  ;;  %v2840_v6 = vadd.f32 %v2808_v47, %v2774_v27  ;;  %v2809_v39 = vmul.f32 %v6729_v13, %v2291_v55  ;;  %v6869_v35 = vpop.f32.mrf.mxu2 }
 0x268   : > { %5007 = vmatmul.msk.f32.vlgmr.msra.gmra.mxu1 %vm3215_vm4, %v3175_v16  ;;  %v3108_v0 = vadd.f32 %v3076_v43, %v3042_v40  ;;  %v2743_v7 = vmul.f32 %v6708_v63, %v2427_v28  ;;  %v2946_v14 = vmul.f32 %v6776_v50, %v2427_v28  ;;  %v3012_v52 = vmul.f32 %v6785_v12, %v2291_v55 }
 0x269   : > { %v2260_v20 = vadd.f32 %v6671_v44, %v2224_v38  ;;  %4990 = vmatmul.msk.f32.gmra.mxu0 %vm639_vm2, %v9248_v29  ;;  %v2912_v60 = vadd.f32 %v2880_v30, %v2840_v6  ;;  %4965 = vmatmul.msk.f32.gmra.mxu3 %vm639_vm2, %v6302_v17  ;;  %v2448_v42 = vmul.f32 %v6676_v32, %v2427_v28  ;;  %v2577_v16 = vrot.slane %v2291_v55, 1  ;;  %v9249_v30 = vld [vmem:[#allocation30_spill] sm:$0xff]  ;;  %v6880_v6 = vpop.f32.mrf.mxu1 }
 0x26a   : > { %v3144_v54 = vadd.f32 %v6830_v33, %v3108_v0  ;;  %v2978_v31 = vadd.f32 %v2946_v14, %v2911_v10  ;;  %v2775_v27 = vadd.f32 %v2743_v7, %v2700_v15  ;;  %v2513_v47 = vmul.f32 %v6681_v24, %v2291_v55  ;;  %v6877_v38 = vpop.f32.mrf.mxu3 }
 0x26b   : > { %v2292_v41 = vmax.f32 %v2260_v20, 0.0  ;;  %v2075_v2 = vadd.f32 %v6666_v22, %v1925_v19  ;;  %v1776_v17 = vadd.f32 %v9249_v30, %v1616_v37 }
 0x26c   : > { %v3043_v58 = vadd.f32 %v3012_v52, %v2978_v31  ;;  %v2841_v5 = vadd.f32 %v2809_v39, %v2775_v27  ;;  %v3176_v15 = vmax.f32 %v3144_v54, 0.0  ;;  %v2545_v0 = vadd.f32 %v2513_v47, %v2448_v42  ;;  %4932 = vmatmul.msk.f32.gmra.mxu2 %vm639_vm2, %v6348_v4 }
 0x26d   : > { %v2356_v40 = vrot.slane %v2292_v41, 7  ;;  %v2578_v43 = vrot.slane %v2292_v41, 1  ;;  %v2514_v28 = vmul.f32 %v6681_v24, %v2292_v41  ;;  %v1926_v29 = vadd.f32 %v6699_v11, %v1776_v17 }
 0x26e   : > { %v2141_v10 = vpop.f32.mrf.mxu0 }
 0x26f   : > { %v2225_v7 = vadd.f32 %v2141_v10, %v2075_v2  ;;  %v2579_v22 = vsel %vm1015_vm3, %v2577_v16, %v2578_v43  ;;  %v2357_v55 = vsel %vm556_vm1, %v2355_v57, %v2356_v40  ;;  %v2649_v19 = vsel %vm1015_vm3, %v2578_v43, 0.0  ;;  %v6899_v54 = vpop.f32.mrf.mxu2 }
 0x270   : > { %5008 = vmatmul.msk.f32.gmra.mxu1 %vm3215_vm4, %v3176_v15  ;;  %v2670_v37 = vmul.f32 %v6693_v25, %v2579_v22  ;;  %v2881_v14 = vmul.f32 %v6745_v34, %v2579_v22  ;;  %v3077_v39 = vmul.f32 %v6811_v51, %v2579_v22  ;;  %v2449_v20 = vmul.f32 %v6676_v32, %v2357_v55 }
 0x271   : > { %v2261_v4 = vadd.f32 %v6671_v44, %v2225_v7  ;;  %4991 = vmatmul.msk.f32.gmra.mxu0 %vm639_vm2, %v6230_v61  ;;  %v2671_v57 = vmul.f32 %v6693_v25, %v2649_v19  ;;  %v2744_v52 = vmul.f32 %v6708_v63, %v2357_v55  ;;  %4966 = vmatmul.msk.f32.gmra.mxu3 %vm639_vm2, %v6328_v23 }
 0x272   : > { %v2702_v42 = vadd.f32 %v2670_v37, %v2545_v0  ;;  %v3109_v31 = vadd.f32 %v3077_v39, %v3043_v58  ;;  %v2546_v27 = vadd.f32 %v2514_v28, %v2449_v20  ;;  %v2947_v47 = vmul.f32 %v6776_v50, %v2357_v55  ;;  %v6911_v58 = vpop.f32.mrf.mxu3 }
 0x273   : > { %v2293_v11 = vmax.f32 %v2261_v4, 0.0  ;;  %v3013_v2 = vmul.f32 %v6785_v12, %v2292_v41  ;;  %v2913_v16 = vadd.f32 %v2881_v14, %v2841_v5  ;;  %v2776_v30 = vadd.f32 %v2744_v52, %v6847_v49 }
 0x274   : > { %v3145_v61 = vadd.f32 %v6830_v33, %v3109_v31  ;;  %v6906_v40 = vadd.f32 %v2671_v57, %v2546_v27  ;;  %v2979_v43 = vadd.f32 %v2947_v47, %v2912_v60  ;;  %v2076_v17 = vadd.f32 %v6710_v56, %v1926_v29  ;;  %4933 = vmatmul.msk.f32.gmra.mxu2 %vm639_vm2, %v9218_v53  ;;  %v6918_v56 = vpop.f32.mrf.mxu1 }
 0x275   : > { %v2810_v23 = vmul.f32 %v6729_v13, %v2292_v41  ;;  %v2358_v10 = vrot.slane %v2293_v11, 7  ;;  %v3078_v7 = vmul.f32 %v6811_v51, %v2649_v19  ;;  %v2882_v60 = vmul.f32 %v6745_v34, %v2649_v19 }
 0x276   : > { %v2144_v28 = vpop.f32.mrf.mxu0  ;;  %v3177_v15 = vmax.f32 %v3145_v61, 0.0  ;;  %v3044_v0 = vadd.f32 %v3013_v2, %v2979_v43  ;;  %v1927_v41 = vadd.f32 %v6733_v48, %v6352_v18  ;;  %v2811_v39 = vmul.f32 %v6729_v13, %v2293_v11 }
 0x277   : > { %v2226_v5 = vadd.f32 %v2144_v28, %v2076_v17  ;;  %v2428_v49 = vsel %vm556_vm1, 0.0, %v2358_v10  ;;  %v2842_v22 = vadd.f32 %v2810_v23, %v2776_v30  ;;  %v3014_v19 = vmul.f32 %v6785_v12, %v2293_v11  ;;  %v6930_v4 = vpop.f32.mrf.mxu2 }
 0x278   : > { %5009 = vmatmul.msk.f32.gmra.mxu1 %vm3215_vm4, %v3177_v15  ;;  %v3110_v55 = vadd.f32 %v3078_v7, %v3044_v0  ;;  %v2745_v37 = vmul.f32 %v6708_v63, %v2428_v49  ;;  %v2948_v14 = vmul.f32 %v6776_v50, %v2428_v49  ;;  %v9250_v18 = vmov 0.0  }
 0x279   : > { %v2262_v20 = vadd.f32 %v6671_v44, %v2226_v5  ;;  %4992 = vmatmul.msk.f32.gmra.mxu0 %vm639_vm2, %v6249_v59  ;;  %v2914_v29 = vadd.f32 %v2882_v60, %v2842_v22  ;;  %2062 = vmatmul.f32.gmra.mxu3 %v9250_v18  ;;  %v2450_v57 = vmul.f32 %v6676_v32, %v2428_v49  ;;  %v2580_v43 = vrot.slane %v2293_v11, 1 }
 0x27a   : > { %v3146_v48 = vadd.f32 %v6830_v33, %v3110_v55  ;;  %v2980_v52 = vadd.f32 %v2948_v14, %v2913_v16  ;;  %v2777_v31 = vadd.f32 %v2745_v37, %v2702_v42  ;;  %v2515_v47 = vmul.f32 %v6681_v24, %v2293_v11  ;;  %v6937_v23 = vpop.f32.mrf.mxu3 }
 0x27b   : > { %v2294_v27 = vmax.f32 %v2262_v20, 0.0  ;;  %v2077_v59 = vadd.f32 %v6747_v1, %v1927_v41  ;;  %v1928_v41 = vadd.f32 %v6766_v21, %v6367_v26 }
 0x27c   : > { %v3045_v2 = vadd.f32 %v3014_v19, %v2980_v52  ;;  %v2843_v61 = vadd.f32 %v2811_v39, %v2777_v31  ;;  %v3178_v0 = vmax.f32 %v3146_v48, 0.0  ;;  %v2547_v7 = vadd.f32 %v2515_v47, %v2450_v57  ;;  %4934 = vmatmul.msk.f32.gmra.mxu2 %vm639_vm2, %v9223_v36  ;;  %v6957_v14 = vpop.f32.mrf.mxu1 }
 0x27d   : > { %v2359_v30 = vrot.slane %v2294_v27, 7  ;;  %v2581_v17 = vrot.slane %v2294_v27, 1  ;;  %v2516_v28 = vmul.f32 %v6681_v24, %v2294_v27  ;;  %v3015_v57 = vmul.f32 %v6785_v12, %v2294_v27 }
 0x27e   : > { %v2147_v15 = vpop.f32.mrf.mxu0 }
 0x27f   : > { %v2227_v42 = vadd.f32 %v2147_v15, %v2077_v59  ;;  %v2582_v16 = vsel %vm1015_vm3, %v2580_v43, %v2581_v17  ;;  %v2360_v5 = vsel %vm556_vm1, %v2358_v10, %v2359_v30  ;;  %v2650_v1 = vsel %vm1015_vm3, %v2581_v17, 0.0  ;;  %v6959_v39 = vpop.f32.mrf.mxu2 }
 0x280   : > { %5010 = vmatmul.msk.f32.gmra.mxu1 %vm3215_vm4, %v3178_v0  ;;  %v2672_v11 = vmul.f32 %v6693_v25, %v2582_v16  ;;  %v2883_v60 = vmul.f32 %v6745_v34, %v2582_v16  ;;  %v3079_v49 = vmul.f32 %v6811_v51, %v2582_v16  ;;  %v2451_v22 = vmul.f32 %v6676_v32, %v2360_v5 }
 0x281   : > { %v2263_v55 = vadd.f32 %v6671_v44, %v2227_v42  ;;  %4993 = vmatmul.msk.f32.gmra.mxu0 %vm639_vm2, %v6270_v8  ;;  %v2673_v10 = vmul.f32 %v6693_v25, %v2650_v1  ;;  %v2746_v37 = vmul.f32 %v6708_v63, %v2360_v5  ;;  %2065 = vmatmul.f32.gmra.mxu3 %v9250_v18 }
 0x282   : > { %v2704_v20 = vadd.f32 %v2672_v11, %v2547_v7  ;;  %v3111_v19 = vadd.f32 %v3079_v49, %v3045_v2  ;;  %v2548_v48 = vadd.f32 %v2516_v28, %v2451_v22  ;;  %v2949_v26 = vmul.f32 %v6776_v50, %v2360_v5  ;;  %v6970_v2 = vpop.f32.mrf.mxu3 }
 0x283   : > { %v2295_v21 = vmax.f32 %v2263_v55, 0.0  ;;  %v2915_v52 = vadd.f32 %v2883_v60, %v2843_v61  ;;  %v2778_v59 = vadd.f32 %v2746_v37, %v6906_v40  ;;  %v2078_v43 = vadd.f32 %v6779_v45, %v1928_v41 }
 0x284   : > { %v3147_v8 = vadd.f32 %v6830_v33, %v3111_v19  ;;  %v6965_v31 = vadd.f32 %v2673_v10, %v2548_v48  ;;  %v2981_v47 = vadd.f32 %v2949_v26, %v2914_v29  ;;  %v2812_v18 = vmul.f32 %v6729_v13, %v2294_v27  ;;  %v6989_v10 = vpop.f32.mrf.mxu1  ;;  %v9251_v26 = vld [vmem:[#allocation57_spill] sm:$0xff] }
 0x285   : > { %v2361_v30 = vrot.slane %v2295_v21, 7  ;;  %v3080_v0 = vmul.f32 %v6811_v51, %v2650_v1  ;;  %v2884_v42 = vmul.f32 %v6745_v34, %v2650_v1  ;;  %v1929_v40 = vadd.f32 %v6802_v46, %v6385_v3 }
 0x286   : > { %v2150_v17 = vpop.f32.mrf.mxu0  ;;  %v3179_v28 = vmax.f32 %v3147_v8, 0.0  ;;  %v3046_v15 = vadd.f32 %v3015_v57, %v2981_v47  ;;  %v2844_v29 = vadd.f32 %v2812_v18, %v2778_v59  ;;  %v2813_v5 = vmul.f32 %v6729_v13, %v2295_v21 }
 0x287   : > { %v2429_v61 = vsel %vm556_vm1, 0.0, %v2361_v30  ;;  %v2228_v7 = vadd.f32 %v2150_v17, %v2078_v43  ;;  %v3016_v1 = vmul.f32 %v6785_v12, %v2295_v21  ;;  %v6986_v3 = vpop.f32.mrf.mxu2  ;;  %v2517_v37 = vmul.f32 %v6681_v24, %v2295_v21 }
 0x288   : > { %v2747_v45 = vmul.f32 %v6708_v63, %v2429_v61  ;;  %5011 = vmatmul.msk.f32.gmra.mxu1 %vm3215_vm4, %v3179_v28  ;;  %v3112_v27 = vadd.f32 %v3080_v0, %v3046_v15  ;;  %v2950_v16 = vmul.f32 %v6776_v50, %v2429_v61  ;;  %v2916_v60 = vadd.f32 %v2884_v42, %v2844_v29  ;;  %v9252_v29 = vld [vmem:[#allocation8_spill] sm:$0xff] }
 0x289   : > { %v2264_v11 = vadd.f32 %v6671_v44, %v2228_v7  ;;  %4994 = vmatmul.msk.f32.gmra.mxu0 %vm639_vm2, %v6289_v9  ;;  %v2452_v49 = vmul.f32 %v6676_v32, %v2429_v61  ;;  %v2079_v9 = vadd.f32 %v9251_v26, %v1929_v40  ;;  %v2583_v57 = vrot.slane %v2295_v21, 1  ;;  %v9253_v40 = vld [vmem:[#allocation58_spill] sm:$0xff] }
 0x28a   : > { %v3148_v46 = vadd.f32 %v6830_v33, %v3112_v27  ;;  %v2982_v22 = vadd.f32 %v2950_v16, %v2915_v52  ;;  %v2779_v41 = vadd.f32 %v2747_v45, %v2704_v20  ;;  %v6993_v59 = vpop.f32.mrf.mxu3  ;;  %v1930_v45 = vadd.f32 %v9253_v40, %v9252_v29  ;;  %v9254_v27 = vld [vmem:[#allocation26_spill] sm:$0xff] }
 0x28b   : > { %v2296_v55 = vmax.f32 %v2264_v11, 0.0  ;;  %v2549_v43 = vadd.f32 %v2517_v37, %v2452_v49 }
 0x28c   : > { %v3047_v19 = vadd.f32 %v3016_v1, %v2982_v22  ;;  %v2845_v48 = vadd.f32 %v2813_v5, %v2779_v41  ;;  %v3180_v52 = vmax.f32 %v3148_v46, 0.0 }
 0x28d   : > { %v2362_v8 = vrot.slane %v2296_v55, 7  ;;  %v2584_v47 = vrot.slane %v2296_v55, 1  ;;  %v2518_v18 = vmul.f32 %v6681_v24, %v2296_v55 }
 0x28e   : > { %v2153_v17 = vpop.f32.mrf.mxu0 }
 0x28f   : > { %v2363_v20 = vsel %vm556_vm1, %v2361_v30, %v2362_v8  ;;  %v2229_v28 = vadd.f32 %v2153_v17, %v2079_v9  ;;  %v2585_v15 = vsel %vm1015_vm3, %v2583_v57, %v2584_v47  ;;  %v2651_v0 = vsel %vm1015_vm3, %v2584_v47, 0.0  ;;  %v7010_v11 = vpop.f32.mrf.mxu2 }
 0x290   : > { %v2453_v61 = vmul.f32 %v6676_v32, %v2363_v20  ;;  %5012 = vmatmul.msk.f32.gmra.mxu1 %vm3215_vm4, %v3180_v52  ;;  %v2674_v21 = vmul.f32 %v6693_v25, %v2585_v15  ;;  %v2885_v7 = vmul.f32 %v6745_v34, %v2585_v15  ;;  %v3081_v42 = vmul.f32 %v6811_v51, %v2585_v15 }
 0x291   : > { %v2265_v30 = vadd.f32 %v6671_v44, %v2229_v28  ;;  %4995 = vmatmul.msk.f32.gmra.mxu0 %vm639_vm2, %v9254_v27  ;;  %v2951_v16 = vmul.f32 %v6776_v50, %v2363_v20  ;;  %v2675_v46 = vmul.f32 %v6693_v25, %v2651_v0  ;;  %v3017_v57 = vmul.f32 %v6785_v12, %v2296_v55 }
 0x292   : > { %v2550_v5 = vadd.f32 %v2518_v18, %v2453_v61  ;;  %v2706_v1 = vadd.f32 %v2674_v21, %v2549_v43  ;;  %v3113_v49 = vadd.f32 %v3081_v42, %v3047_v19  ;;  %v2917_v37 = vadd.f32 %v2885_v7, %v2845_v48  ;;  %v7019_v17 = vpop.f32.mrf.mxu3  ;;  %v7021_v43 = vpop.f32.mrf.mxu1  ;;  %v9255_v19 = vld [vmem:[#allocation7_spill] sm:$0xff] }
 0x293   : > { %v2297_v22 = vmax.f32 %v2265_v30, 0.0  ;;  %v2983_v41 = vadd.f32 %v2951_v16, %v2916_v60  ;;  %v2748_v8 = vmul.f32 %v6708_v63, %v2363_v20  ;;  %v2080_v47 = vadd.f32 %v6851_v62, %v1930_v45  ;;  %v9256_v30 = vld [vmem:[#allocation78_spill] sm:$0xff] }
 0x294   : > { %v3149_v26 = vadd.f32 %v6830_v33, %v3113_v49  ;;  %v7014_v9 = vadd.f32 %v2675_v46, %v2550_v5  ;;  %v1931_v52 = vadd.f32 %v6869_v35, %v9255_v19  ;;  %v3082_v15 = vmul.f32 %v6811_v51, %v2651_v0 }
 0x295   : > { %v2364_v18 = vrot.slane %v2297_v22, 7  ;;  %v3048_v28 = vadd.f32 %v3017_v57, %v2983_v41  ;;  %v2814_v61 = vmul.f32 %v6729_v13, %v2296_v55  ;;  %v2780_v62 = vadd.f32 %v2748_v8, %v6965_v31  ;;  %v9258_v57 = vld [vmem:[#allocation40_spill] sm:$0xff] }
 0x296   : > { %v2156_v60 = vpop.f32.mrf.mxu0  ;;  %v3181_v48 = vmax.f32 %v3149_v26, 0.0  ;;  %v2886_v42 = vmul.f32 %v6745_v34, %v2651_v0  ;;  %v2815_v40 = vmul.f32 %v6729_v13, %v2297_v22  ;;  %v3018_v55 = vmul.f32 %v6785_v12, %v2297_v22  ;;  %v9257_v26 = vld [vmem:[#allocation9_spill] sm:$0xff] }
 0x297   : > { %v2430_v21 = vsel %vm556_vm1, 0.0, %v2364_v18  ;;  %v2230_v20 = vadd.f32 %v2156_v60, %v2080_v47  ;;  %v3114_v29 = vadd.f32 %v3082_v15, %v3048_v28  ;;  %v2846_v27 = vadd.f32 %v2814_v61, %v2780_v62  ;;  %v7039_v16 = vpop.f32.mrf.mxu2 }
 0x298   : > { %v2749_v7 = vmul.f32 %v6708_v63, %v2430_v21  ;;  %5013 = vmatmul.msk.f32.gmra.mxu1 %vm3215_vm4, %v3181_v48  ;;  %v2952_v35 = vmul.f32 %v6776_v50, %v2430_v21  ;;  %v2454_v31 = vmul.f32 %v6676_v32, %v2430_v21  ;;  %v1629_v8 = vadd.f32 %v9258_v57, %v9257_v26 }
 0x299   : > { %v2266_v45 = vadd.f32 %v6671_v44, %v2230_v20  ;;  %4996 = vmatmul.msk.f32.gmra.mxu0 %vm639_vm2, %v9256_v30  ;;  %v3150_v5 = vadd.f32 %v6830_v33, %v3114_v29  ;;  %v2918_v41 = vadd.f32 %v2886_v42, %v2846_v27  ;;  %v2519_v47 = vmul.f32 %v6681_v24, %v2297_v22  ;;  %v9259_v30 = vld [vmem:[#allocation49_spill] sm:$0xff] }
 0x29a   : > { %v2984_v0 = vadd.f32 %v2952_v35, %v2917_v37  ;;  %v2781_v49 = vadd.f32 %v2749_v7, %v2706_v1  ;;  %v2081_v48 = vadd.f32 %v6877_v38, %v1931_v52  ;;  %v2586_v28 = vrot.slane %v2297_v22, 1  ;;  %v7046_v21 = vpop.f32.mrf.mxu3 }
 0x29b   : > { %v2298_v46 = vmax.f32 %v2266_v45, 0.0  ;;  %v2551_v20 = vadd.f32 %v2519_v47, %v2454_v31  ;;  %v3182_v62 = vmax.f32 %v3150_v5, 0.0  ;;  %v9261_v5 = vld [vmem:[#allocation13_spill] sm:$0xff] }
 0x29c   : > { %v3049_v19 = vadd.f32 %v3018_v55, %v2984_v0  ;;  %v2847_v60 = vadd.f32 %v2815_v40, %v2781_v49  ;;  %v7052_v40 = vpop.f32.mrf.mxu1  ;;  %v7060_v55 = vadd.f32 %v9259_v30, %v1629_v8  ;;  %v9263_v8 = vld [vmem:[#allocation35_spill] sm:$0xff]  ;;  %v9265_v30 = vld [vmem:[#allocation53_spill] sm:$0xff] }
 0x29d   : > { %v2365_v15 = vrot.slane %v2298_v46, 7  ;;  %v2587_v61 = vrot.slane %v2298_v46, 1  ;;  %v2520_v37 = vmul.f32 %v6681_v24, %v2298_v46 }
 0x29e   : > { %v2159_v1 = vpop.f32.mrf.mxu0 }
 0x29f   : > { %v2366_v7 = vsel %vm556_vm1, %v2364_v18, %v2365_v15  ;;  %v2231_v42 = vadd.f32 %v2159_v1, %v2081_v48  ;;  %v2588_v29 = vsel %vm1015_vm3, %v2586_v28, %v2587_v61  ;;  %v2652_v35 = vsel %vm1015_vm3, %v2587_v61, 0.0  ;;  %v9260_v18 = vld [vmem:[#allocation10_spill] sm:$0xff]  ;;  %v7068_v26 = vpop.f32.mrf.mxu2  ;;  %v9262_v28 = vld [vmem:[#allocation41_spill] sm:$0xff] }
 0x2a0   : > { %v2455_v38 = vmul.f32 %v6676_v32, %v2366_v7  ;;  %5014 = vmatmul.msk.f32.gmra.mxu1 %vm3215_vm4, %v3182_v62  ;;  %v2676_v22 = vmul.f32 %v6693_v25, %v2588_v29  ;;  %v2887_v52 = vmul.f32 %v6745_v34, %v2588_v29  ;;  %v3083_v45 = vmul.f32 %v6811_v51, %v2588_v29 }
 0x2a1   : > { %v1932_v27 = vadd.f32 %v6899_v54, %v9260_v18  ;;  %v2267_v31 = vadd.f32 %v6671_v44, %v2231_v42  ;;  %4997 = vmatmul.msk.f32.gmra.mxu0 %vm639_vm2, %v9261_v5  ;;  %v2953_v0 = vmul.f32 %v6776_v50, %v2366_v7  ;;  %v2677_v48 = vmul.f32 %v6693_v25, %v2652_v35 }
 0x2a2   : > { %v2552_v49 = vadd.f32 %v2520_v37, %v2455_v38  ;;  %v2708_v57 = vadd.f32 %v2676_v22, %v2551_v20  ;;  %v3115_v47 = vadd.f32 %v3083_v45, %v3049_v19  ;;  %v1631_v15 = vadd.f32 %v9263_v8, %v9262_v28  ;;  %v9264_v38 = vld [vmem:[#allocation43_spill] sm:$0xff]  ;;  %v9266_v19 = vld [vmem:[#allocation45_spill] sm:$0xff]  ;;  %v9267_v22 = vld [vmem:[#allocation46_spill] sm:$0xff] }
 0x2a3   : > { %v2299_v61 = vmax.f32 %v2267_v31, 0.0  ;;  %v2985_v1 = vadd.f32 %v2953_v0, %v2918_v41  ;;  %v2919_v54 = vadd.f32 %v2887_v52, %v2847_v60  ;;  %v3019_v29 = vmul.f32 %v6785_v12, %v2298_v46  ;;  %v7083_v31 = vpop.f32.mrf.mxu3  ;;  %v9268_v41 = vld [vmem:[#allocation11_spill] sm:$0xff] }
 0x2a4   : > { %v3151_v62 = vadd.f32 %v6830_v33, %v3115_v47  ;;  %v7074_v42 = vadd.f32 %v2677_v48, %v2552_v49  ;;  %v2750_v37 = vmul.f32 %v6708_v63, %v2366_v7  ;;  %v1632_v20 = vadd.f32 %v9265_v30, %v9264_v38 }
 0x2a5   : > { %v1633_v45 = vadd.f32 %v9267_v22, %v9266_v19  ;;  %v2082_v18 = vadd.f32 %v6911_v58, %v1932_v27  ;;  %v2367_v5 = vrot.slane %v2299_v61, 7  ;;  %v1933_v60 = vadd.f32 %v6930_v4, %v9268_v41 }
 0x2a6   : > { %v2162_v52 = vpop.f32.mrf.mxu0  ;;  %v3183_v0 = vmax.f32 %v3151_v62, 0.0  ;;  %v3050_v49 = vadd.f32 %v3019_v29, %v2985_v1  ;;  %v3084_v47 = vmul.f32 %v6811_v51, %v2652_v35  ;;  %v2816_v7 = vmul.f32 %v6729_v13, %v2298_v46  ;;  %v9269_v29 = vld [vmem:[#allocation16_spill] sm:$0xff] }
 0x2a7   : > { %v2431_v48 = vsel %vm556_vm1, 0.0, %v2367_v5  ;;  %v2232_v28 = vadd.f32 %v2162_v52, %v2082_v18  ;;  %v2782_v8 = vadd.f32 %v2750_v37, %v7014_v9  ;;  %v2888_v27 = vmul.f32 %v6745_v34, %v2652_v35  ;;  %v7100_v9 = vpop.f32.mrf.mxu1  ;;  %v7103_v19 = vpop.f32.mrf.mxu2  ;;  %v4219_v18 = vld [vmem:[%s8936_s9 + $0x38] sm:$0xff] }
 0x2a8   : > { %v2751_v58 = vmul.f32 %v6708_v63, %v2431_v48  ;;  %5015 = vmatmul.msk.f32.gmra.mxu1 %vm3215_vm4, %v3183_v0  ;;  %v3116_v38 = vadd.f32 %v3084_v47, %v3050_v49  ;;  %v2954_v4 = vmul.f32 %v6776_v50, %v2431_v48  ;;  %v2817_v1 = vmul.f32 %v6729_v13, %v2299_v61 }
 0x2a9   : > { %v2268_v62 = vadd.f32 %v6671_v44, %v2232_v28  ;;  %4998 = vmatmul.msk.f32.gmra.mxu0 %vm639_vm2, %v9269_v29  ;;  %v3020_v46 = vmul.f32 %v6785_v12, %v2299_v61  ;;  %v2848_v30 = vadd.f32 %v2816_v7, %v2782_v8  ;;  %v2456_v37 = vmul.f32 %v6676_v32, %v2431_v48  ;;  %v9270_v7 = vld [vmem:[#allocation38_spill] sm:$0xff]  ;;  %v9271_v48 = vld [vmem:[#allocation37_spill] sm:$0xff] }
 0x2aa   : > { %v3152_v35 = vadd.f32 %v6830_v33, %v3116_v38  ;;  %v2986_v22 = vadd.f32 %v2954_v4, %v2919_v54  ;;  %v2783_v41 = vadd.f32 %v2751_v58, %v2708_v57  ;;  %v7110_v52 = vadd.f32 %v6880_v6, %v1631_v15  ;;  %4257 = vmatpush.msrb.mxu2 %v4219_v18 }
 0x2ab   : > { %v7113_v0 = vadd.f32 %v6918_v56, %v1632_v20  ;;  %v2300_v49 = vmax.f32 %v2268_v62, 0.0  ;;  %v2920_v47 = vadd.f32 %v2888_v27, %v2848_v30  ;;  %v1634_v28 = vadd.f32 %v9271_v48, %v9270_v7  ;;  %v7119_v6 = vpop.f32.mrf.mxu3 }
 0x2ac   : > { %v2521_v8 = vmul.f32 %v6681_v24, %v2299_v61  ;;  %v3051_v54 = vadd.f32 %v3020_v46, %v2986_v22  ;;  %v2849_v38 = vadd.f32 %v2817_v1, %v2783_v41  ;;  %v2083_v4 = vadd.f32 %v6937_v23, %v1933_v60  ;;  %v9272_v46 = vld [vmem:[#allocation19_spill] sm:$0xff] }
 0x2ad   : > { %v2589_v29 = vrot.slane %v2299_v61, 1  ;;  %v2368_v57 = vrot.slane %v2300_v49, 7  ;;  %v2590_v58 = vrot.slane %v2300_v49, 1  ;;  %v7122_v56 = vadd.f32 %v6957_v14, %v1633_v45 }
 0x2ae   : > { %v2553_v15 = vadd.f32 %v2521_v8, %v2456_v37  ;;  %v2522_v20 = vmul.f32 %v6681_v24, %v2300_v49  ;;  %v2165_v27 = vpop.f32.mrf.mxu0  ;;  %v3184_v62 = vmax.f32 %v3152_v35, 0.0  ;;  %v7134_v24 = vadd.f32 %v6989_v10, %v1634_v28  ;;  %v9273_v35 = vld [vmem:[#allocation32_spill] sm:$0xff] }
 0x2af   : > { %v2369_v30 = vsel %vm556_vm1, %v2367_v5, %v2368_v57  ;;  %v2233_v18 = vadd.f32 %v2165_v27, %v2083_v4  ;;  %v2591_v1 = vsel %vm1015_vm3, %v2589_v29, %v2590_v58  ;;  %v2653_v23 = vsel %vm1015_vm3, %v2590_v58, 0.0  ;;  %v7142_v41 = vpop.f32.mrf.mxu2  ;;  %v9274_v4 = vld [vmem:[#allocation31_spill] sm:$0xff]  ;;  %v9275_v10 = vld [vmem:[#allocation48_spill] sm:$0xff] }
 0x2b0   : > { %v2457_v61 = vmul.f32 %v6676_v32, %v2369_v30  ;;  %5016 = vmatmul.msk.f32.gmra.mxu1 %vm3215_vm4, %v3184_v62  ;;  %v2678_v60 = vmul.f32 %v6693_v25, %v2591_v1  ;;  %v2889_v14 = vmul.f32 %v6745_v34, %v2591_v1  ;;  %v3085_v45 = vmul.f32 %v6811_v51, %v2591_v1  ;;  %v9277_v62 = vld [vmem:[#allocation55_spill] sm:$0xff] }
 0x2b1   : > { %v1934_v5 = vadd.f32 %v6959_v39, %v9272_v46  ;;  %v2269_v37 = vadd.f32 %v6671_v44, %v2233_v18  ;;  %4999 = vmatmul.msk.f32.gmra.mxu0 %vm639_vm2, %v9273_v35  ;;  %v2955_v32 = vmul.f32 %v6776_v50, %v2369_v30  ;;  %v2679_v8 = vmul.f32 %v6693_v25, %v2653_v23  ;;  %v7149_v44 = vpop.f32.mrf.mxu1  ;;  %v9278_v18 = vld [vmem:[#allocation51_spill] sm:$0xff] }
 0x2b2   : > { %v2554_v22 = vadd.f32 %v2522_v20, %v2457_v61  ;;  %v2710_v7 = vadd.f32 %v2678_v60, %v2553_v15  ;;  %v3117_v48 = vadd.f32 %v3085_v45, %v3051_v54  ;;  %v1635_v28 = vadd.f32 %v9275_v10, %v9274_v4  ;;  %v9276_v54 = vld [vmem:[#allocation33_spill] sm:$0xff]  ;;  %v9279_v1 = vld [vmem:[#allocation39_spill] sm:$0xff] }
 0x2b3   : > { %v7147_v29 = vmax.f32 %v2269_v37, 0.0  ;;  %v2987_v39 = vadd.f32 %v2955_v32, %v2920_v47  ;;  %v2921_v57 = vadd.f32 %v2889_v14, %v2849_v38  ;;  %v3021_v20 = vmul.f32 %v6785_v12, %v2300_v49  ;;  %v7162_v38 = vpop.f32.mrf.mxu3  ;;  %v9280_v14 = vld [vmem:[#allocation22_spill] sm:$0xff] }
 0x2b4   : > { %v3153_v58 = vadd.f32 %v6830_v33, %v3117_v48  ;;  %v7152_v27 = vadd.f32 %v2679_v8, %v2554_v22  ;;  %v2752_v15 = vmul.f32 %v6708_v63, %v2369_v30  ;;  %v1636_v25 = vadd.f32 %v9277_v62, %v9276_v54 }
 0x2b5   : > { %v1637_v61 = vadd.f32 %v9279_v1, %v9278_v18  ;;  %v2084_v60 = vadd.f32 %v6970_v2, %v1934_v5  ;;  %v2370_v47 = vrot.slane %v7147_v29, 7  ;;  %v1935_v45 = vadd.f32 %v6986_v3, %v9280_v14 }
 0x2b6   : > { %v2168_v46 = vpop.f32.mrf.mxu0  ;;  %v3185_v37 = vmax.f32 %v3153_v58, 0.0  ;;  %v3052_v32 = vadd.f32 %v3021_v20, %v2987_v39  ;;  %v3086_v30 = vmul.f32 %v6811_v51, %v2653_v23  ;;  %v2818_v22 = vmul.f32 %v6729_v13, %v2300_v49  ;;  %v7179_v49 = vld [vmem:[%s9215_s2] ss:$0 sm:$0xff] }
 0x2b7   : > { %v2432_v48 = vsel %vm556_vm1, 0.0, %v2370_v47  ;;  %v2234_v8 = vadd.f32 %v2168_v46, %v2084_v60  ;;  %v2784_v4 = vadd.f32 %v2752_v15, %v7074_v42  ;;  %v2890_v5 = vmul.f32 %v6745_v34, %v2653_v23  ;;  %v9281_v42 = vld [vmem:[#allocation34_spill] sm:$0xff]  ;;  %v7189_v23 = vld [vmem:[%s9216_s3] ss:$0 sm:$0xff]  ;;  %v7192_v20 = vpop.f32.mrf.mxu2 }
 0x2b8   : > { %v2753_v2 = vmul.f32 %v6708_v63, %v2432_v48  ;;  %5017 = vmatmul.msk.f32.gmra.mxu1 %vm3215_vm4, %v3185_v37  ;;  %v3118_v10 = vadd.f32 %v3086_v30, %v3052_v32  ;;  %v2956_v3 = vmul.f32 %v6776_v50, %v2432_v48  ;;  %v2819_v39 = vmul.f32 %v6729_v13, %v7147_v29  ;;  %v7207_v37 = vld [vmem:[%s9216_s3 + $0x1] ss:$0 sm:$0xff] }
 0x2b9   : > { %v2270_v58 = vadd.f32 %v7179_v49, %v2234_v8  ;;  %5000 = vmatmul.msk.f32.gmra.mxu0 %vm639_vm2, %v9281_v42  ;;  %v3022_v63 = vmul.f32 %v6785_v12, %v7147_v29  ;;  %v2850_v34 = vadd.f32 %v2818_v22, %v2784_v4  ;;  %v2458_v13 = vmul.f32 %v7189_v23, %v2432_v48  ;;  %v1763_v48 = vpop.f32.mrf.mxu1 }
 0x2ba   : > { %v3154_v15 = vadd.f32 %v6830_v33, %v3118_v10  ;;  %v2988_v54 = vadd.f32 %v2956_v3, %v2921_v57  ;;  %v2785_v62 = vadd.f32 %v2753_v2, %v2710_v7  ;;  %v7196_v18 = vadd.f32 %v7021_v43, %v1635_v28 }
 0x2bb   : > { %v7199_v1 = vadd.f32 %v7052_v40, %v1636_v25  ;;  %v2302_v60 = vmax.f32 %v2270_v58, 0.0  ;;  %v2922_v14 = vadd.f32 %v2890_v5, %v2850_v34  ;;  %v7202_v46 = vadd.f32 %v7100_v9, %v1637_v61  ;;  %v7213_v30 = vpop.f32.mrf.mxu3  ;;  %v9283_v9 = vld [vmem:[#allocation44_spill] sm:$0xff]  ;;  %v9284_v61 = vld [vmem:[#allocation50_spill] sm:$0xff] }
 0x2bc   : > { %v2523_v57 = vmul.f32 %v7207_v37, %v7147_v29  ;;  %v3053_v7 = vadd.f32 %v3022_v63, %v2988_v54  ;;  %v2851_v32 = vadd.f32 %v2819_v39, %v2785_v62  ;;  %v2085_v43 = vadd.f32 %v6993_v59, %v1935_v45  ;;  %v7226_v39 = vld [vmem:[%s9216_s3 + $0x2] ss:$0 sm:$0xff] }
 0x2bd   : > { %9282 = vst [vmem:[#allocation59_spill] sm:$0xff] %v7202_v46  ;;  %v2592_v40 = vrot.slane %v7147_v29, 1  ;;  %v2371_v28 = vrot.slane %v2302_v60, 7  ;;  %v2593_v25 = vrot.slane %v2302_v60, 1  ;;  %v1638_v22 = vadd.f32 %v9284_v61, %v9283_v9  ;;  %v9287_v62 = vld [vmem:[#allocation25_spill] sm:$0xff] }
 0x2be   : > { %v2555_v8 = vadd.f32 %v2523_v57, %v2458_v13  ;;  %v2524_v4 = vmul.f32 %v7207_v37, %v2302_v60  ;;  %v2171_v2 = vpop.f32.mrf.mxu0  ;;  %v3186_v5 = vmax.f32 %v3154_v15, 0.0  ;;  %v9285_v13 = vld [vmem:[#allocation36_spill] sm:$0xff]  ;;  %v1936_v57 = vadd.f32 %v7010_v11, %v9287_v62 }
 0x2bf   : > { %v2372_v10 = vsel %vm556_vm1, %v2370_v47, %v2371_v28  ;;  %v2235_v3 = vadd.f32 %v2171_v2, %v2085_v43  ;;  %v2594_v59 = vsel %vm1015_vm3, %v2592_v40, %v2593_v25  ;;  %v2654_v29 = vsel %vm1015_vm3, %v2593_v25, 0.0  ;;  %v7232_v47 = vld [vmem:[%s9216_s3 + $0x6] ss:$0 sm:$0xff]  ;;  %v9286_v15 = vld [vmem:[#allocation56_spill] sm:$0xff]  ;;  %v1892_v25 = vpop.f32.mrf.mxu2 }
 0x2c0   : > { %v2459_v45 = vmul.f32 %v7189_v23, %v2372_v10  ;;  %5018 = vmatmul.msk.f32.gmra.mxu1 %vm3215_vm4, %v3186_v5  ;;  %v2680_v58 = vmul.f32 %v7226_v39, %v2594_v59  ;;  %v2891_v63 = vmul.f32 %v7232_v47, %v2594_v59  ;;  %v3087_v34 = vmul.f32 %v6811_v51, %v2594_v59 }
 0x2c1   : > { %v1639_v54 = vadd.f32 %v9286_v15, %v9285_v13  ;;  %v2271_v43 = vadd.f32 %v7179_v49, %v2235_v3  ;;  %v2957_v40 = vmul.f32 %v6776_v50, %v2372_v10  ;;  %v2681_v2 = vmul.f32 %v7226_v39, %v2654_v29  ;;  %v7255_v50 = vld [vmem:[%s9216_s3 + $0x4] ss:$0 sm:$0xff] }
 0x2c2   : > { %v2556_v28 = vadd.f32 %v2524_v4, %v2459_v45  ;;  %v2712_v9 = vadd.f32 %v2680_v58, %v2555_v8  ;;  %v3119_v61 = vadd.f32 %v3087_v34, %v3053_v7  ;;  %v7244_v5 = vadd.f32 %v7149_v44, %v1638_v22  ;;  %v9288_v44 = vld [vmem:[#allocation54_spill] sm:$0xff]  ;;  %v9289_v22 = vld [vmem:[#allocation52_spill] sm:$0xff] }
 0x2c3   : > { %v7246_v59 = vmax.f32 %v2271_v43, 0.0  ;;  %v2989_v46 = vadd.f32 %v2957_v40, %v2922_v14  ;;  %v2923_v13 = vadd.f32 %v2891_v63, %v2851_v32  ;;  %v3023_v3 = vmul.f32 %v6785_v12, %v2302_v60  ;;  %v7264_v45 = vpop.f32.mrf.mxu3  ;;  %v9290_v58 = vld [vmem:[#allocation28_spill] sm:$0xff]  ;;  %v1766_v40 = vpop.f32.mrf.mxu1 }
 0x2c4   : > { %v3155_v15 = vadd.f32 %v6830_v33, %v3119_v61  ;;  %v7249_v11 = vadd.f32 %v2681_v2, %v2556_v28  ;;  %v2754_v7 = vmul.f32 %v7255_v50, %v2372_v10  ;;  %v7258_v8 = vadd.f32 %v1763_v48, %v1639_v54  ;;  %v7272_v48 = vld [vmem:[%s9216_s3 + $0x5] ss:$0 sm:$0xff]  ;;  %v9291_v28 = vld [vmem:[#allocation47_spill] sm:$0xff]  ;;  %v7284_v61 = vld [vmem:[%s9216_s3 + $0x8] ss:$0 sm:$0xff] }
 0x2c5   : > { %v1640_v4 = vadd.f32 %v9289_v22, %v9288_v44  ;;  %v2086_v14 = vadd.f32 %v7019_v17, %v1936_v57  ;;  %v2373_v32 = vrot.slane %v7246_v59, 7  ;;  %v1937_v12 = vadd.f32 %v7039_v16, %v9290_v58  ;;  %v4218_v58 = vld [vmem:[%s8936_s9 + $0x30] sm:$0xff] }
 0x2c6   : > { %v2174_v63 = vpop.f32.mrf.mxu0  ;;  %v3187_v34 = vmax.f32 %v3155_v15, 0.0  ;;  %v3054_v62 = vadd.f32 %v3023_v3, %v2989_v46  ;;  %v3088_v43 = vmul.f32 %v6811_v51, %v2654_v29  ;;  %v2820_v10 = vmul.f32 %v7272_v48, %v2302_v60  ;;  %4258 = vmatpush.msrb.mxu2 %v4218_v58 }
 0x2c7   : > { %v2433_v17 = vsel %vm556_vm1, 0.0, %v2373_v32  ;;  %v2236_v54 = vadd.f32 %v2174_v63, %v2086_v14  ;;  %v2786_v57 = vadd.f32 %v2754_v7, %v7152_v27  ;;  %v1938_v16 = vadd.f32 %v7068_v26, %v9291_v28  ;;  %v7292_v26 = vld [vmem:[%s9216_s3 + $0x9] ss:$0 sm:$0xff]  ;;  %v1895_v44 = vpop.f32.mrf.mxu2 }
 0x2c8   : > { %v2755_v46 = vmul.f32 %v7255_v50, %v2433_v17  ;;  %5019 = vmatmul.msk.f32.gmra.mxu1 %vm3215_vm4, %v3187_v34  ;;  %v3120_v51 = vadd.f32 %v3088_v43, %v3054_v62  ;;  %v2958_v60 = vmul.f32 %v7284_v61, %v2433_v17  ;;  %v2892_v27 = vmul.f32 %v7232_v47, %v2654_v29 }
 0x2c9   : > { %v2272_v2 = vadd.f32 %v7179_v49, %v2236_v54  ;;  %v3024_v15 = vmul.f32 %v7292_v26, %v7246_v59  ;;  %v2852_v3 = vadd.f32 %v2820_v10, %v2786_v57  ;;  %v2460_v7 = vmul.f32 %v7189_v23, %v2433_v17  ;;  %v9292_v54 = vld [vmem:[#allocation42_spill] sm:$0xff] }
 0x2ca   : > { %v3156_v22 = vadd.f32 %v6830_v33, %v3120_v51  ;;  %v2990_v14 = vadd.f32 %v2958_v60, %v2923_v13  ;;  %v2787_v29 = vadd.f32 %v2755_v46, %v2712_v9  ;;  %v7301_v63 = vadd.f32 %v1766_v40, %v1640_v4 }
 0x2cb   : > { %v2087_v34 = vadd.f32 %v7046_v21, %v1937_v12  ;;  %v2304_v62 = vmax.f32 %v2272_v2, 0.0  ;;  %v2924_v43 = vadd.f32 %v2892_v27, %v2852_v3  ;;  %v2088_v10 = vadd.f32 %v7083_v31, %v1938_v16  ;;  %v7312_v21 = vpop.f32.mrf.mxu3 }
 0x2cc   : > { %v1939_v17 = vadd.f32 %v7103_v19, %v7060_v55  ;;  %v2525_v33 = vmul.f32 %v7207_v37, %v7246_v59  ;;  %v3055_v13 = vadd.f32 %v3024_v15, %v2990_v14  ;;  %v1940_v57 = vadd.f32 %v7142_v41, %v9292_v54 }
 0x2cd   : > { %v2595_v9 = vrot.slane %v7246_v59, 1  ;;  %v2374_v4 = vrot.slane %v2304_v62, 7  ;;  %v2596_v40 = vrot.slane %v2304_v62, 1  ;;  %v1941_v12 = vadd.f32 %v7192_v20, %v7110_v52 }
 0x2ce   : > { %v2557_v31 = vadd.f32 %v2525_v33, %v2460_v7  ;;  %v1942_v28 = vadd.f32 %v1892_v25, %v7113_v0  ;;  %v2177_v55 = vpop.f32.mrf.mxu0  ;;  %v3188_v19 = vmax.f32 %v3156_v22, 0.0  ;;  %v2526_v2 = vmul.f32 %v7207_v37, %v2304_v62  ;;  %v7329_v0 = vld [vmem:[%s9216_s3 + $0xa] ss:$0 sm:$0xff] }
 0x2cf   : > { %v2375_v16 = vsel %vm556_vm1, %v2373_v32, %v2374_v4  ;;  %v2237_v46 = vadd.f32 %v2177_v55, %v2087_v34  ;;  %v2597_v51 = vsel %vm1015_vm3, %v2595_v9, %v2596_v40  ;;  %v7320_v41 = vsel %vm1015_vm3, %v2596_v40, 0.0  ;;  %v7337_v7 = vpop.f32.mrf.mxu2  ;;  %v7348_v9 = vld [vmem:[%s8934_s7] ss:$0 sm:$0xff]  ;;  %v7353_v4 = vld [vmem:[%s8934_s7 + $0x1] ss:$0 sm:$0xff] }
 0x2d0   : > { %v2461_v60 = vmul.f32 %v7189_v23, %v2375_v16  ;;  %5020 = vmatmul.msk.f32.gmra.mxu1 %vm3215_vm4, %v3188_v19  ;;  %v2682_v52 = vmul.f32 %v7226_v39, %v2597_v51  ;;  %v3089_v20 = vmul.f32 %v7329_v0, %v2597_v51  ;;  %v2821_v25 = vmul.f32 %v7272_v48, %v7246_v59 }
 0x2d1   : > { %v2273_v32 = vadd.f32 %v7179_v49, %v2237_v46  ;;  %v2893_v27 = vmul.f32 %v7232_v47, %v2597_v51  ;;  %v2959_v15 = vmul.f32 %v7284_v61, %v2375_v16  ;;  %v2683_v58 = vmul.f32 %v7226_v39, %v7320_v41 }
 0x2d2   : > { %v2558_v3 = vadd.f32 %v2526_v2, %v2461_v60  ;;  %v2714_v22 = vadd.f32 %v2682_v52, %v2557_v31  ;;  %v3121_v14 = vadd.f32 %v3089_v20, %v3055_v13  ;;  %v2089_v34 = vadd.f32 %v7119_v6, %v1939_v17  ;;  %v7358_v13 = vld [vmem:[%s9243_s4] ss:$0 sm:$0xff] }
 0x2d3   : > { %v7343_v33 = vadd.f32 %v7162_v38, %v1940_v57  ;;  %v2305_v59 = vmax.f32 %v2273_v32, 0.0  ;;  %v2991_v54 = vadd.f32 %v2959_v15, %v2924_v43  ;;  %v3025_v43 = vmul.f32 %v7292_v26, %v2304_v62  ;;  %v7371_v19 = vpop.f32.mrf.mxu3 }
 0x2d4   : > { %v3157_v6 = vadd.f32 %v7358_v13, %v3121_v14  ;;  %v7361_v38 = vadd.f32 %v2683_v58, %v2558_v3  ;;  %v2853_v17 = vadd.f32 %v2821_v25, %v2787_v29  ;;  %v7365_v57 = vadd.f32 %v7213_v30, %v1941_v12 }
 0x2d5   : > { %v7368_v40 = vadd.f32 %v7264_v45, %v1942_v28  ;;  %v1943_v31 = vadd.f32 %v1895_v44, %v7122_v56  ;;  %v2376_v55 = vrot.slane %v2305_v59, 7  ;;  %v3056_v60 = vadd.f32 %v3025_v43, %v2991_v54  ;;  %v7387_v28 = vld [vmem:[%s8934_s7 + $0x2] ss:$0 sm:$0xff] }
 0x2d6   : > { %v2180_v46 = vpop.f32.mrf.mxu0  ;;  %v3189_v51 = vmax.f32 %v3157_v6, 0.0  ;;  %v3090_v2 = vmul.f32 %v7329_v0, %v7320_v41  ;;  %v2925_v52 = vadd.f32 %v2893_v27, %v2853_v17  ;;  %v3515_v30 = vmul.f32 %v7348_v9, %v9218_v53 }
 0x2d7   : > { %v2434_v29 = vsel %vm556_vm1, 0.0, %v2376_v55  ;;  %v2238_v20 = vadd.f32 %v2180_v46, %v2088_v10  ;;  %v7379_v45 = vmul.f32 0.0, %v7353_v4  ;;  %v2822_v56 = vmul.f32 %v7272_v48, %v2304_v62  ;;  %v1901_v3 = vpop.f32.mrf.mxu2 }
 0x2d8   : > { %v2757_v44 = vmul.f32 %v7255_v50, %v2434_v29  ;;  %5021 = vmatmul.msk.f32.gmra.mxu1 %vm3215_vm4, %v3189_v51  ;;  %v3122_v12 = vadd.f32 %v3090_v2, %v3056_v60  ;;  %v2960_v10 = vmul.f32 %v7284_v61, %v2434_v29  ;;  %v2823_v25 = vmul.f32 %v7272_v48, %v2305_v59 }
 0x2d9   : > { %v2274_v32 = vadd.f32 %v7179_v49, %v2238_v20  ;;  %v3026_v27 = vmul.f32 %v7292_v26, %v2305_v59  ;;  %v2756_v62 = vmul.f32 %v7255_v50, %v2375_v16  ;;  %v2462_v15 = vmul.f32 %v7189_v23, %v2434_v29 }
 0x2da   : > { %v3158_v14 = vadd.f32 %v7358_v13, %v3122_v12  ;;  %v2992_v58 = vadd.f32 %v2960_v10, %v2925_v52  ;;  %v2789_v54 = vadd.f32 %v2757_v44, %v2714_v22  ;;  %v7397_v6 = vadd.f32 %v7312_v21, %v1943_v31 }
 0x2db   : > { %v2306_v43 = vmax.f32 %v2274_v32, 0.0  ;;  %v3564_v17 = vadd.f32 %v7379_v45, %v3515_v30  ;;  %v2788_v46 = vadd.f32 %v2756_v62, %v7249_v11  ;;  %v2527_v51 = vmul.f32 %v7207_v37, %v2305_v59  ;;  %v2051_v52 = vpop.f32.mrf.mxu3 }
 0x2dc   : > { %v3624_v16 = vmul.f32 %v7387_v28, %v9273_v35  ;;  %v3057_v60 = vadd.f32 %v3026_v27, %v2992_v58  ;;  %v2855_v2 = vadd.f32 %v2823_v25, %v2789_v54  ;;  %v2598_v29 = vrot.slane %v2305_v59, 1 }
 0x2dd   : > { %v2377_v20 = vrot.slane %v2306_v43, 7  ;;  %v2599_v12 = vrot.slane %v2306_v43, 1  ;;  %v2894_v21 = vmul.f32 %v7232_v47, %v7320_v41  ;;  %v2559_v22 = vadd.f32 %v2527_v51, %v2462_v15 }
 0x2de   : > { %v2528_v31 = vmul.f32 %v7207_v37, %v2306_v43  ;;  %v2183_v30 = vpop.f32.mrf.mxu0  ;;  %v3190_v44 = vmax.f32 %v3158_v14, 0.0  ;;  %v2854_v11 = vadd.f32 %v2822_v56, %v2788_v46  ;;  %v7422_v46 = vld [vmem:[%s8933_s6] ss:$0 sm:$0xff] }
 0x2df   : > { %v2378_v10 = vsel %vm556_vm1, %v2376_v55, %v2377_v20  ;;  %v2239_v32 = vadd.f32 %v2183_v30, %v2089_v34  ;;  %v2600_v62 = vsel %vm1015_vm3, %v2598_v29, %v2599_v12  ;;  %v2656_v25 = vsel %vm1015_vm3, %v2599_v12, 0.0  ;;  %v1904_v54 = vpop.f32.mrf.mxu2 }
 0x2e0   : > { %v2463_v59 = vmul.f32 %v7189_v23, %v2378_v10  ;;  %5022 = vmatmul.msk.f32.gmra.mxu1 %vm3215_vm4, %v3190_v44  ;;  %v2684_v27 = vmul.f32 %v7226_v39, %v2600_v62  ;;  %v2895_v41 = vmul.f32 %v7232_v47, %v2600_v62  ;;  %v3091_v15 = vmul.f32 %v7329_v0, %v2600_v62 }
 0x2e1   : > { %v2275_v14 = vadd.f32 %v7179_v49, %v2239_v32  ;;  %v3516_v55 = vmul.f32 %v7348_v9, %v9223_v36  ;;  %v2685_v34 = vmul.f32 %v7226_v39, %v2656_v25  ;;  %v2926_v56 = vadd.f32 %v2894_v21, %v2854_v11 }
 0x2e2   : > { %v2560_v58 = vadd.f32 %v2528_v31, %v2463_v59  ;;  %v2716_v51 = vadd.f32 %v2684_v27, %v2559_v22  ;;  %v3123_v29 = vadd.f32 %v3091_v15, %v3057_v60  ;;  %v2961_v20 = vmul.f32 %v7284_v61, %v2378_v10 }
 0x2e3   : > { %v1944_v12 = vadd.f32 %v7337_v7, %v7134_v24  ;;  %v7427_v30 = vmax.f32 %v2275_v14, 0.0  ;;  %v3027_v44 = vmul.f32 %v7292_v26, %v2306_v43  ;;  %v2927_v32 = vadd.f32 %v2895_v41, %v2855_v2 }
 0x2e4   : > { %v3159_v21 = vadd.f32 %v7358_v13, %v3123_v29  ;;  %v7431_v31 = vadd.f32 %v2685_v34, %v2560_v58  ;;  %v2993_v11 = vadd.f32 %v2961_v20, %v2926_v56  ;;  %v2758_v62 = vmul.f32 %v7255_v50, %v2378_v10  ;;  %v7436_v59 = vpop.f32.mrf.mxu3 }
 0x2e5   : > { %v1945_v22 = vadd.f32 %v1901_v3, %v7196_v18  ;;  %v2379_v60 = vrot.slane %v7427_v30, 7  ;;  %v3329_v27 = vpop.f32.mrf.mxu1  ;;  %v3565_v24 = vadd.f32 %v7379_v45, %v3516_v55  ;;  %v3625_v7 = vmul.f32 %v7387_v28, %v9281_v42 }
 0x2e6   : > { %v3330_v2 = vadd.f32 %v7422_v46, %v3329_v27  ;;  %v2186_v41 = vpop.f32.mrf.mxu0  ;;  %v3191_v15 = vmax.f32 %v3159_v21, 0.0  ;;  %v3058_v14 = vadd.f32 %v3027_v44, %v2993_v11  ;;  %v3092_v34 = vmul.f32 %v7329_v0, %v2656_v25 }
 0x2e7   : > { %v2824_v10 = vmul.f32 %v7272_v48, %v2306_v43  ;;  %v2435_v18 = vsel %vm556_vm1, 0.0, %v2379_v60  ;;  %v2240_v3 = vadd.f32 %v2186_v41, %v7343_v33  ;;  %v2790_v56 = vadd.f32 %v2758_v62, %v7361_v38  ;;  %v7462_v38 = vld [vmem:[%s8934_s7 + $0x4] ss:$0 sm:$0xff] }
 0x2e8   : > { %v2759_v45 = vmul.f32 %v7255_v50, %v2435_v18  ;;  %v7448_v55 = vmax.f32 %v3330_v2, 0.0  ;;  %v3640_v58 = vadd.f32 %v3624_v16, %v3564_v17  ;;  %5023 = vmatmul.msk.f32.gmra.mxu1 %vm3215_vm4, %v3191_v15  ;;  %v3124_v29 = vadd.f32 %v3092_v34, %v3058_v14  ;;  %v1907_v17 = vpop.f32.mrf.mxu2 }
 0x2e9   : > { %v7452_v20 = vadd.f32 %v7371_v19, %v1944_v12  ;;  %v2276_v44 = vadd.f32 %v7179_v49, %v2240_v3  ;;  %v2962_v43 = vmul.f32 %v7284_v61, %v2435_v18  ;;  %v2856_v21 = vadd.f32 %v2824_v10, %v2790_v56 }
 0x2ea   : > { %v7456_v11 = vadd.f32 %v2051_v52, %v1945_v22  ;;  %v3672_v33 = vrot.slane %v7448_v55, 7  ;;  %v7464_v16 = vadd.f32 %v3625_v7, %v3565_v24  ;;  %v2896_v19 = vmul.f32 %v7232_v47, %v2656_v25 }
 0x2eb   : > { %v2464_v12 = vmul.f32 %v7189_v23, %v2435_v18  ;;  %v7468_v62 = vmax.f32 %v2276_v44, 0.0  ;;  %v3160_v27 = vadd.f32 %v7358_v13, %v3124_v29  ;;  %v2994_v52 = vadd.f32 %v2962_v43, %v2927_v32  ;;  %v7494_v44 = vld [vmem:[%s8934_s7 + $0x5] ss:$0 sm:$0xff] }
 0x2ec   : > { %v1946_v22 = vadd.f32 %v1904_v54, %v7199_v1  ;;  %v3712_v2 = vsel %vm556_vm1, 0.0, %v3672_v33  ;;  %v7473_v41 = vadd.f32 %v2896_v19, %v2856_v21  ;;  %v7475_v15 = vadd.f32 %v2759_v45, %v2716_v51  ;;  %v2057_v34 = vpop.f32.mrf.mxu3 }
 0x2ed   : > { %v2529_v24 = vmul.f32 %v7207_v37, %v7427_v30  ;;  %v2601_v25 = vrot.slane %v7427_v30, 1  ;;  %v2380_v7 = vrot.slane %v7468_v62, 7  ;;  %v2602_v14 = vrot.slane %v7468_v62, 1  ;;  %v3332_v10 = vpop.f32.mrf.mxu1 }
 0x2ee   : > { %v3723_v32 = vmul.f32 %v7462_v38, %v3712_v2  ;;  %v3333_v1 = vadd.f32 %v7422_v46, %v3332_v10  ;;  %v2189_v54 = vpop.f32.mrf.mxu0  ;;  %v3192_v18 = vmax.f32 %v3160_v27, 0.0  ;;  %v3028_v51 = vmul.f32 %v7292_v26, %v7427_v30 }
 0x2ef   : > { %v2561_v3 = vadd.f32 %v2529_v24, %v2464_v12  ;;  %v7487_v56 = vsel %vm556_vm1, %v2379_v60, %v2380_v7  ;;  %v2241_v45 = vadd.f32 %v2189_v54, %v7365_v57  ;;  %v2603_v29 = vsel %vm1015_vm3, %v2601_v25, %v2602_v14  ;;  %v4217_v57 = vld [vmem:[%s8936_s9 + $0x28] sm:$0xff]  ;;  %v9293_v12 = vld [vmem:[#allocation59_spill] sm:$0xff] }
 0x2f0   : > { %v2465_v43 = vmul.f32 %v7189_v23, %v7487_v56  ;;  %v2530_v21 = vmul.f32 %v7207_v37, %v7468_v62  ;;  %v3426_v19 = vmax.f32 %v3333_v1, 0.0  ;;  %5024 = vmatmul.msk.f32.gmra.mxu1 %vm3215_vm4, %v3192_v18  ;;  %v2686_v60 = vmul.f32 %v7226_v39, %v2603_v29  ;;  %4259 = vmatpush.msrb.mxu2 %v4217_v57  ;;  %v1910_v42 = vpop.f32.mrf.mxu2 }
 0x2f1   : > { %v1947_v27 = vadd.f32 %v1907_v17, %v9293_v12  ;;  %v2277_v2 = vadd.f32 %v7179_v49, %v2241_v45  ;;  %v3059_v24 = vadd.f32 %v3028_v51, %v2994_v52  ;;  %v3093_v25 = vmul.f32 %v7329_v0, %v2603_v29  ;;  %v7526_v51 = vld [vmem:[%s8934_s7 + $0x6] ss:$0 sm:$0xff] }
 0x2f2   : > { %v3739_v7 = vadd.f32 %v3723_v32, %v3640_v58  ;;  %v2562_v10 = vadd.f32 %v2530_v21, %v2465_v43  ;;  %v3673_v54 = vrot.slane %v3426_v19, 7  ;;  %v3790_v1 = vrot.slane %v3426_v19, 1 }
 0x2f3   : > { %v3789_v18 = vrot.slane %v7448_v55, 1  ;;  %v7509_v36 = vmax.f32 %v2277_v2, 0.0  ;;  %v7511_v35 = vadd.f32 %v2686_v60, %v2561_v3  ;;  %v3125_v53 = vadd.f32 %v3093_v25, %v3059_v24 }
 0x2f4   : > { %v7515_v17 = vmul.f32 %v7272_v48, %v7427_v30  ;;  %v7518_v52 = vadd.f32 %v7436_v59, %v1946_v22  ;;  %v3757_v58 = vmul.f32 %v7494_v44, %v7448_v55  ;;  %v3674_v32 = vsel %vm556_vm1, %v3672_v33, %v3673_v54  ;;  %v2060_v21 = vpop.f32.mrf.mxu3 }
 0x2f5   : > { %9294 = vst [vmem:[#allocation70_spill] sm:$0xff] %v7511_v35  ;;  %v7530_v3 = vmul.f32 %v7272_v48, %v7468_v62  ;;  %v3724_v30 = vmul.f32 %v7462_v38, %v3674_v32  ;;  %v3791_v45 = vsel %vm1015_vm3, %v3789_v18, %v3790_v1  ;;  %v2382_v59 = vrot.slane %v7509_v36, 7  ;;  %v3335_v22 = vpop.f32.mrf.mxu1 }
 0x2f6   : > { %9295 = vst [vmem:[#allocation61_spill] sm:$0xff] %v7518_v52  ;;  %v3773_v43 = vadd.f32 %v3757_v58, %v3739_v7  ;;  %v7535_v55 = vadd.f32 %v2057_v34, %v1947_v27  ;;  %v3829_v33 = vsel %vm1015_vm3, %v3790_v1, 0.0  ;;  %v2192_v60 = vpop.f32.mrf.mxu0  ;;  %v7539_v57 = vmul.f32 %v7232_v47, %v2603_v29 }
 0x2f7   : > { %9296 = vst [vmem:[#allocation60_spill] sm:$0xff] %v7530_v3  ;;  %v3758_v12 = vmul.f32 %v7494_v44, %v3426_v19  ;;  %v7543_v2 = vsel %vm556_vm1, 0.0, %v2382_v59  ;;  %v3336_v24 = vadd.f32 %v7422_v46, %v3335_v22  ;;  %v2657_v25 = vsel %vm1015_vm3, %v2602_v14, 0.0  ;;  %v7558_v14 = vld [vmem:[%s8934_s7 + $0x8] ss:$0 sm:$0xff] }
 0x2f8   : > { %9297 = vst [vmem:[#allocation72_spill] sm:$0xff] %v7535_v55  ;;  %v3839_v7 = vmul.f32 %v7526_v51, %v3791_v45  ;;  %v1948_v34 = vadd.f32 %v1910_v42, %v7244_v5  ;;  %v2242_v27 = vadd.f32 %v2192_v60, %v7368_v40  ;;  %v3161_v54 = vadd.f32 %v7358_v13, %v3125_v53  ;;  %v1913_v45 = vpop.f32.mrf.mxu2 }
 0x2f9   : > { %v3740_v29 = vadd.f32 %v3724_v30, %v7464_v16  ;;  %v3840_v1 = vmul.f32 %v7526_v51, %v3829_v33  ;;  %v2466_v19 = vmul.f32 %v7189_v23, %v7543_v2  ;;  %v3427_v18 = vmax.f32 %v3336_v24, 0.0 }
 0x2fa   : > { %v2278_v58 = vadd.f32 %v7179_v49, %v2242_v27  ;;  %v3193_v42 = vmax.f32 %v3161_v54, 0.0  ;;  %v2687_v5 = vmul.f32 %v7226_v39, %v2657_v25  ;;  %v2963_v53 = vmul.f32 %v7284_v61, %v7487_v56 }
 0x2fb   : > { %v2531_v40 = vmul.f32 %v7207_v37, %v7509_v36  ;;  %v2604_v16 = vrot.slane %v7509_v36, 1  ;;  %v7569_v32 = vmul.f32 %v7272_v48, %v7509_v36  ;;  %v3471_v30 = vrot.slane %v3427_v18, 7 }
 0x2fc   : > { %v3855_v22 = vadd.f32 %v3839_v7, %v3773_v43  ;;  %v7571_v33 = vadd.f32 %v2060_v21, %v1948_v34  ;;  %v7573_v60 = vmax.f32 %v2278_v58, 0.0  ;;  %5025 = vmatmul.msk.f32.gmra.mxu1 %vm3215_vm4, %v3193_v42  ;;  %v7576_v24 = vadd.f32 %v2687_v5, %v2562_v10  ;;  %v4216_v43 = vld [vmem:[%s8936_s9 + $0x20] sm:$0xff] }
 0x2fd   : > { %9298 = vst [vmem:[#allocation73_spill] sm:$0xff] %v7569_v32  ;;  %v3774_v27 = vadd.f32 %v3758_v12, %v3740_v29  ;;  %v7580_v54 = vmul.f32 %v7255_v50, %v7543_v2  ;;  %v3506_v55 = vsel %vm556_vm1, 0.0, %v3471_v30  ;;  %v3338_v35 = vpop.f32.mrf.mxu1  ;;  %v2995_v32 = vadd.f32 %v2963_v53, %v7473_v41  ;;  %4260 = vmatpush.msrb.mxu2 %v4216_v43 }
 0x2fe   : > { %9299 = vst [vmem:[#allocation62_spill] sm:$0xff] %v7571_v33  ;;  %v2563_v21 = vadd.f32 %v2531_v40, %v2466_v19  ;;  %v3882_v7 = vmul.f32 %v7558_v14, %v3506_v55  ;;  %v2383_v10 = vrot.slane %v7573_v60, 7  ;;  %v2195_v34 = vpop.f32.mrf.mxu0  ;;  %v7590_v12 = vmul.f32 %v7232_v47, %v2657_v25  ;;  %v7599_v19 = vld [vmem:[%s8934_s7 + $0x9] ss:$0 sm:$0xff]  ;;  %v2063_v40 = vpop.f32.mrf.mxu3 }
 0x2ff   : > { %9300 = vst [vmem:[#allocation74_spill] sm:$0xff] %v7576_v24  ;;  %v3580_v29 = vrot.slane %v3427_v18, 1  ;;  %v3339_v42 = vadd.f32 %v7422_v46, %v3338_v35  ;;  %v3029_v41 = vmul.f32 %v7292_v26, %v7468_v62  ;;  %v2532_v53 = vmul.f32 %v7207_v37, %v7573_v60 }
 0x300   : > { %9301 = vst [vmem:[#allocation75_spill] sm:$0xff] %v7580_v54  ;;  %v7602_v5 = vsel %vm556_vm1, %v2382_v59, %v2383_v10  ;;  %v2243_v43 = vadd.f32 %v2195_v34, %v7397_v6  ;;  %v3094_v58 = vmul.f32 %v7329_v0, %v2657_v25  ;;  %v9304_v24 = vrot.slane %v7573_v60, 1  ;;  %v7618_v10 = vld [vmem:[%s8934_s7 + $0xa] ss:$0 sm:$0xff]  ;;  %v1916_v52 = vpop.f32.mrf.mxu2 }
 0x301   : > { %9302 = vst [vmem:[#allocation21_spill] sm:$0xff] %v7590_v12  ;;  %v2467_v35 = vmul.f32 %v7189_v23, %v7602_v5  ;;  %v3428_v62 = vmax.f32 %v3339_v42, 0.0  ;;  %v3060_v33 = vadd.f32 %v3029_v41, %v2995_v32  ;;  %v3898_v59 = vadd.f32 %v3882_v7, %v3855_v22 }
 0x302   : > { %9303 = vst [vmem:[#allocation63_spill] sm:$0xff] %v7602_v5  ;;  %v7613_v54 = vsel %vm1015_vm3, %v2604_v16, %v9304_v24  ;;  %v2279_v6 = vadd.f32 %v7179_v49, %v2243_v43  ;;  %v2857_v34 = vadd.f32 %v7515_v17, %v7475_v15  ;;  %v1949_v42 = vadd.f32 %v1913_v45, %v7258_v8 }
 0x303   : > { %9305 = vst [vmem:[#allocation14_spill] sm:$0xff] %v7618_v10  ;;  %v2688_v25 = vmul.f32 %v7226_v39, %v7613_v54  ;;  %v7625_v32 = vadd.f32 %v2532_v53, %v2467_v35  ;;  %v3472_v16 = vrot.slane %v3428_v62, 7  ;;  %v3581_v24 = vrot.slane %v3428_v62, 1 }
 0x304   : > { %v3856_v22 = vadd.f32 %v3840_v1, %v3774_v27  ;;  %v3916_v7 = vmul.f32 %v7599_v19, %v3427_v18  ;;  %v7629_v41 = vmax.f32 %v2279_v6, 0.0  ;;  %v3126_v12 = vadd.f32 %v3094_v58, %v3060_v33 }
 0x305   : > { %v3550_v43 = vmul.f32 %v7353_v4, %v3427_v18  ;;  %v3473_v5 = vsel %vm556_vm1, %v3471_v30, %v3472_v16  ;;  %v3582_v3 = vsel %vm1015_vm3, %v3580_v29, %v3581_v24  ;;  %v3341_v15 = vpop.f32.mrf.mxu1  ;;  %v7634_v17 = vadd.f32 %v2688_v25, %v2563_v21  ;;  %v7649_v21 = vld [vmem:[%s8935_s8] ss:$0 sm:$0xff] }
 0x306   : > { %v3517_v8 = vmul.f32 %v7348_v9, %v3506_v55  ;;  %v3932_v45 = vadd.f32 %v3916_v7, %v3898_v59  ;;  %v3883_v1 = vmul.f32 %v7558_v14, %v3473_v5  ;;  %v3956_v27 = vmul.f32 %v7618_v10, %v3582_v3  ;;  %v2198_v53 = vpop.f32.mrf.mxu0  ;;  %9307 = vst [vmem:[#allocation17_spill] sm:$0xff] %v7649_v21 }
 0x307   : > { %v7641_v33 = vmul.f32 %v7272_v48, %v7573_v60  ;;  %v7643_v18 = vadd.f32 %v2063_v40, %v1949_v42  ;;  %v3615_v30 = vsel %vm1015_vm3, %v3581_v24, 0.0  ;;  %v2385_v55 = vrot.slane %v7629_v41, 7 }
 0x308   : > { %v3899_v29 = vadd.f32 %v3883_v1, %v3856_v22  ;;  %v3917_v58 = vmul.f32 %v7599_v19, %v3428_v62  ;;  %v3972_v35 = vadd.f32 %v3956_v27, %v3932_v45  ;;  %v1950_v59 = vadd.f32 %v1916_v52, %v7301_v63  ;;  %v2066_v1 = vpop.f32.mrf.mxu3 }
 0x309   : > { %9306 = vst [vmem:[#allocation64_spill] sm:$0xff] %v7643_v18  ;;  %v3518_v6 = vmul.f32 %v7348_v9, %v3473_v5  ;;  %v7656_v40 = vsel %vm556_vm1, 0.0, %v2385_v55  ;;  %v3162_v25 = vadd.f32 %v7358_v13, %v3126_v12  ;;  %v3342_v42 = vadd.f32 %v7422_v46, %v3341_v15  ;;  %v4215_v15 = vld [vmem:[%s8936_s9 + $0x18] sm:$0xff] }
 0x30a   : > { %v3566_v16 = vadd.f32 %v3550_v43, %v3517_v8  ;;  %v3551_v24 = vmul.f32 %v7353_v4, %v3428_v62  ;;  %v3627_v7 = vmul.f32 %v7387_v28, %v3615_v30  ;;  %v3933_v22 = vadd.f32 %v3917_v58, %v3899_v29  ;;  %v4214_v8 = vld [vmem:[%s8936_s9 + $0x10] sm:$0xff]  ;;  %4261 = vmatpush.msrb.mxu2 %v4215_v15  ;;  %v4213_v62 = vld [vmem:[%s8936_s9 + $0x8] sm:$0xff] }
 0x30b   : > { %v3992_v45 = vadd.f32 %v7649_v21, %v3972_v35  ;;  %v3194_v27 = vmax.f32 %v3162_v25, 0.0  ;;  %v3429_v63 = vmax.f32 %v3342_v42, 0.0  ;;  %v2244_v52 = vadd.f32 %v2198_v53, %v7452_v20 }
 0x30c   : > { %v3957_v5 = vmul.f32 %v7618_v10, %v3615_v30  ;;  %v2468_v12 = vmul.f32 %v7189_v23, %v7656_v40  ;;  %v2533_v43 = vmul.f32 %v7207_v37, %v7629_v41  ;;  %v3567_v29 = vadd.f32 %v3551_v24, %v3518_v6  ;;  %4262 = vmatpush.msrb.mxu2 %v4214_v8 }
 0x30d   : > { %v7678_v20 = vmul.f32 %v7272_v48, %v7629_v41  ;;  %5026 = vmatmul.msk.f32.gmra.mxu1 %vm3215_vm4, %v3194_v27  ;;  %v7681_v53 = vadd.f32 %v2066_v1, %v1950_v59  ;;  %v3675_v30 = vrot.slane %v3429_v63, 7  ;;  %v3344_v58 = vpop.f32.mrf.mxu1  ;;  %v3626_v35 = vmul.f32 %v7387_v28, %v3582_v3 }
 0x30e   : > { %v2280_v25 = vadd.f32 %v7179_v49, %v2244_v52  ;;  %v2929_v42 = vadd.f32 %v7539_v57, %v2857_v34  ;;  %v2964_v6 = vmul.f32 %v7284_v61, %v7543_v2  ;;  %v2201_v24 = vpop.f32.mrf.mxu0  ;;  %v3973_v27 = vadd.f32 %v3957_v5, %v3933_v22  ;;  %v4212_v22 = vld [vmem:[%s8936_s9] sm:$0xff]  ;;  %4263 = vmatpush.msrb.mxu2 %v4213_v62 }
 0x30f   : > { %9308 = vst [vmem:[#allocation65_spill] sm:$0xff] %v7678_v20  ;;  %v7691_v59 = vmax.f32 %v3992_v45, 0.0  ;;  %v7695_v1 = vmul.f32 %v7255_v50, %v7656_v40  ;;  %v3345_v3 = vadd.f32 %v7422_v46, %v3344_v58  ;;  %v7698_v52 = vadd.f32 %v2533_v43, %v2468_v12 }
 0x310   : > { %9309 = vst [vmem:[#allocation18_spill] sm:$0xff] %v7681_v53  ;;  %v3713_v57 = vsel %vm556_vm1, 0.0, %v3675_v30  ;;  %v7701_v2 = vmax.f32 %v2280_v25, 0.0  ;;  %v2996_v34 = vadd.f32 %v2964_v6, %v2929_v42  ;;  %v3030_v45 = vmul.f32 %v7292_v26, %v7509_v36  ;;  %4264 = vmatpush.msrb.mxu2 %v4212_v22 }
 0x311   : > { %v3095_v5 = vmul.f32 %v7329_v0, %v7613_v54  ;;  %v3430_v15 = vmax.f32 %v3345_v3, 0.0  ;;  %v2245_v8 = vadd.f32 %v2201_v24, %v7456_v11  ;;  %v3642_v12 = vadd.f32 %v3626_v35, %v3566_v16 }
 0x312   : > { %v3792_v43 = vrot.slane %v3429_v63, 1  ;;  %v2386_v58 = vrot.slane %v7701_v2, 7  ;;  %v7714_v25 = vmul.f32 %v7232_v47, %v7613_v54  ;;  %v3993_v42 = vadd.f32 %v7649_v21, %v3973_v27 }
 0x313   : > { %v3725_v6 = vmul.f32 %v7462_v38, %v3713_v57  ;;  %v3061_v36 = vadd.f32 %v3030_v45, %v2996_v34  ;;  %v3676_v53 = vrot.slane %v3430_v15, 7  ;;  %v3793_v11 = vrot.slane %v3430_v15, 1 }
 0x314   : > { %v7719_v3 = vsel %vm556_vm1, %v2385_v55, %v2386_v58  ;;  %v2281_v16 = vadd.f32 %v7179_v49, %v2245_v8  ;;  %v9310_v62 = vrot.slane %v7573_v60, 1  ;;  %v2534_v24 = vmul.f32 %v7207_v37, %v7701_v2 }
 0x315   : > { %v2469_v54 = vmul.f32 %v7189_v23, %v7719_v3  ;;  %v3127_v27 = vadd.f32 %v3095_v5, %v3061_v36  ;;  %v3677_v57 = vsel %vm556_vm1, %v3675_v30, %v3676_v53  ;;  %v3347_v34 = vpop.f32.mrf.mxu1  ;;  %v3643_v22 = vadd.f32 %v3627_v7, %v3567_v29 }
 0x316   : > { %v2658_v35 = vsel %vm1015_vm3, %v9310_v62, 0.0  ;;  %v3726_v55 = vmul.f32 %v7462_v38, %v3677_v57  ;;  %v3794_v45 = vsel %vm1015_vm3, %v3792_v43, %v3793_v11  ;;  %v7732_v8 = vmax.f32 %v2281_v16, 0.0  ;;  %v2204_v16 = vpop.f32.mrf.mxu0 }
 0x317   : > { %v3741_v58 = vadd.f32 %v3725_v6, %v3642_v12  ;;  %v7734_v18 = vadd.f32 %v2534_v24, %v2469_v54  ;;  %v3163_v62 = vadd.f32 %v7358_v13, %v3127_v27  ;;  %v2689_v21 = vmul.f32 %v7226_v39, %v2658_v35 }
 0x318   : > { %v3759_v20 = vmul.f32 %v7494_v44, %v3429_v63  ;;  %v3742_v5 = vadd.f32 %v3726_v55, %v3643_v22  ;;  %v3830_v53 = vsel %vm1015_vm3, %v3793_v11, 0.0  ;;  %v2388_v7 = vrot.slane %v7732_v8, 7  ;;  %v9312_v22 = vld [vmem:[#allocation61_spill] sm:$0xff] }
 0x319   : > { %v7741_v29 = vmax.f32 %v3993_v42, 0.0  ;;  %v3195_v30 = vmax.f32 %v3163_v62, 0.0  ;;  %v3841_v43 = vmul.f32 %v7526_v51, %v3794_v45  ;;  %v7745_v12 = vadd.f32 %v2689_v21, %v7625_v32  ;;  %v9313_v62 = vld [vmem:[#allocation60_spill] sm:$0xff] }
 0x31a   : > { %v7750_v36 = vmul.f32 %v7272_v48, %v7701_v2  ;;  %v3760_v63 = vmul.f32 %v7494_v44, %v3430_v15  ;;  %v2760_v11 = vmul.f32 %v7255_v50, %v7487_v56  ;;  %v3775_v42 = vadd.f32 %v3759_v20, %v3741_v58 }
 0x31b   : > { %5027 = vmatmul.msk.f32.gmra.mxu1 %vm3215_vm4, %v3195_v30  ;;  %v3842_v54 = vmul.f32 %v7526_v51, %v3830_v53  ;;  %v2535_v32 = vmul.f32 %v7207_v37, %v7732_v8  ;;  %v7761_v27 = vsel %vm556_vm1, 0.0, %v2388_v7  ;;  %v3348_v57 = vadd.f32 %v7422_v46, %v3347_v34  ;;  %v9314_v53 = vld [vmem:[#allocation63_spill] sm:$0xff] }
 0x31c   : > { %v3776_v24 = vadd.f32 %v3760_v63, %v3742_v5  ;;  %v2792_v15 = vadd.f32 %v2760_v11, %v7431_v31  ;;  %v7765_v56 = vadd.f32 %v3841_v43, %v3775_v42  ;;  %v7769_v20 = vmul.f32 %v7272_v48, %v7732_v8 }
 0x31d   : > { %v2246_v55 = vadd.f32 %v2204_v16, %v9312_v22  ;;  %v4032_v45 = vrot.slane %v7691_v59, 1  ;;  %v3350_v58 = vpop.f32.mrf.mxu1  ;;  %v2965_v30 = vmul.f32 %v7284_v61, %v9314_v53  ;;  %v7776_v63 = vmax.f32 %v3348_v57, 0.0 }
 0x31e   : > { %9311 = vst [vmem:[#allocation66_spill] sm:$0xff] %v7769_v20  ;;  %v2858_v5 = vadd.f32 %v9313_v62, %v2792_v15  ;;  %v4048_v31 = vrot.slane %v7691_v59, 2  ;;  %v2470_v34 = vmul.f32 %v7189_v23, %v7761_v27  ;;  %v7783_v43 = vmul.f32 %v7255_v50, %v7761_v27  ;;  %v9316_v15 = vld [vmem:[#allocation21_spill] sm:$0xff] }
 0x31f   : > { %v7786_v11 = vmul.f32 %v7232_v47, %v2658_v35  ;;  %v2282_v16 = vadd.f32 %v7179_v49, %v2246_v55  ;;  %v7789_v42 = vadd.f32 %v3842_v54, %v3776_v24  ;;  %v3031_v57 = vmul.f32 %v7292_v26, %v7573_v60 }
 0x320   : > { %9315 = vst [vmem:[#allocation76_spill] sm:$0xff] %v7783_v43  ;;  %v2930_v22 = vadd.f32 %v9316_v15, %v2858_v5  ;;  %v4088_v62 = vrot.slane %v7741_v29, 4  ;;  %v9022_v21 = vrot.slane %v7776_v63, 7  ;;  %v4152_v20 = vsel %vm556_vm1, %v7691_v59, %v4032_v45 }
 0x321   : > { %v7796_v6 = vmax.f32 %v2282_v16, 0.0  ;;  %v4064_v49 = vrot.slane %v7691_v59, 3  ;;  %v4161_v54 = vsel %vm4160_vm5, %v4152_v20, %v4048_v31  ;;  %v7802_v24 = vadd.f32 %v2535_v32, %v2470_v34 }
 0x322   : > { %v2997_v47 = vadd.f32 %v2965_v30, %v2930_v22  ;;  %v3096_v60 = vmul.f32 %v7329_v0, %v2658_v35  ;;  %v4104_v5 = vrot.slane %v7741_v29, 5  ;;  %v4120_v15 = vrot.slane %v7741_v29, 6 }
 0x323   : > { %v2389_v55 = vrot.slane %v7796_v6, 7  ;;  %v4136_v45 = vrot.slane %v7741_v29, 7  ;;  %v4169_v30 = vsel %vm702_vm0, %v4161_v54, %v4064_v49  ;;  %v3507_v59 = vsel %vm556_vm1, 0.0, %v9022_v21 }
 0x324   : > { %v3062_v16 = vadd.f32 %v3031_v57, %v2997_v47  ;;  %v2536_v35 = vmul.f32 %v7207_v37, %v7796_v6  ;;  %v4178_v20 = vsel %vm4177_vm6, %v4169_v30, %v4088_v62  ;;  %v3552_v22 = vmul.f32 %v7353_v4, %v7776_v63  ;;  %v9319_v30 = vld [vmem:[#allocation70_spill] sm:$0xff] }
 0x325   : > { %v7814_v32 = vsel %vm556_vm1, %v2388_v7, %v2389_v55  ;;  %v3353_v29 = vpop.f32.mrf.mxu1  ;;  %v4187_v57 = vsel %vm4186_vm7, %v4178_v20, %v4104_v5  ;;  %v9317_v7 = vrot.slane %v7701_v2, 1  ;;  %v9318_v47 = vrot.slane %v7629_v41, 1  ;;  %v9320_v20 = vld [vmem:[#allocation75_spill] sm:$0xff] }
 0x326   : > { %v3128_v31 = vadd.f32 %v3096_v60, %v3062_v16  ;;  %v2471_v34 = vmul.f32 %v7189_v23, %v7814_v32  ;;  %v4196_v23 = vsel %vm4195_vm8, %v4187_v57, %v4120_v15  ;;  %v2207_v60 = vpop.f32.mrf.mxu0  ;;  %v3583_v55 = vrot.slane %v7776_v63, 1 }
 0x327   : > { %v2609_v37 = vsel %vm1015_vm3, %v9318_v47, %v9317_v7  ;;  %v3884_v5 = vmul.f32 %v7558_v14, %v3507_v59  ;;  %v4204_v16 = vsel %vm1015_vm3, %v4196_v23, %v4136_v45  ;;  %v2793_v21 = vadd.f32 %v9320_v20, %v9319_v30  ;;  %v9322_v45 = vld [vmem:[#allocation72_spill] sm:$0xff]  ;;  %v7864_v30 = vld [vmem:[%s9215_s2] ss:$0 sm:$0xff]  ;;  %v9324_v20 = vld [vmem:[#allocation74_spill] sm:$0xff]  ;;  %s4616_s2 = scalar_lea.sflag [#allocation3], %s9348_s1 }
 0x328   : > { %v3164_v62 = vadd.f32 %v7358_v13, %v3128_v31  ;;  %v7830_v49 = vadd.f32 %v2536_v35, %v2471_v34  ;;  %v2690_v54 = vmul.f32 %v7226_v39, %v2609_v37  ;;  %v3918_v31 = vmul.f32 %v7599_v19, %v7776_v63  ;;  %5045 = vmatmul.msk.f32.vlgmr.msrb.gmra.mxu2 %vm4224_vm9, %v4204_v16  ;;  %v9321_v34 = vld [vmem:[#allocation73_spill] sm:$0xff] }
 0x329   : > { %v2966_v35 = vmul.f32 %v7284_v61, %v7656_v40  ;;  %v2859_v57 = vadd.f32 %v9321_v34, %v2793_v21  ;;  %v3351_v7 = vadd.f32 %v7422_v46, %v3350_v58  ;;  %v2247_v47 = vadd.f32 %v2207_v60, %v9322_v45 }
 0x32a   : > { %v3196_v43 = vmax.f32 %v3164_v62, 0.0  ;;  %v7843_v15 = vadd.f32 %v2690_v54, %v7698_v52  ;;  %v9323_v23 = vrot.slane %v7701_v2, 1  ;;  %v3519_v16 = vmul.f32 %v7348_v9, %v3507_v59 }
 0x32b   : > { %v9024_v52 = vrot.slane %v7796_v6, 1  ;;  %v2762_v40 = vmul.f32 %v7255_v50, %v9314_v53  ;;  %v3900_v21 = vadd.f32 %v3884_v5, %v7765_v56  ;;  %v2931_v58 = vadd.f32 %v7714_v25, %v2859_v57 }
 0x32c   : > { %v2659_v62 = vsel %vm1015_vm3, %v9323_v23, 0.0  ;;  %5028 = vmatmul.msk.f32.gmra.mxu1 %vm3215_vm4, %v3196_v43  ;;  %v3432_v60 = vmax.f32 %v3351_v7, 0.0  ;;  %v2283_v43 = vadd.f32 %v7864_v30, %v2247_v47  ;;  %v3032_v59 = vmul.f32 %v7292_v26, %v7629_v41 }
 0x32d   : > { %v2691_v54 = vmul.f32 %v7226_v39, %v2659_v62  ;;  %v2794_v50 = vadd.f32 %v2762_v40, %v9324_v20  ;;  %v3354_v56 = vadd.f32 %v7422_v46, %v3353_v29  ;;  %v2998_v53 = vadd.f32 %v2966_v35, %v2931_v58 }
 0x32e   : > { %v3097_v25 = vmul.f32 %v7329_v0, %v2609_v37  ;;  %v3475_v5 = vrot.slane %v3432_v60, 7  ;;  %v3584_v34 = vrot.slane %v3432_v60, 1  ;;  %v3568_v57 = vadd.f32 %v3552_v22, %v3519_v16  ;;  %v7892_v22 = vld [vmem:[%s9216_s3 + $0x6] ss:$0 sm:$0xff] }
 0x32f   : > { %v7870_v39 = vadd.f32 %v2691_v54, %v7734_v18  ;;  %v7877_v7 = vmul.f32 %v7272_v48, %v7796_v6  ;;  %v7879_v45 = vmax.f32 %v2283_v43, 0.0  ;;  %v2860_v41 = vadd.f32 %v7641_v33, %v2794_v50  ;;  %v7882_v18 = vpop.f32.mrf.mxu1  ;;  %v2210_v43 = vpop.f32.mrf.mxu0 }
 0x330   : > { %v3934_v47 = vadd.f32 %v3918_v31, %v3900_v21  ;;  %v3063_v23 = vadd.f32 %v3032_v59, %v2998_v53  ;;  %v9326_v29 = vrot.slane %v7776_v63, 7  ;;  %v7887_v54 = vmax.f32 %v3354_v56, 0.0 }
 0x331   : > { %9325 = vst [vmem:[#allocation27_spill] sm:$0xff] %v7877_v7  ;;  %v7895_v48 = vmul.f32 %v7892_v22, %v2609_v37  ;;  %v7899_v16 = vmul.f32 %v7892_v22, %v2659_v62  ;;  %v2967_v63 = vmul.f32 %v7284_v61, %v7719_v3  ;;  %v3616_v40 = vsel %vm1015_vm3, %v3584_v34, 0.0 }
 0x332   : > { %v3476_v35 = vsel %vm556_vm1, %v9326_v29, %v3475_v5  ;;  %v3129_v31 = vadd.f32 %v3097_v25, %v3063_v23  ;;  %v9025_v21 = vrot.slane %v7879_v45, 7  ;;  %v3033_v58 = vmul.f32 %v7292_v26, %v7701_v2 }
 0x333   : > { %v3885_v33 = vmul.f32 %v7558_v14, %v3476_v35  ;;  %v3520_v37 = vmul.f32 %v7348_v9, %v3476_v35  ;;  %v3553_v59 = vmul.f32 %v7353_v4, %v3432_v60  ;;  %v2932_v20 = vadd.f32 %v7786_v11, %v2860_v41  ;;  %v5182_v11 = vld [vmem:[%s9216_s3 + $0x1] ss:$0 sm:$0xff]  ;;  %v9327_v35 = vld [vmem:[#allocation62_spill] sm:$0xff] }
 0x334   : > { %v3098_v50 = vmul.f32 %v7329_v0, %v2659_v62  ;;  %v3165_v56 = vadd.f32 %v7358_v13, %v3129_v31  ;;  %v3585_v53 = vsel %vm1015_vm3, %v3583_v55, %v3584_v34  ;;  %v9023_v25 = vrot.slane %v7887_v54, 7 }
 0x335   : > { %v3901_v61 = vadd.f32 %v3885_v33, %v7789_v42  ;;  %v7916_v5 = vmul.f32 %v7387_v28, %v3616_v40  ;;  %v3919_v26 = vmul.f32 %v7599_v19, %v3432_v60  ;;  %v3959_v9 = vmul.f32 %v7618_v10, %v3616_v40 }
 0x336   : > { %v2999_v4 = vadd.f32 %v2967_v63, %v2932_v20  ;;  %v3197_v2 = vmax.f32 %v3165_v56, 0.0  ;;  %v7923_v0 = vsel %vm556_vm1, 0.0, %v9025_v21  ;;  %v2537_v42 = vmul.f32 %v5182_v11, %v7879_v45 }
 0x337   : > { %v2613_v55 = vrot.slane %v7879_v45, 1  ;;  %v7930_v62 = vadd.f32 %v3553_v59, %v3520_v37  ;;  %v3628_v34 = vmul.f32 %v7387_v28, %v3585_v53  ;;  %v3714_v41 = vsel %vm556_vm1, 0.0, %v9023_v25  ;;  %v5183_v28 = vld [vmem:[%s9216_s3] ss:$0 sm:$0xff]  ;;  %v7960_v59 = vld [vmem:[%s9216_s3 + $0x2] ss:$0 sm:$0xff]  ;;  %v7963_v56 = vpop.f32.mrf.mxu1 }
 0x338   : > { %v3064_v60 = vadd.f32 %v3033_v58, %v2999_v4  ;;  %5029 = vmatmul.msk.f32.gmra.mxu1 %vm3215_vm4, %v3197_v2  ;;  %v3935_v23 = vadd.f32 %v3919_v26, %v3901_v61  ;;  %v3958_v29 = vmul.f32 %v7618_v10, %v3585_v53  ;;  %v2248_v33 = vadd.f32 %v2210_v43, %v9327_v35  ;;  %v7951_v58 = vld [vmem:[%s9216_s3 + $0x5] ss:$0 sm:$0xff]  ;;  %v7968_v61 = vld [vmem:[%s9216_s3 + $0x4] ss:$0 sm:$0xff] }
 0x339   : > { %v9328_v63 = vrot.slane %v7732_v8, 1  ;;  %v2472_v40 = vmul.f32 %v5183_v28, %v7923_v0  ;;  %v7955_v43 = vmul.f32 %v7951_v58, %v7879_v45  ;;  %v7972_v53 = vmul.f32 %v7968_v61, %v7923_v0  ;;  %v9330_v10 = vld [vmem:[#allocation65_spill] sm:$0xff] }
 0x33a   : > { %v3130_v37 = vadd.f32 %v3098_v50, %v3064_v60  ;;  %v3727_v50 = vmul.f32 %v7462_v38, %v3714_v41  ;;  %v2284_v26 = vadd.f32 %v7864_v30, %v2248_v33  ;;  %v2795_v4 = vadd.f32 %v7695_v1, %v7634_v17 }
 0x33b   : > { %v2612_v31 = vsel %vm1015_vm3, %v9328_v63, %v9024_v52  ;;  %9329 = vst [vmem:[#allocation67_spill] sm:$0xff] %v7955_v43  ;;  %v3644_v60 = vadd.f32 %v3628_v34, %v3568_v57  ;;  %v3974_v35 = vadd.f32 %v3958_v29, %v3934_v47  ;;  %v3975_v25 = vadd.f32 %v3959_v9, %v3935_v23  ;;  %v2213_v43 = vpop.f32.mrf.mxu0  ;;  %v9331_v9 = vld [vmem:[#allocation17_spill] sm:$0xff]  ;;  %v9332_v29 = vld [vmem:[#allocation64_spill] sm:$0xff] }
 0x33c   : > { %v2692_v20 = vmul.f32 %v7960_v59, %v2612_v31  ;;  %v3166_v2 = vadd.f32 %v7358_v13, %v3130_v37  ;;  %v3761_v52 = vmul.f32 %v7494_v44, %v7887_v54  ;;  %v7984_v21 = vmax.f32 %v2284_v26, 0.0  ;;  %v7991_v13 = vld [vmem:[%s9216_s3 + $0x8] ss:$0 sm:$0xff] }
 0x33d   : > { %v2861_v41 = vadd.f32 %v9330_v10, %v2795_v4  ;;  %v2569_v33 = vadd.f32 %v2537_v42, %v2472_v40  ;;  %v3795_v7 = vrot.slane %v7887_v54, 1  ;;  %v2968_v17 = vmul.f32 %v7991_v13, %v7761_v27 }
 0x33e   : > { %v7980_v63 = vadd.f32 %v2692_v20, %v7802_v24  ;;  %v3357_v1 = vadd.f32 %v7422_v46, %v7882_v18  ;;  %v3198_v24 = vmax.f32 %v3166_v2, 0.0  ;;  %v3743_v57 = vadd.f32 %v3727_v50, %v3644_v60  ;;  %v8014_v20 = vld [vmem:[%s9216_s3 + $0x9] ss:$0 sm:$0xff] }
 0x33f   : > { %v2392_v47 = vrot.slane %v7984_v21, 7  ;;  %v2614_v10 = vrot.slane %v7984_v21, 1  ;;  %v3994_v42 = vadd.f32 %v9331_v9, %v3974_v35  ;;  %v2933_v34 = vadd.f32 %v7895_v48, %v2861_v41 }
 0x340   : > { %v3434_v23 = vmax.f32 %v3357_v1, 0.0  ;;  %v2249_v40 = vadd.f32 %v2213_v43, %v9332_v29  ;;  %5030 = vmatmul.msk.f32.gmra.mxu1 %vm3215_vm4, %v3198_v24  ;;  %v9333_v27 = vrot.slane %v7879_v45, 7  ;;  %v3034_v48 = vmul.f32 %v8014_v20, %v7732_v8  ;;  %v8021_v43 = vld [vmem:[%s9216_s3 + $0xa] ss:$0 sm:$0xff]  ;;  %s5218_s3 = sshra.s32 %s4631_s17, 4  ;;  %s5219_s3 = int_to_ptr.hbm [resolvable:$true] %s5218_s3 }
 0x341   : > { %v8009_v18 = vsel %vm1015_vm3, %v2613_v55, %v2614_v10  ;;  %v3099_v50 = vmul.f32 %v8021_v43, %v2612_v31  ;;  %v2538_v55 = vmul.f32 %v5182_v11, %v7984_v21  ;;  %v3000_v4 = vadd.f32 %v2968_v17, %v2933_v34  ;;  %v8036_v17 = vpop.f32.mrf.mxu1  ;;  %s5220_s22 = scalar_lea.hbm %s5219_s3, 64  ;;  %p5225_p0 = scmp.lt.s32.totalorder %s5219_s3, %s8942_s15 }
 0x342   : > { %v8006_v37 = vsel %vm556_vm1, %v9333_v27, %v2392_v47  ;;  %v3679_v2 = vrot.slane %v3434_v23, 7  ;;  %v3796_v60 = vrot.slane %v3434_v23, 1  ;;  %v2285_v35 = vadd.f32 %v7864_v30, %v2249_v40  ;;  %p5221_p11 = scmp.ne.s32.totalorder %s5219_s3, %s5220_s22  ;;  %p5226_p1 = scmp.lt.s32.totalorder %s5224_s23, %s5220_s22 }
 0x343   : > { %9334 = vst [vmem:[#allocation20_spill] sm:$0xff] %v8006_v37  ;;  %v2473_v26 = vmul.f32 %v5183_v28, %v8006_v37  ;;  %v2694_v41 = vmul.f32 %v7960_v59, %v8009_v18  ;;  %v9335_v8 = vrot.slane %v7796_v6, 1  ;;  %v3995_v24 = vadd.f32 %v9331_v9, %v3975_v25 }
 0x344   : > { %v3065_v29 = vadd.f32 %v3034_v48, %v3000_v4  ;;  %v9336_v28 = vrot.slane %v7887_v54, 7  ;;  %v8039_v34 = vmul.f32 %v7892_v22, %v2612_v31  ;;  %v8042_v27 = vmax.f32 %v2285_v35, 0.0  ;;  %p5222_p12 = pnand %p5221_p11, %p5389_p5  ;;  %p5227_p2 = por %p5226_p1, %p5225_p0 }
 0x345   : > { %v2660_v1 = vsel %vm1015_vm3, %v9335_v8, 0.0  ;;  %v2570_v47 = vadd.f32 %v2538_v55, %v2473_v26  ;;  %v2764_v8 = vmul.f32 %v7968_v61, %v7719_v3  ;;  %v3777_v37 = vadd.f32 %v3761_v52, %v3743_v57  ;;  %v8060_v3 = vld [vmem:[%s9243_s4] ss:$0 sm:$0xff] }
 0x346   : > { %v3680_v11 = vsel %vm556_vm1, %v9336_v28, %v3679_v2  ;;  %v3131_v25 = vadd.f32 %v3099_v50, %v3065_v29  ;;  %v2726_v26 = vadd.f32 %v2694_v41, %v2569_v33  ;;  %v2693_v48 = vmul.f32 %v7960_v59, %v2660_v1  ;;  %v2216_v50 = vpop.f32.mrf.mxu0  ;;  %p5223_p13 = pneg %p5222_p12 }
 0x347   : > { %v3728_v40 = vmul.f32 %v7462_v38, %v3680_v11  ;;  %v8047_v54 = vmax.f32 %v3994_v42, 0.0  ;;  %v3645_v55 = vadd.f32 %v7916_v5, %v7930_v62  ;;  %v3797_v31 = vsel %vm1015_vm3, %v3795_v7, %v3796_v60 }
 0x348   : > { %v2730_v4 = vrot.slane %v8042_v27, 7  ;;  %v8055_v38 = vmul.f32 %v7951_v58, %v7984_v21  ;;  %v3167_v52 = vadd.f32 %v8060_v3, %v3131_v25  ;;  %v3831_v33 = vsel %vm1015_vm3, %v3796_v60, 0.0  ;;  %p5228_p3 = pnand %p5227_p2, %p5223_p13 }
 0x349   : > { %v8065_v57 = vadd.f32 %v2693_v48, %v7830_v49  ;;  %v8068_v7 = vsel %vm1015_vm3, %v2614_v10, 0.0  ;;  %v3744_v5 = vadd.f32 %v3728_v40, %v3645_v55  ;;  %v2796_v42 = vadd.f32 %v2764_v8, %v7745_v12 }
 0x34a   : > { %v2735_v62 = vsel %vm556_vm1, 0.0, %v2730_v4  ;;  %v3199_v2 = vmax.f32 %v3167_v52, 0.0  ;;  %v3762_v35 = vmul.f32 %v7494_v44, %v3434_v23  ;;  %v3843_v41 = vmul.f32 %v7526_v51, %v3797_v31  ;;  %v9337_v23 = vld [vmem:[#allocation18_spill] sm:$0xff] }
 0x34b   : > { %v2769_v29 = vmul.f32 %v7968_v61, %v2735_v62  ;;  %v3844_v60 = vmul.f32 %v7526_v51, %v3831_v33  ;;  %v2835_v49 = vmul.f32 %v7951_v58, %v8042_v27  ;;  %v2862_v10 = vadd.f32 %v7750_v36, %v2796_v42  ;;  %v8087_v51 = vpop.f32.mrf.mxu1 }
 0x34c   : > { %v2969_v28 = vmul.f32 %v7991_v13, %v7814_v32  ;;  %5031 = vmatmul.msk.f32.gmra.mxu1 %vm3215_vm4, %v3199_v2  ;;  %v3360_v44 = vadd.f32 %v7422_v46, %v7963_v56  ;;  %v2250_v11 = vadd.f32 %v2216_v50, %v9337_v23  ;;  %v2695_v40 = vmul.f32 %v7960_v59, %v8068_v7 }
 0x34d   : > { %v2801_v12 = vadd.f32 %v2769_v29, %v2726_v26  ;;  %v3778_v8 = vadd.f32 %v3762_v35, %v3744_v5  ;;  %v2869_v25 = vrot.slane %v8042_v27, 1  ;;  %v2934_v36 = vadd.f32 %v7899_v16, %v2862_v10 }
 0x34e   : > { %v4033_v48 = vrot.slane %v8047_v54, 1  ;;  %v8094_v26 = vmax.f32 %v3360_v44, 0.0  ;;  %v2286_v46 = vadd.f32 %v7864_v30, %v2250_v11  ;;  %v2727_v56 = vadd.f32 %v2695_v40, %v2570_v47 }
 0x34f   : > { %v8092_v55 = vadd.f32 %v2835_v49, %v2801_v12  ;;  %v3859_v31 = vadd.f32 %v3843_v41, %v3777_v37  ;;  %v3001_v52 = vadd.f32 %v2969_v28, %v2934_v36  ;;  %v3035_v59 = vmul.f32 %v8014_v20, %v7796_v6  ;;  %v9338_v41 = vld [vmem:[#allocation76_spill] sm:$0xff] }
 0x350   : > { %v4011_v33 = vmax.f32 %v3995_v24, 0.0  ;;  %v8101_v5 = vmul.f32 %v8014_v20, %v8042_v27  ;;  %v8104_v16 = vmul.f32 %v7892_v22, %v2660_v1  ;;  %v3477_v42 = vrot.slane %v8094_v26, 7 }
 0x351   : > { %v4049_v50 = vrot.slane %v8047_v54, 2  ;;  %v8109_v30 = vmul.f32 %v7991_v13, %v2735_v62  ;;  %v3066_v37 = vadd.f32 %v3035_v59, %v3001_v52  ;;  %v3100_v47 = vmul.f32 %v8021_v43, %v2660_v1 }
 0x352   : > { %v8112_v2 = vmax.f32 %v2286_v46, 0.0  ;;  %v8114_v6 = vadd.f32 %v3844_v60, %v3778_v8  ;;  %v4065_v24 = vrot.slane %v8047_v54, 3  ;;  %v4153_v35 = vsel %vm556_vm1, %v8047_v54, %v4033_v48  ;;  %v8128_v60 = vld [vmem:[%s8934_s7 + $0x1] ss:$0 sm:$0xff]  ;;  %v9339_v46 = vld [vmem:[#allocation66_spill] sm:$0xff] }
 0x353   : > { %v2797_v29 = vadd.f32 %v9338_v41, %v7843_v15  ;;  %v3132_v49 = vadd.f32 %v3100_v47, %v3066_v37  ;;  %v4089_v62 = vrot.slane %v4011_v33, 4  ;;  %v4105_v28 = vrot.slane %v4011_v33, 5  ;;  %v8136_v44 = vpop.f32.mrf.mxu1 }
 0x354   : > { %v2731_v10 = vrot.slane %v8112_v2, 7  ;;  %v3508_v1 = vsel %vm556_vm1, 0.0, %v3477_v42  ;;  %v8132_v54 = vmul.f32 %v8128_v60, %v8094_v26  ;;  %v3586_v15 = vrot.slane %v8094_v26, 1 }
 0x355   : > { %v4162_v12 = vsel %vm4160_vm5, %v4153_v35, %v4049_v50  ;;  %v3168_v23 = vadd.f32 %v8060_v3, %v3132_v49  ;;  %v4121_v40 = vrot.slane %v4011_v33, 6  ;;  %v4137_v8 = vrot.slane %v4011_v33, 7 }
 0x356   : > { %v8140_v11 = vsel %vm556_vm1, %v2730_v4, %v2731_v10  ;;  %v4170_v48 = vsel %vm702_vm0, %v4162_v12, %v4065_v24  ;;  %v2863_v52 = vadd.f32 %v9339_v46, %v2797_v29  ;;  %v2970_v59 = vmul.f32 %v7991_v13, %v7923_v0  ;;  %v8157_v24 = vld [vmem:[%s8933_s6] ss:$0 sm:$0xff]  ;;  %v9340_v46 = vld [vmem:[#allocation27_spill] sm:$0xff] }
 0x357   : > { %v2770_v36 = vmul.f32 %v7968_v61, %v8140_v11  ;;  %v3200_v50 = vmax.f32 %v3168_v23, 0.0  ;;  %v3886_v37 = vmul.f32 %v7558_v14, %v3508_v1  ;;  %v2836_v47 = vmul.f32 %v7951_v58, %v8112_v2 }
 0x358   : > { %v4179_v4 = vsel %vm4177_vm6, %v4170_v48, %v4089_v62  ;;  %v2935_v41 = vadd.f32 %v8039_v34, %v2863_v52  ;;  %v3363_v0 = vadd.f32 %v8157_v24, %v8036_v17  ;;  %v3036_v58 = vmul.f32 %v8014_v20, %v7879_v45 }
 0x359   : > { %v2802_v35 = vadd.f32 %v2770_v36, %v2727_v56  ;;  %v4188_v33 = vsel %vm4186_vm7, %v4179_v4, %v4105_v28  ;;  %5032 = vmatmul.msk.f32.gmra.mxu1 %vm3215_vm4, %v3200_v50  ;;  %v3101_v56 = vmul.f32 %v8021_v43, %v8009_v18  ;;  %v2766_v34 = vmul.f32 %v7968_v61, %v7814_v32 }
 0x35a   : > { %v4197_v29 = vsel %vm4195_vm8, %v4188_v33, %v4121_v40  ;;  %v3002_v62 = vadd.f32 %v2970_v59, %v2935_v41  ;;  %v3436_v28 = vmax.f32 %v3363_v0, 0.0  ;;  %v3902_v17 = vadd.f32 %v3886_v37, %v3859_v31  ;;  %v8185_v31 = vld [vmem:[%s8934_s7] ss:$0 sm:$0xff]  ;;  %v9343_v41 = vld [vmem:[#allocation14_spill] sm:$0xff] }
 0x35b   : > { %v8169_v49 = vadd.f32 %v2836_v47, %v2802_v35  ;;  %v4205_v10 = vsel %vm1015_vm3, %v4197_v29, %v4137_v8  ;;  %v2798_v12 = vadd.f32 %v2766_v34, %v7870_v39  ;;  %v3366_v45 = vadd.f32 %v8157_v24, %v8087_v51  ;;  %v8180_v8 = vpop.f32.mrf.mxu1  ;;  %v9342_v47 = vld [vmem:[#allocation20_spill] sm:$0xff] }
 0x35c   : > { %5046 = vmatmul.msk.f32.gmra.mxu2 %vm4224_vm9, %v4205_v10  ;;  %v2799_v23 = vadd.f32 %v7972_v53, %v7980_v63  ;;  %v3920_v32 = vmul.f32 %v7599_v19, %v8094_v26  ;;  %v3067_v40 = vadd.f32 %v3036_v58, %v3002_v62  ;;  %v3478_v36 = vrot.slane %v3436_v28, 7  ;;  %v9341_v53 = vld [vmem:[#allocation67_spill] sm:$0xff] }
 0x35d   : > { %v3587_v48 = vrot.slane %v3436_v28, 1  ;;  %v3521_v39 = vmul.f32 %v8185_v31, %v3508_v1  ;;  %v2864_v51 = vadd.f32 %v9340_v46, %v2798_v12  ;;  %v8189_v52 = vmax.f32 %v3366_v45, 0.0 }
 0x35e   : > { %v2865_v63 = vadd.f32 %v9341_v53, %v2799_v23  ;;  %v3133_v59 = vadd.f32 %v3101_v56, %v3067_v40  ;;  %v3479_v50 = vsel %vm556_vm1, %v3477_v42, %v3478_v36  ;;  %v2971_v4 = vmul.f32 %v7991_v13, %v9342_v47 }
 0x35f   : > { %v3588_v37 = vsel %vm1015_vm3, %v3586_v15, %v3587_v48  ;;  %v3936_v35 = vadd.f32 %v3920_v32, %v3902_v17  ;;  %v2870_v33 = vrot.slane %v8112_v2, 1  ;;  %v3887_v1 = vmul.f32 %v7558_v14, %v3479_v50 }
 0x360   : > { %v3960_v0 = vmul.f32 %v9343_v41, %v3588_v37  ;;  %v8203_v29 = vmul.f32 %v8014_v20, %v8112_v2  ;;  %v3169_v26 = vadd.f32 %v8060_v3, %v3133_v59  ;;  %v3617_v42 = vsel %vm1015_vm3, %v3587_v48, 0.0 }
 0x361   : > { %v2936_v15 = vadd.f32 %v8104_v16, %v2864_v51  ;;  %v3903_v58 = vadd.f32 %v3887_v1, %v8114_v6  ;;  %v3921_v56 = vmul.f32 %v7599_v19, %v3436_v28  ;;  %v3681_v10 = vrot.slane %v8189_v52, 7  ;;  %v8220_v19 = vld [vmem:[%s8934_s7 + $0x2] ss:$0 sm:$0xff] }
 0x362   : > { %v3976_v34 = vadd.f32 %v3960_v0, %v3936_v35  ;;  %v3201_v14 = vmax.f32 %v3169_v26, 0.0  ;;  %v3037_v17 = vmul.f32 %v8014_v20, %v7984_v21  ;;  %v3102_v12 = vmul.f32 %v8021_v43, %v8068_v7  ;;  %v8259_v26 = vld [vmem:[%s8934_s7 + $0x5] ss:$0 sm:$0xff] }
 0x363   : > { %v3003_v62 = vadd.f32 %v2971_v4, %v2936_v15  ;;  %v3522_v45 = vmul.f32 %v8185_v31, %v3479_v50  ;;  %v3937_v23 = vadd.f32 %v3921_v56, %v3903_v58  ;;  %v3961_v16 = vmul.f32 %v9343_v41, %v3617_v42  ;;  %v8232_v48 = vpop.f32.mrf.mxu1 }
 0x364   : > { %v3630_v6 = vmul.f32 %v8220_v19, %v3588_v37  ;;  %5033 = vmatmul.msk.f32.gmra.mxu1 %vm3215_vm4, %v3201_v14  ;;  %v3715_v21 = vsel %vm556_vm1, 0.0, %v3681_v10  ;;  %v2871_v40 = vsel %vm1015_vm3, %v2869_v25, %v2870_v33  ;;  %v2905_v36 = vmul.f32 %v7892_v22, %v8009_v18  ;;  %v8243_v18 = vld [vmem:[%s8934_s7 + $0x4] ss:$0 sm:$0xff] }
 0x365   : > { %v3068_v32 = vadd.f32 %v3037_v17, %v3003_v62  ;;  %v3570_v46 = vadd.f32 %v8132_v54, %v3521_v39  ;;  %v3555_v51 = vmul.f32 %v8128_v60, %v3436_v28  ;;  %v3631_v53 = vmul.f32 %v8220_v19, %v3617_v42 }
 0x366   : > { %v3996_v59 = vadd.f32 %v9331_v9, %v3976_v34  ;;  %v3977_v50 = vadd.f32 %v3961_v16, %v3937_v23  ;;  %v2937_v4 = vadd.f32 %v2905_v36, %v2865_v63  ;;  %v3369_v27 = vadd.f32 %v8157_v24, %v8136_v44  ;;  %v4553_v44 = vld [vmem:[%s8940_s13 + $0x78] sm:$0xff] }
 0x367   : > { %v3134_v37 = vadd.f32 %v3102_v12, %v3068_v32  ;;  %v3571_v25 = vadd.f32 %v3555_v51, %v3522_v45  ;;  %v3646_v35 = vadd.f32 %v3630_v6, %v3570_v46  ;;  %v3729_v54 = vmul.f32 %v8243_v18, %v3715_v21  ;;  %4558 = vmatpush.msrb.mxu3 %v4553_v44 }
 0x368   : > { %v2768_v28 = vmul.f32 %v7968_v61, %v9342_v47  ;;  %v3004_v1 = vadd.f32 %v8109_v30, %v2937_v4  ;;  %v3103_v63 = vmul.f32 %v8021_v43, %v2871_v40  ;;  %v3438_v41 = vmax.f32 %v3369_v27, 0.0 }
 0x369   : > { %v3170_v39 = vadd.f32 %v8060_v3, %v3134_v37  ;;  %v8254_v0 = vmax.f32 %v3996_v59, 0.0  ;;  %v3763_v61 = vmul.f32 %v8259_v26, %v8189_v52  ;;  %v3798_v47 = vrot.slane %v8189_v52, 1 }
 0x36a   : > { %v2800_v30 = vadd.f32 %v2768_v28, %v8065_v57  ;;  %v3997_v42 = vadd.f32 %v9331_v9, %v3977_v50  ;;  %v3069_v58 = vadd.f32 %v8101_v5, %v3004_v1  ;;  %v3682_v56 = vrot.slane %v3438_v41, 7 }
 0x36b   : > { %v3202_v15 = vmax.f32 %v3170_v39, 0.0  ;;  %v3799_v34 = vrot.slane %v3438_v41, 1  ;;  %v2906_v62 = vmul.f32 %v7892_v22, %v8068_v7  ;;  %v2973_v17 = vmul.f32 %v7991_v13, %v8140_v11  ;;  %v3377_v5 = vpop.f32.mrf.mxu1 }
 0x36c   : > { %v2866_v14 = vadd.f32 %v8055_v38, %v2800_v30  ;;  %v3745_v52 = vadd.f32 %v3729_v54, %v3646_v35  ;;  %v3135_v57 = vadd.f32 %v3103_v63, %v3069_v58  ;;  %v3683_v12 = vsel %vm556_vm1, %v3681_v10, %v3682_v56  ;;  %v4552_v38 = vld [vmem:[%s8940_s13 + $0x70] sm:$0xff] }
 0x36d   : > { %5034 = vmatmul.msk.f32.gmra.mxu1 %vm3215_vm4, %v3202_v15  ;;  %v3372_v9 = vadd.f32 %v8157_v24, %v8180_v8  ;;  %v2907_v45 = vmul.f32 %v7892_v22, %v2871_v40  ;;  %v3730_v7 = vmul.f32 %v8243_v18, %v3683_v12  ;;  %v3800_v11 = vsel %vm1015_vm3, %v3798_v47, %v3799_v34  ;;  %v8292_v40 = vld [vmem:[%s8934_s7 + $0x6] ss:$0 sm:$0xff] }
 0x36e   : > { %v2938_v23 = vadd.f32 %v2906_v62, %v2866_v14  ;;  %4559 = vmatpush.msrb.mxu3 %v4552_v38  ;;  %v3171_v16 = vadd.f32 %v8060_v3, %v3135_v57  ;;  %v3647_v6 = vadd.f32 %v3631_v53, %v3571_v25  ;;  %v2874_v8 = vsel %vm1015_vm3, %v2870_v33, 0.0  ;;  %v9345_v62 = vld [vmem:[#allocation32_spill] sm:$0xff] }
 0x36f   : > { %v8286_v10 = vmax.f32 %v3372_v9, 0.0  ;;  %v4013_v32 = vmax.f32 %v3997_v42, 0.0  ;;  %v3832_v21 = vsel %vm1015_vm3, %v3799_v34, 0.0  ;;  %v3845_v36 = vmul.f32 %v8292_v40, %v3800_v11 }
 0x370   : > { %v3005_v46 = vadd.f32 %v2973_v17, %v2938_v23  ;;  %v3779_v51 = vadd.f32 %v3763_v61, %v3745_v52  ;;  %v3203_v59 = vmax.f32 %v3171_v16, 0.0  ;;  %v4034_v2 = vrot.slane %v8254_v0, 1 }
 0x371   : > { %v3480_v53 = vrot.slane %v8286_v10, 7  ;;  %v3746_v33 = vadd.f32 %v3730_v7, %v3647_v6  ;;  %v3104_v37 = vmul.f32 %v8021_v43, %v2874_v8  ;;  %v4050_v4 = vrot.slane %v8254_v0, 2 }
 0x372   : > { %v3070_v50 = vadd.f32 %v8203_v29, %v3005_v46  ;;  %v3764_v27 = vmul.f32 %v8259_v26, %v3438_v41  ;;  %v3846_v25 = vmul.f32 %v8292_v40, %v3832_v21  ;;  %v2908_v35 = vmul.f32 %v7892_v22, %v2874_v8  ;;  %v9344_v41 = vld [vmem:[#allocation6_spill] sm:$0xff] }
 0x373   : > { %v4066_v54 = vrot.slane %v8254_v0, 3  ;;  %v3861_v28 = vadd.f32 %v3845_v36, %v3779_v51  ;;  %v3509_v1 = vsel %vm556_vm1, 0.0, %v3480_v53  ;;  %v4090_v63 = vrot.slane %v4013_v32, 4  ;;  %v3380_v30 = vpop.f32.mrf.mxu1 }
 0x374   : > { %v3136_v39 = vadd.f32 %v3104_v37, %v3070_v50  ;;  %v4106_v29 = vrot.slane %v4013_v32, 5  ;;  %v4154_v44 = vsel %vm556_vm1, %v8254_v0, %v4034_v2  ;;  %v2939_v61 = vadd.f32 %v2907_v45, %v8092_v55  ;;  %v8320_v55 = vld [vmem:[%s8934_s7 + $0x8] ss:$0 sm:$0xff]  ;;  %v9346_v45 = vld [vmem:[#allocation5_spill] sm:$0xff] }
 0x375   : > { %5035 = vmatmul.msk.f32.gmra.mxu1 %vm3215_vm4, %v3203_v59  ;;  %v2974_v47 = vmul.f32 %v7991_v13, %v9344_v41  ;;  %v3780_v22 = vadd.f32 %v3764_v27, %v3746_v33  ;;  %v4122_v15 = vrot.slane %v4013_v32, 6  ;;  %v4163_v58 = vsel %vm4160_vm5, %v4154_v44, %v4050_v4  ;;  %v9347_v27 = vld [vmem:[#allocation34_spill] sm:$0xff] }
 0x376   : > { %v3172_v42 = vadd.f32 %v8060_v3, %v3136_v39  ;;  %v4171_v56 = vsel %vm702_vm0, %v4163_v58, %v4066_v54  ;;  %v3040_v14 = vmul.f32 0.0, %v8014_v20  ;;  %v3105_v0 = vmul.f32 %v8021_v43, %v9345_v62 }
 0x377   : > { %v3006_v34 = vadd.f32 %v2974_v47, %v2939_v61  ;;  %v3888_v17 = vmul.f32 %v8320_v55, %v3509_v1  ;;  %v4138_v52 = vrot.slane %v4013_v32, 7  ;;  %v4180_v57 = vsel %vm4177_vm6, %v4171_v56, %v4090_v63 }
 0x378   : > { %v3375_v12 = vadd.f32 %v8157_v24, %v8232_v48  ;;  %v4189_v9 = vsel %vm4186_vm7, %v4180_v57, %v4106_v29  ;;  %v2940_v20 = vadd.f32 %v2908_v35, %v8169_v49  ;;  %v2975_v7 = vmul.f32 %v7991_v13, %v9346_v45  ;;  %v8376_v57 = vld [vmem:[%s8935_s8] ss:$0 sm:$0xff] }
 0x379   : > { %v3071_v38 = vadd.f32 %v3040_v14, %v3006_v34  ;;  %v3204_v11 = vmax.f32 %v3172_v42, 0.0  ;;  %v4198_v23 = vsel %vm4195_vm8, %v4189_v9, %v4122_v15  ;;  %v3378_v6 = vadd.f32 %v8157_v24, %v3377_v5  ;;  %v8342_v5 = vld [vmem:[%s8934_s7 + $0x9] ss:$0 sm:$0xff] }
 0x37a   : > { %v3440_v16 = vmax.f32 %v3375_v12, 0.0  ;;  %v4206_v8 = vsel %vm1015_vm3, %v4198_v23, %v4138_v52  ;;  %v3007_v21 = vadd.f32 %v2975_v7, %v2940_v20  ;;  %v3381_v48 = vadd.f32 %v8157_v24, %v3380_v30 }
 0x37b   : > { %v3137_v32 = vadd.f32 %v3105_v0, %v3071_v38  ;;  %v3589_v36 = vrot.slane %v8286_v10, 1  ;;  %v3904_v46 = vadd.f32 %v3888_v17, %v3861_v28  ;;  %5047 = vmatmul.msk.f32.gmra.mxu2 %vm4224_vm9, %v4206_v8  ;;  %v3556_v13 = vmul.f32 %v8128_v60, %v8286_v10  ;;  %v3383_v54 = vpop.f32.mrf.mxu1 }
 0x37c   : > { %v3481_v49 = vrot.slane %v3440_v16, 7  ;;  %v3590_v51 = vrot.slane %v3440_v16, 1  ;;  %v3922_v59 = vmul.f32 %v8342_v5, %v8286_v10  ;;  %v3441_v33 = vmax.f32 %v3378_v6, 0.0  ;;  %v4551_v10 = vld [vmem:[%s8940_s13 + $0x68] sm:$0xff] }
 0x37d   : > { %5036 = vmatmul.msk.f32.gmra.mxu1 %vm3215_vm4, %v3204_v11  ;;  %v3173_v2 = vadd.f32 %v8060_v3, %v3137_v32  ;;  %v3862_v50 = vadd.f32 %v3846_v25, %v3780_v22  ;;  %v3106_v35 = vmul.f32 %v8021_v43, %v9347_v27  ;;  %v3072_v63 = vadd.f32 %v3040_v14, %v3007_v21  ;;  %v8363_v43 = vld [vmem:[%s8934_s7 + $0xa] ss:$0 sm:$0xff] }
 0x37e   : > { %v3482_v37 = vsel %vm556_vm1, %v3480_v53, %v3481_v49  ;;  %v3591_v4 = vsel %vm1015_vm3, %v3589_v36, %v3590_v51  ;;  %v3618_v28 = vsel %vm1015_vm3, %v3590_v51, 0.0  ;;  %v8353_v29 = vmax.f32 %v3381_v48, 0.0  ;;  %4560 = vmatpush.msrb.mxu3 %v4551_v10 }
 0x37f   : > { %v3889_v39 = vmul.f32 %v8320_v55, %v3482_v37  ;;  %v3523_v25 = vmul.f32 %v8185_v31, %v3509_v1  ;;  %v3938_v53 = vadd.f32 %v3922_v59, %v3904_v46  ;;  %v3923_v44 = vmul.f32 %v8342_v5, %v3440_v16 }
 0x380   : > { %v3962_v61 = vmul.f32 %v8363_v43, %v3591_v4  ;;  %v3205_v47 = vmax.f32 %v3173_v2, 0.0  ;;  %v3684_v22 = vrot.slane %v3441_v33, 7  ;;  %v3384_v42 = vadd.f32 %v8157_v24, %v3383_v54 }
 0x381   : > { %v3905_v30 = vadd.f32 %v3889_v39, %v3862_v50  ;;  %v3524_v15 = vmul.f32 %v8185_v31, %v3482_v37  ;;  %v3963_v1 = vmul.f32 %v8363_v43, %v3618_v28  ;;  %v3632_v56 = vmul.f32 %v8220_v19, %v3591_v4 }
 0x382   : > { %v3978_v58 = vadd.f32 %v3962_v61, %v3938_v53  ;;  %v3138_v14 = vadd.f32 %v3106_v35, %v3072_v63  ;;  %v3716_v62 = vsel %vm556_vm1, 0.0, %v3684_v22  ;;  %v3685_v0 = vrot.slane %v8353_v29, 7 }
 0x383   : > { %v3939_v34 = vadd.f32 %v3923_v44, %v3905_v30  ;;  %v3572_v17 = vadd.f32 %v3556_v13, %v3523_v25  ;;  %v3557_v52 = vmul.f32 %v8128_v60, %v3440_v16  ;;  %v3731_v9 = vmul.f32 %v8243_v18, %v3716_v62 }
 0x384   : > { %v3998_v12 = vadd.f32 %v8376_v57, %v3978_v58  ;;  %v3686_v20 = vsel %vm556_vm1, %v3684_v22, %v3685_v0  ;;  %v3802_v45 = vrot.slane %v8353_v29, 1  ;;  %v8383_v7 = vmax.f32 %v3384_v42, 0.0 }
 0x385   : > { %5037 = vmatmul.msk.f32.gmra.mxu1 %vm3215_vm4, %v3205_v47  ;;  %v3979_v38 = vadd.f32 %v3963_v1, %v3939_v34  ;;  %v3573_v11 = vadd.f32 %v3557_v52, %v3524_v15  ;;  %v3648_v23 = vadd.f32 %v3632_v56, %v3572_v17  ;;  %v3801_v16 = vrot.slane %v3441_v33, 1 }
 0x386   : > { %v4014_v8 = vmax.f32 %v3998_v12, 0.0  ;;  %v3174_v32 = vadd.f32 %v8060_v3, %v3138_v14  ;;  %v3483_v21 = vrot.slane %v8383_v7, 7  ;;  %v3633_v48 = vmul.f32 %v8220_v19, %v3618_v28 }
 0x387   : > { %v3999_v6 = vadd.f32 %v8376_v57, %v3979_v38  ;;  %v3747_v36 = vadd.f32 %v3731_v9, %v3648_v23  ;;  %v3732_v46 = vmul.f32 %v8243_v18, %v3686_v20  ;;  %v3803_v49 = vsel %vm1015_vm3, %v3801_v16, %v3802_v45 }
 0x388   : > { %v3765_v13 = vmul.f32 %v8259_v26, %v3441_v33  ;;  %v3649_v59 = vadd.f32 %v3633_v48, %v3573_v11  ;;  %v8393_v2 = vsel %vm556_vm1, 0.0, %v3483_v21  ;;  %v3206_v50 = vmax.f32 %v3174_v32, 0.0 }
 0x389   : > { %v4015_v51 = vmax.f32 %v3999_v6, 0.0  ;;  %v3847_v37 = vmul.f32 %v8292_v40, %v3803_v49  ;;  %v4035_v3 = vrot.slane %v4014_v8, 1  ;;  %v4051_v4 = vrot.slane %v4014_v8, 2 }
 0x38a   : > { %v3386_v35 = vpop.f32.mrf.mxu1  ;;  %v3781_v54 = vadd.f32 %v3765_v13, %v3747_v36  ;;  %v3748_v28 = vadd.f32 %v3732_v46, %v3649_v59  ;;  %v3890_v63 = vmul.f32 %v8320_v55, %v8393_v2  ;;  %v4067_v10 = vrot.slane %v4014_v8, 3  ;;  %v4550_v36 = vld [vmem:[%s8940_s13 + $0x60] sm:$0xff] }
 0x38b   : > { %v4091_v39 = vrot.slane %v4015_v51, 4  ;;  %v4107_v33 = vrot.slane %v4015_v51, 5  ;;  %v4155_v25 = vsel %vm556_vm1, %v4014_v8, %v4035_v3  ;;  %v3387_v44 = vadd.f32 %v8157_v24, %v3386_v35  ;;  %4561 = vmatpush.msrb.mxu3 %v4550_v36 }
 0x38c   : > { %v4164_v53 = vsel %vm4160_vm5, %v4155_v25, %v4051_v4  ;;  %v3766_v61 = vmul.f32 %v8259_v26, %v8353_v29  ;;  %v3863_v47 = vadd.f32 %v3847_v37, %v3781_v54  ;;  %v3833_v22 = vsel %vm1015_vm3, %v3802_v45, 0.0 }
 0x38d   : > { %5038 = vmatmul.msk.f32.gmra.mxu1 %vm3215_vm4, %v3206_v50  ;;  %v4172_v30 = vsel %vm702_vm0, %v4164_v53, %v4067_v10  ;;  %v4123_v42 = vrot.slane %v4015_v51, 6  ;;  %v8407_v1 = vmax.f32 %v3387_v44, 0.0  ;;  %v4139_v34 = vrot.slane %v4015_v51, 7 }
 0x38e   : > { %v4181_v15 = vsel %vm4177_vm6, %v4172_v30, %v4091_v39  ;;  %v3782_v58 = vadd.f32 %v3766_v61, %v3748_v28  ;;  %v3906_v56 = vadd.f32 %v3890_v63, %v3863_v47  ;;  %v3592_v62 = vrot.slane %v8383_v7, 1 }
 0x38f   : > { %v4190_v14 = vsel %vm4186_vm7, %v4181_v15, %v4107_v33  ;;  %v3484_v29 = vrot.slane %v8407_v1, 7  ;;  %v3593_v17 = vrot.slane %v8407_v1, 1  ;;  %v3848_v52 = vmul.f32 %v8292_v40, %v3833_v22 }
 0x390   : > { %v4199_v0 = vsel %vm4195_vm8, %v4190_v14, %v4123_v42  ;;  %v3924_v12 = vmul.f32 %v8342_v5, %v8383_v7  ;;  %v3925_v32 = vmul.f32 %v8342_v5, %v8407_v1  ;;  %v3525_v14 = vmul.f32 %v8185_v31, %v8393_v2 }
 0x391   : > { %v4207_v9 = vsel %vm1015_vm3, %v4199_v0, %v4139_v34  ;;  %v3485_v38 = vsel %vm556_vm1, %v3483_v21, %v3484_v29  ;;  %v3594_v20 = vsel %vm1015_vm3, %v3592_v62, %v3593_v17  ;;  %v3864_v45 = vadd.f32 %v3848_v52, %v3782_v58  ;;  %v4549_v34 = vld [vmem:[%s8940_s13 + $0x58] sm:$0xff] }
 0x392   : > { %5048 = vmatmul.msk.f32.gmra.mxu2 %vm4224_vm9, %v4207_v9  ;;  %v3940_v11 = vadd.f32 %v3924_v12, %v3906_v56  ;;  %v3891_v23 = vmul.f32 %v8320_v55, %v3485_v38  ;;  %v3964_v16 = vmul.f32 %v8363_v43, %v3594_v20  ;;  %v3619_v6 = vsel %vm1015_vm3, %v3593_v17, 0.0  ;;  %4562 = vmatpush.msrb.mxu3 %v4549_v34  ;;  %v8500_v34 = vld [vmem:[%s8937_s10] ss:$0 sm:$0xff] }
 0x393   : > { %v3965_v46 = vmul.f32 %v8363_v43, %v3619_v6  ;;  %v3558_v29 = vmul.f32 %v8128_v60, %v8383_v7  ;;  %v3526_v17 = vmul.f32 %v8185_v31, %v3485_v38  ;;  %v3634_v52 = vmul.f32 %v8220_v19, %v3594_v20 }
 0x394   : > { %v3907_v8 = vadd.f32 %v3891_v23, %v3864_v45  ;;  %v3980_v48 = vadd.f32 %v3964_v16, %v3940_v11  ;;  %v3559_v45 = vmul.f32 %v8128_v60, %v8407_v1  ;;  %v3635_v20 = vmul.f32 %v8220_v19, %v3619_v6 }
 0x395   : > { %v3574_v9 = vadd.f32 %v3558_v29, %v3525_v14 }
 0x396   : > { %v3941_v21 = vadd.f32 %v3925_v32, %v3907_v8  ;;  %v4000_v51 = vadd.f32 %v8376_v57, %v3980_v48  ;;  %v3575_v32 = vadd.f32 %v3559_v45, %v3526_v17 }
 0x397   : > { %v3650_v48 = vadd.f32 %v3634_v52, %v3574_v9 }
 0x398   : > { %v3981_v49 = vadd.f32 %v3965_v46, %v3941_v21  ;;  %v4016_v59 = vmax.f32 %v4000_v51, 0.0  ;;  %v3389_v37 = vpop.f32.mrf.mxu1 }
 0x399   : > { %v3390_v33 = vadd.f32 %v8157_v24, %v3389_v37 }
 0x39a   : > { %v4001_v13 = vadd.f32 %v8376_v57, %v3981_v49  ;;  %v4036_v3 = vrot.slane %v4016_v59, 1  ;;  %v4052_v4 = vrot.slane %v4016_v59, 2  ;;  %v4068_v54 = vrot.slane %v4016_v59, 3 }
 0x39b   : > { %v3445_v42 = vmax.f32 %v3390_v33, 0.0  ;;  %v3651_v49 = vadd.f32 %v3635_v20, %v3575_v32  ;;  %v8520_v32 = vld [vmem:[%s8938_s11 + $0x1] ss:$0 sm:$0xff] }
 0x39c   : > { %v4017_v50 = vmax.f32 %v4001_v13, 0.0  ;;  %v4156_v39 = vsel %vm556_vm1, %v4016_v59, %v4036_v3 }
 0x39d   : > { %v4165_v63 = vsel %vm4160_vm5, %v4156_v39, %v4052_v4  ;;  %v3687_v58 = vrot.slane %v3445_v42, 7  ;;  %v3804_v16 = vrot.slane %v3445_v42, 1  ;;  %v3767_v46 = vmul.f32 %v8259_v26, %v3445_v42 }
 0x39e   : > { %v4092_v35 = vrot.slane %v4017_v50, 4  ;;  %v4108_v28 = vrot.slane %v4017_v50, 5  ;;  %v4173_v10 = vsel %vm702_vm0, %v4165_v63, %v4068_v54  ;;  %v4124_v25 = vrot.slane %v4017_v50, 6 }
 0x39f   : > { %v4140_v44 = vrot.slane %v4017_v50, 7  ;;  %v3717_v62 = vsel %vm556_vm1, 0.0, %v3687_v58 }
 0x3a0   : > { %v4182_v53 = vsel %vm4177_vm6, %v4173_v10, %v4092_v35  ;;  %v3733_v11 = vmul.f32 %v8243_v18, %v3717_v62 }
 0x3a1   : > { %v4191_v61 = vsel %vm4186_vm7, %v4182_v53, %v4108_v28 }
 0x3a2   : > { %v4200_v30 = vsel %vm4195_vm8, %v4191_v61, %v4124_v25  ;;  %v3749_v36 = vadd.f32 %v3733_v11, %v3650_v48  ;;  %v4548_v61 = vld [vmem:[%s8940_s13 + $0x50] sm:$0xff] }
 0x3a3   : > { %v4208_v22 = vsel %vm1015_vm3, %v4200_v30, %v4140_v44  ;;  %4563 = vmatpush.msrb.mxu3 %v4548_v61  ;;  %v8549_v61 = vld [vmem:[%s8938_s11 + $0x4] ss:$0 sm:$0xff] }
 0x3a4   : > { %5049 = vmatmul.msk.f32.gmra.mxu2 %vm4224_vm9, %v4208_v22  ;;  %v3783_v59 = vadd.f32 %v3767_v46, %v3749_v36 }
 0x3a9   : > { %v3392_v47 = vpop.f32.mrf.mxu1 }
 0x3aa   : > { %v3393_v15 = vadd.f32 %v8157_v24, %v3392_v47 }
 0x3ab   : > { %v4266_v29 = vpop.f32.mrf.mxu2 }
 0x3ac   : > { %v3446_v56 = vmax.f32 %v3393_v15, 0.0  ;;  %v4267_v9 = vadd.f32 %v8500_v34, %v4266_v29  ;;  %v4544_v29 = vld [vmem:[%s8940_s13 + $0x30] sm:$0xff] }
 0x3ae   : > { %v3688_v0 = vrot.slane %v3446_v56, 7  ;;  %v3805_v12 = vrot.slane %v3446_v56, 1  ;;  %v3768_v4 = vmul.f32 %v8259_v26, %v3446_v56  ;;  %v8522_v20 = vmax.f32 %v4267_v9, 0.0 }
 0x3b0   : > { %v3689_v2 = vsel %vm556_vm1, %v3687_v58, %v3688_v0  ;;  %v3806_v7 = vsel %vm1015_vm3, %v3804_v16, %v3805_v12  ;;  %v3834_v54 = vsel %vm1015_vm3, %v3805_v12, 0.0  ;;  %v4547_v16 = vld [vmem:[%s8940_s13 + $0x48] sm:$0xff] }
 0x3b1   : > { %v3734_v21 = vmul.f32 %v8243_v18, %v3689_v2  ;;  %v3849_v51 = vmul.f32 %v8292_v40, %v3806_v7  ;;  %v3850_v53 = vmul.f32 %v8292_v40, %v3834_v54  ;;  %4564 = vmatpush.msrb.mxu3 %v4547_v16  ;;  %v4542_v16 = vld [vmem:[%s8940_s13 + $0x20] sm:$0xff] }
 0x3b3   : > { %v3750_v50 = vadd.f32 %v3734_v21, %v3651_v49  ;;  %v3865_v35 = vadd.f32 %v3849_v51, %v3783_v59 }
 0x3b5   : > { %v3395_v23 = vpop.f32.mrf.mxu1  ;;  %v3784_v39 = vadd.f32 %v3768_v4, %v3750_v50  ;;  %v4346_v50 = vmul.f32 0.0, %v8520_v32 }
 0x3b6   : > { %v3396_v8 = vadd.f32 %v8157_v24, %v3395_v23 }
 0x3b7   : > { %v3866_v22 = vadd.f32 %v3850_v53, %v3784_v39 }
 0x3b8   : > { %v8458_v38 = vmax.f32 %v3396_v8, 0.0  ;;  %v8515_v8 = vld [vmem:[%s8938_s11] ss:$0 sm:$0xff] }
 0x3b9   : > { %v4328_v59 = vmul.f32 %v8515_v8, %v9344_v41 }
 0x3ba   : > { %v3486_v1 = vrot.slane %v8458_v38, 7  ;;  %v3595_v10 = vrot.slane %v8458_v38, 1  ;;  %v3926_v44 = vmul.f32 %v8342_v5, %v8458_v38 }
 0x3bb   : > { %v4354_v53 = vadd.f32 %v4346_v50, %v4328_v59 }
 0x3bc   : > { %v8466_v13 = vsel %vm556_vm1, 0.0, %v3486_v1 }
 0x3bd   : > { %v3892_v37 = vmul.f32 %v8320_v55, %v8466_v13  ;;  %v3398_v3 = vpop.f32.mrf.mxu1  ;;  %v3527_v9 = vmul.f32 %v8185_v31, %v8466_v13 }
 0x3be   : > { %v3399_v6 = vadd.f32 %v8157_v24, %v3398_v3 }
 0x3bf   : > { %v3908_v63 = vadd.f32 %v3892_v37, %v3865_v35  ;;  %v8532_v37 = vld [vmem:[%s8938_s11 + $0x2] ss:$0 sm:$0xff] }
 0x3c0   : > { %v8473_v28 = vmax.f32 %v3399_v6, 0.0  ;;  %v4305_v6 = vrot.slane %v8522_v20, 7 }
 0x3c1   : > { %v3942_v42 = vadd.f32 %v3926_v44, %v3908_v63  ;;  %v4385_v44 = vmul.f32 %v8532_v37, %v9347_v27 }
 0x3c2   : > { %v3487_v33 = vrot.slane %v8473_v28, 7  ;;  %v3596_v25 = vrot.slane %v8473_v28, 1  ;;  %v3927_v62 = vmul.f32 %v8342_v5, %v8473_v28 }
 0x3c4   : > { %v8485_v47 = vsel %vm556_vm1, %v3486_v1, %v3487_v33  ;;  %v8488_v30 = vsel %vm1015_vm3, %v3595_v10, %v3596_v25  ;;  %v8495_v56 = vsel %vm1015_vm3, %v3596_v25, 0.0  ;;  %v4546_v25 = vld [vmem:[%s8940_s13 + $0x40] sm:$0xff] }
 0x3c5   : > { %v3893_v15 = vmul.f32 %v8320_v55, %v8485_v47  ;;  %v3966_v58 = vmul.f32 %v8363_v43, %v8488_v30  ;;  %v3967_v52 = vmul.f32 %v8363_v43, %v8495_v56  ;;  %4565 = vmatpush.msrb.mxu3 %v4546_v25  ;;  %v3636_v13 = vmul.f32 %v8220_v19, %v8488_v30  ;;  %v4540_v30 = vld [vmem:[%s8940_s13 + $0x10] sm:$0xff] }
 0x3c7   : > { %v3909_v14 = vadd.f32 %v3893_v15, %v3866_v22  ;;  %v3982_v0 = vadd.f32 %v3966_v58, %v3942_v42  ;;  %v8554_v15 = vsel %vm556_vm1, 0.0, %v4305_v6 }
 0x3c9   : > { %v3943_v17 = vadd.f32 %v3927_v62, %v3909_v14  ;;  %v4002_v12 = vadd.f32 %v8376_v57, %v3982_v0  ;;  %v3401_v23 = vpop.f32.mrf.mxu1  ;;  %v4545_v14 = vld [vmem:[%s8940_s13 + $0x38] sm:$0xff] }
 0x3ca   : > { %v3402_v21 = vadd.f32 %v8157_v24, %v3401_v23  ;;  %4566 = vmatpush.msrb.mxu3 %v4545_v14 }
 0x3cb   : > { %v3983_v45 = vadd.f32 %v3967_v52, %v3943_v17  ;;  %v4018_v11 = vmax.f32 %v4002_v12, 0.0  ;;  %v4393_v17 = vadd.f32 %v4385_v44, %v4354_v53  ;;  %v4408_v52 = vmul.f32 %v8549_v61, %v8554_v15  ;;  %v4543_v12 = vld [vmem:[%s8940_s13 + $0x28] sm:$0xff] }
 0x3cc   : > { %v8537_v35 = vmax.f32 %v3402_v21, 0.0  ;;  %4567 = vmatpush.msrb.mxu3 %v4544_v29 }
 0x3cd   : > { %v4003_v2 = vadd.f32 %v8376_v57, %v3983_v45  ;;  %v4037_v48 = vrot.slane %v4018_v11, 1  ;;  %v4053_v7 = vrot.slane %v4018_v11, 2  ;;  %v4069_v46 = vrot.slane %v4018_v11, 3 }
 0x3ce   : > { %v3690_v62 = vrot.slane %v8537_v35, 7  ;;  %v4362_v45 = vrot.slane %v8522_v20, 1  ;;  %4568 = vmatpush.msrb.mxu3 %v4543_v12  ;;  %v4416_v21 = vadd.f32 %v4408_v52, %v4393_v17  ;;  %v8641_v52 = vld [vmem:[%s8938_s11 + $0x9] ss:$0 sm:$0xff]  ;;  %v3769_v12 = vmul.f32 %v8259_v26, %v8537_v35 }
 0x3cf   : > { %v4019_v36 = vmax.f32 %v4003_v2, 0.0  ;;  %v4157_v1 = vsel %vm556_vm1, %v4018_v11, %v4037_v48  ;;  %v8578_v11 = vld [vmem:[%s8938_s11 + $0x5] ss:$0 sm:$0xff]  ;;  %v3560_v2 = vmul.f32 %v8128_v60, %v8458_v38 }
 0x3d0   : > { %v4166_v3 = vsel %vm4160_vm5, %v4157_v1, %v4053_v7  ;;  %v3718_v23 = vsel %vm556_vm1, 0.0, %v3690_v62  ;;  %v3528_v1 = vmul.f32 %v8185_v31, %v8485_v47  ;;  %4569 = vmatpush.msrb.mxu3 %v4542_v16  ;;  %v8601_v59 = vsel %vm1015_vm3, %v4362_v45, 0.0  ;;  %v8608_v47 = vld [vmem:[%s8938_s11 + $0x6] ss:$0 sm:$0xff] }
 0x3d1   : > { %v4093_v49 = vrot.slane %v4019_v36, 4  ;;  %v4109_v51 = vrot.slane %v4019_v36, 5  ;;  %v4174_v4 = vsel %vm702_vm0, %v4166_v3, %v4069_v46  ;;  %v4125_v54 = vrot.slane %v4019_v36, 6 }
 0x3d2   : > { %v4141_v10 = vrot.slane %v4019_v36, 7  ;;  %v4541_v36 = vld [vmem:[%s8940_s13 + $0x18] sm:$0xff]  ;;  %v3735_v38 = vmul.f32 %v8243_v18, %v3718_v23  ;;  %v4426_v50 = vmul.f32 %v8578_v11, %v8522_v20  ;;  %v3561_v3 = vmul.f32 %v8128_v60, %v8473_v28  ;;  %v8624_v60 = vld [vmem:[%s8938_s11 + $0x8] ss:$0 sm:$0xff] }
 0x3d3   : > { %v4183_v39 = vsel %vm4177_vm6, %v4174_v4, %v4093_v49  ;;  %v3576_v49 = vadd.f32 %v3560_v2, %v3527_v9  ;;  %4570 = vmatpush.msrb.mxu3 %v4541_v36  ;;  %v4447_v14 = vmul.f32 %v8608_v47, %v8601_v59 }
 0x3d4   : > { %v4192_v33 = vsel %vm4186_vm7, %v4183_v39, %v4109_v51  ;;  %v3807_v39 = vrot.slane %v8537_v35, 1  ;;  %v4434_v25 = vadd.f32 %v4426_v50, %v4416_v21  ;;  %v3577_v53 = vadd.f32 %v3561_v3, %v3528_v1 }
 0x3d5   : > { %v4201_v42 = vsel %vm4195_vm8, %v4192_v33, %v4125_v54  ;;  %v3652_v54 = vadd.f32 %v3636_v13, %v3576_v49  ;;  %v4539_v33 = vld [vmem:[%s8940_s13 + $0x8] sm:$0xff]  ;;  %4571 = vmatpush.msrb.mxu3 %v4540_v30 }
 0x3d6   : > { %v3404_v63 = vpop.f32.mrf.mxu1  ;;  %v4209_v58 = vsel %vm1015_vm3, %v4201_v42, %v4141_v10  ;;  %v4455_v45 = vadd.f32 %v4447_v14, %v4434_v25  ;;  %v8655_v13 = vld [vmem:[%s8938_s11 + $0xa] ss:$0 sm:$0xff] }
 0x3d7   : > { %v3405_v22 = vadd.f32 %v8157_v24, %v3404_v63  ;;  %5050 = vmatmul.msk.f32.gmra.mxu2 %vm4224_vm9, %v4209_v58  ;;  %v3751_v28 = vadd.f32 %v3735_v38, %v3652_v54  ;;  %4572 = vmatpush.msrb.mxu3 %v4539_v33  ;;  %v8672_v54 = vld [vmem:[%s8939_s12] ss:$0 sm:$0xff] }
 0x3d9   : > { %v8562_v0 = vmax.f32 %v3405_v22, 0.0  ;;  %v3785_v35 = vadd.f32 %v3769_v12, %v3751_v28 }
 0x3db   : > { %v3691_v48 = vrot.slane %v8562_v0, 7  ;;  %v3808_v51 = vrot.slane %v8562_v0, 1  ;;  %v3770_v30 = vmul.f32 %v8259_v26, %v8562_v0 }
 0x3dd   : > { %v3692_v63 = vsel %vm556_vm1, %v3690_v62, %v3691_v48  ;;  %v3809_v22 = vsel %vm1015_vm3, %v3807_v39, %v3808_v51  ;;  %v3637_v62 = vmul.f32 %v8220_v19, %v8495_v56  ;;  %v4538_v56 = vld [vmem:[%s8940_s13] sm:$0xff]  ;;  %v3835_v39 = vsel %vm1015_vm3, %v3808_v51, 0.0 }
 0x3de   : > { %v3736_v29 = vmul.f32 %v8243_v18, %v3692_v63  ;;  %v3851_v16 = vmul.f32 %v8292_v40, %v3809_v22  ;;  %4573 = vmatpush.msrb.mxu3 %v4538_v56  ;;  %v3852_v28 = vmul.f32 %v8292_v40, %v3835_v39  ;;  %v4386_v39 = vmul.f32 %v8532_v37, %v8601_v59  ;;  %v5202_v59 = vld [vmem:[%s8934_s7 + $0x1] ss:$0 sm:$0xff] }
 0x3df   : > { %v4269_v7 = vpop.f32.mrf.mxu2  ;;  %v3653_v23 = vadd.f32 %v3637_v62, %v3577_v53 }
 0x3e0   : > { %v4270_v46 = vadd.f32 %v8500_v34, %v4269_v7  ;;  %v3867_v50 = vadd.f32 %v3851_v16, %v3785_v35 }
 0x3e1   : > { %v3407_v6 = vpop.f32.mrf.mxu1  ;;  %v3752_v36 = vadd.f32 %v3736_v29, %v3653_v23 }
 0x3e2   : > { %v8612_v4 = vmax.f32 %v4270_v46, 0.0  ;;  %v3408_v10 = vadd.f32 %v8157_v24, %v3407_v6 }
 0x3e4   : > { %v4306_v44 = vrot.slane %v8612_v4, 7  ;;  %v8627_v42 = vmax.f32 %v3408_v10, 0.0  ;;  %v4363_v58 = vrot.slane %v8612_v4, 1  ;;  %v4484_v46 = vmul.f32 %v8641_v52, %v8612_v4 }
 0x3e5   : > { %v3786_v10 = vadd.f32 %v3770_v30, %v3752_v36 }
 0x3e6   : > { %v8636_v17 = vsel %vm556_vm1, 0.0, %v4306_v44  ;;  %v3489_v9 = vrot.slane %v8627_v42, 7  ;;  %v8659_v7 = vsel %vm1015_vm3, %v4363_v58, 0.0  ;;  %v3598_v53 = vrot.slane %v8627_v42, 1 }
 0x3e7   : > { %v4466_v2 = vmul.f32 %v8624_v60, %v8636_v17  ;;  %v4502_v6 = vmul.f32 %v8655_v13, %v8659_v7  ;;  %v3928_v22 = vmul.f32 %v8342_v5, %v8627_v42  ;;  %v3868_v51 = vadd.f32 %v3852_v28, %v3786_v10 }
 0x3e8   : > { %v3512_v48 = vsel %vm556_vm1, 0.0, %v3489_v9 }
 0x3e9   : > { %v3894_v21 = vmul.f32 %v8320_v55, %v3512_v48  ;;  %v4474_v1 = vadd.f32 %v4466_v2, %v4455_v45 }
 0x3ea   : > { %v3410_v49 = vpop.f32.mrf.mxu1 }
 0x3eb   : > { %v3411_v38 = vadd.f32 %v8157_v24, %v3410_v49  ;;  %v4492_v3 = vadd.f32 %v4484_v46, %v4474_v1  ;;  %v3910_v33 = vadd.f32 %v3894_v21, %v3867_v50 }
 0x3ed   : > { %v3452_v63 = vmax.f32 %v3411_v38, 0.0  ;;  %v4510_v25 = vadd.f32 %v4502_v6, %v4492_v3  ;;  %v3944_v29 = vadd.f32 %v3928_v22, %v3910_v33  ;;  %v4347_v38 = vmul.f32 %v8520_v32, %v8522_v20 }
 0x3ef   : > { %v3490_v44 = vrot.slane %v3452_v63, 7  ;;  %v3599_v0 = vrot.slane %v3452_v63, 1  ;;  %v4522_v58 = vadd.f32 %v8672_v54, %v4510_v25  ;;  %v3929_v36 = vmul.f32 %v8342_v5, %v3452_v63 }
 0x3f1   : > { %v3491_v14 = vsel %vm556_vm1, %v3489_v9, %v3490_v44  ;;  %v3600_v62 = vsel %vm1015_vm3, %v3598_v53, %v3599_v0  ;;  %v8685_v23 = vsel %vm1015_vm3, %v3599_v0, 0.0  ;;  %v4530_v2 = vmax.f32 %v4522_v58, 0.0 }
 0x3f2   : > { %v3895_v12 = vmul.f32 %v8320_v55, %v3491_v14  ;;  %v3968_v56 = vmul.f32 %v8363_v43, %v3600_v62  ;;  %v3413_v45 = vpop.f32.mrf.mxu1  ;;  %v4329_v9 = vmul.f32 %v8515_v8, %v8554_v15  ;;  %v3969_v46 = vmul.f32 %v8363_v43, %v8685_v23 }
 0x3f3   : > { %v3414_v16 = vadd.f32 %v8157_v24, %v3413_v45  ;;  %4574 = vmatmul.f32.vlgmr.msrb.gmra.mxu3 %v4530_v2  ;;  %v3529_v53 = vmul.f32 %v8185_v31, %v3512_v48  ;;  %v4409_v44 = vmul.f32 %v8549_v61, %v8636_v17  ;;  %v4427_v48 = vmul.f32 %v8578_v11, %v8612_v4 }
 0x3f4   : > { %v3911_v35 = vadd.f32 %v3895_v12, %v3868_v51  ;;  %v3984_v21 = vadd.f32 %v3968_v56, %v3944_v29  ;;  %v4355_v6 = vadd.f32 %v4347_v38, %v4329_v9  ;;  %v3562_v51 = vmul.f32 %v5202_v59, %v8627_v42 }
 0x3f5   : > { %v3453_v30 = vmax.f32 %v3414_v16, 0.0  ;;  %v3530_v9 = vmul.f32 %v8185_v31, %v3491_v14  ;;  %v5203_v14 = vld [vmem:[%s8933_s6] ss:$0 sm:$0xff] }
 0x3f6   : > { %v3945_v1 = vadd.f32 %v3929_v36, %v3911_v35  ;;  %v4004_v49 = vadd.f32 %v8376_v57, %v3984_v21  ;;  %v4394_v58 = vadd.f32 %v4386_v39, %v4355_v6 }
 0x3f7   : > { %v3693_v0 = vrot.slane %v3453_v30, 7  ;;  %v3810_v39 = vrot.slane %v3453_v30, 1 }
 0x3f8   : > { %v3985_v50 = vadd.f32 %v3969_v46, %v3945_v1  ;;  %v4020_v3 = vmax.f32 %v4004_v49, 0.0  ;;  %v4417_v21 = vadd.f32 %v4409_v44, %v4394_v58  ;;  %v3638_v1 = vmul.f32 %v8220_v19, %v3600_v62 }
 0x3f9   : > { %v3719_v2 = vsel %vm556_vm1, 0.0, %v3693_v0  ;;  %v3563_v49 = vmul.f32 %v5202_v59, %v3452_v63  ;;  %v3639_v59 = vmul.f32 %v8220_v19, %v8685_v23 }
 0x3fa   : > { %v4005_v10 = vadd.f32 %v8376_v57, %v3985_v50  ;;  %v3416_v15 = vpop.f32.mrf.mxu1  ;;  %v4038_v33 = vrot.slane %v4020_v3, 1  ;;  %v4054_v25 = vrot.slane %v4020_v3, 2  ;;  %v4070_v56 = vrot.slane %v4020_v3, 3 }
 0x3fb   : > { %v3417_v20 = vadd.f32 %v8157_v24, %v3416_v15  ;;  %v3578_v24 = vadd.f32 %v3562_v51, %v3529_v53  ;;  %v3737_v6 = vmul.f32 %v8243_v18, %v3719_v2  ;;  %v3579_v53 = vadd.f32 %v3563_v49, %v3530_v9 }
 0x3fc   : > { %v4021_v28 = vmax.f32 %v4005_v10, 0.0  ;;  %v4158_v22 = vsel %vm556_vm1, %v4020_v3, %v4038_v33  ;;  %v4435_v58 = vadd.f32 %v4427_v48, %v4417_v21  ;;  %v3771_v2 = vmul.f32 %v8259_v26, %v3453_v30 }
 0x3fd   : > { %v3454_v29 = vmax.f32 %v3417_v20, 0.0  ;;  %v4167_v12 = vsel %vm4160_vm5, %v4158_v22, %v4054_v25  ;;  %v3654_v44 = vadd.f32 %v3638_v1, %v3578_v24  ;;  %v4448_v24 = vmul.f32 %v8608_v47, %v8659_v7 }
 0x3fe   : > { %v4094_v45 = vrot.slane %v4021_v28, 4  ;;  %v4110_v16 = vrot.slane %v4021_v28, 5  ;;  %v4272_v36 = vpop.f32.mrf.mxu2  ;;  %v4175_v42 = vsel %vm702_vm0, %v4167_v12, %v4070_v56  ;;  %v4126_v50 = vrot.slane %v4021_v28, 6 }
 0x3ff   : > { %v3694_v35 = vrot.slane %v3454_v29, 7  ;;  %v4273_v46 = vadd.f32 %v8500_v34, %v4272_v36  ;;  %v3811_v38 = vrot.slane %v3454_v29, 1  ;;  %v4142_v15 = vrot.slane %v4021_v28, 7 }
 0x400   : > { %v4184_v3 = vsel %vm4177_vm6, %v4175_v42, %v4094_v45  ;;  %v3753_v51 = vadd.f32 %v3737_v6, %v3654_v44  ;;  %v4456_v19 = vadd.f32 %v4448_v24, %v4435_v58 }
 0x401   : > { %v4193_v33 = vsel %vm4186_vm7, %v4184_v3, %v4110_v16  ;;  %v3695_v31 = vsel %vm556_vm1, %v3693_v0, %v3694_v35  ;;  %v8724_v25 = vmax.f32 %v4273_v46, 0.0  ;;  %v3812_v22 = vsel %vm1015_vm3, %v3810_v39, %v3811_v38 }
 0x402   : > { %v3419_v10 = vpop.f32.mrf.mxu1  ;;  %v4202_v63 = vsel %vm4195_vm8, %v4193_v33, %v4126_v50  ;;  %v3738_v12 = vmul.f32 %v8243_v18, %v3695_v31  ;;  %v3655_v35 = vadd.f32 %v3639_v59, %v3579_v53  ;;  %v3853_v48 = vmul.f32 %v8292_v40, %v3812_v22 }
 0x403   : > { %v3420_v62 = vadd.f32 %v5203_v14, %v3419_v10  ;;  %v4210_v20 = vsel %vm1015_vm3, %v4202_v63, %v4142_v15  ;;  %v4307_v0 = vrot.slane %v8724_v25, 7  ;;  %v4364_v56 = vrot.slane %v8724_v25, 1 }
 0x404   : > { %5051 = vmatmul.msk.f32.gmra.mxu2 %vm4224_vm9, %v4210_v20  ;;  %v3787_v23 = vadd.f32 %v3771_v2, %v3753_v51  ;;  %v3754_v21 = vadd.f32 %v3738_v12, %v3655_v35  ;;  %v4485_v30 = vmul.f32 %v8641_v52, %v8724_v25  ;;  %v3772_v50 = vmul.f32 %v8259_v26, %v3454_v29 }
 0x405   : > { %v3455_v28 = vmax.f32 %v3420_v62, 0.0  ;;  %v8735_v16 = vsel %vm556_vm1, 0.0, %v4307_v0  ;;  %v8746_v42 = vsel %vm1015_vm3, %v4364_v56, 0.0  ;;  %v3836_v6 = vsel %vm1015_vm3, %v3811_v38, 0.0 }
 0x406   : > { %v4467_v18 = vmul.f32 %v8624_v60, %v8735_v16  ;;  %v3869_v3 = vadd.f32 %v3853_v48, %v3787_v23  ;;  %v4503_v15 = vmul.f32 %v8655_v13, %v8746_v42  ;;  %v4330_v33 = vmul.f32 %v8515_v8, %v8636_v17 }
 0x407   : > { %v3873_v45 = vrot.slane %v3455_v28, 7  ;;  %v3788_v31 = vadd.f32 %v3772_v50, %v3754_v21  ;;  %v3854_v20 = vmul.f32 %v8292_v40, %v3836_v6  ;;  %v3930_v26 = vmul.f32 %v8342_v5, %v3455_v28 }
 0x408   : > { %v4475_v49 = vadd.f32 %v4467_v18, %v4456_v19  ;;  %v4348_v29 = vmul.f32 %v8520_v32, %v8612_v4  ;;  %v4410_v2 = vmul.f32 %v8549_v61, %v8735_v16 }
 0x409   : > { %v3878_v36 = vsel %vm556_vm1, 0.0, %v3873_v45  ;;  %v3870_v17 = vadd.f32 %v3854_v20, %v3788_v31 }
 0x40a   : > { %v3896_v9 = vmul.f32 %v8320_v55, %v3878_v36  ;;  %v3422_v1 = vpop.f32.mrf.mxu1  ;;  %v4493_v10 = vadd.f32 %v4485_v30, %v4475_v49  ;;  %v4356_v12 = vadd.f32 %v4348_v29, %v4330_v33 }
 0x40b   : > { %v3423_v46 = vadd.f32 %v5203_v14, %v3422_v1  ;;  %v3948_v14 = vrot.slane %v3455_v28, 1 }
 0x40c   : > { %v3912_v62 = vadd.f32 %v3896_v9, %v3869_v3  ;;  %v4511_v44 = vadd.f32 %v4503_v15, %v4493_v10 }
 0x40d   : > { %v3456_v39 = vmax.f32 %v3423_v46, 0.0  ;;  %v4428_v46 = vmul.f32 %v8578_v11, %v8724_v25 }
 0x40e   : > { %v4523_v0 = vadd.f32 %v8672_v54, %v4511_v44  ;;  %v3946_v58 = vadd.f32 %v3930_v26, %v3912_v62 }
 0x40f   : > { %v3874_v63 = vrot.slane %v3456_v39, 7  ;;  %v3949_v53 = vrot.slane %v3456_v39, 1  ;;  %v3931_v24 = vmul.f32 %v8342_v5, %v3456_v39 }
 0x410   : > { %v4531_v56 = vmax.f32 %v4523_v0, 0.0 }
 0x411   : > { %v3875_v38 = vsel %vm556_vm1, %v3873_v45, %v3874_v63  ;;  %v3950_v22 = vsel %vm1015_vm3, %v3948_v14, %v3949_v53  ;;  %v3953_v40 = vsel %vm1015_vm3, %v3949_v53, 0.0  ;;  %v4387_v45 = vmul.f32 %v8532_v37, %v8659_v7 }
 0x412   : > { %v3897_v59 = vmul.f32 %v8320_v55, %v3875_v38  ;;  %v3970_v51 = vmul.f32 %v8363_v43, %v3950_v22  ;;  %4577 = vmatmul.f32.gmra.mxu3 %v4531_v56  ;;  %v3971_v55 = vmul.f32 %v8363_v43, %v3953_v40  ;;  %v4349_v40 = vmul.f32 %v8520_v32, %v8724_v25 }
 0x413   : > { %v4395_v36 = vadd.f32 %v4387_v45, %v4356_v12 }
 0x414   : > { %v3913_v28 = vadd.f32 %v3897_v59, %v3870_v17  ;;  %v3986_v4 = vadd.f32 %v3970_v51, %v3946_v58  ;;  %v4331_v51 = vmul.f32 %v8515_v8, %v8735_v16 }
 0x415   : > { %v4275_v19 = vpop.f32.mrf.mxu2  ;;  %v4418_v5 = vadd.f32 %v4410_v2, %v4395_v36 }
 0x416   : > { %v3947_v35 = vadd.f32 %v3931_v24, %v3913_v28  ;;  %v4006_v48 = vadd.f32 %v8376_v57, %v3986_v4  ;;  %v4276_v21 = vadd.f32 %v8500_v34, %v4275_v19  ;;  %v4357_v28 = vadd.f32 %v4349_v40, %v4331_v51 }
 0x417   : > { %v4436_v39 = vadd.f32 %v4428_v46, %v4418_v5  ;;  %v4388_v4 = vmul.f32 %v8532_v37, %v8746_v42 }
 0x418   : > { %v3987_v18 = vadd.f32 %v3971_v55, %v3947_v35  ;;  %v4022_v23 = vmax.f32 %v4006_v48, 0.0  ;;  %v8777_v49 = vmax.f32 %v4276_v21, 0.0 }
 0x419   : > { %v4396_v2 = vadd.f32 %v4388_v4, %v4357_v28 }
 0x41a   : > { %v4007_v9 = vadd.f32 %v8376_v57, %v3987_v18  ;;  %v4039_v1 = vrot.slane %v4022_v23, 1  ;;  %v4055_v7 = vrot.slane %v4022_v23, 2  ;;  %v4071_v50 = vrot.slane %v4022_v23, 3 }
 0x41b   : > { %v4308_v6 = vrot.slane %v8777_v49, 7  ;;  %v4449_v57 = vmul.f32 %v8608_v47, %v8746_v42  ;;  %v4365_v62 = vrot.slane %v8777_v49, 1  ;;  %v4486_v17 = vmul.f32 %v8641_v52, %v8777_v49 }
 0x41c   : > { %v4023_v30 = vmax.f32 %v4007_v9, 0.0  ;;  %v4159_v43 = vsel %vm556_vm1, %v4022_v23, %v4039_v1  ;;  %v4429_v16 = vmul.f32 %v8578_v11, %v8777_v49 }
 0x41d   : > { %v4168_v3 = vsel %vm4160_vm5, %v4159_v43, %v4055_v7  ;;  %v4322_v31 = vsel %vm556_vm1, 0.0, %v4308_v6  ;;  %v4457_v26 = vadd.f32 %v4449_v57, %v4436_v39  ;;  %v4379_v38 = vsel %vm1015_vm3, %v4365_v62, 0.0 }
 0x41e   : > { %v4095_v10 = vrot.slane %v4023_v30, 4  ;;  %v4111_v15 = vrot.slane %v4023_v30, 5  ;;  %v4176_v33 = vsel %vm702_vm0, %v4168_v3, %v4071_v50  ;;  %v4127_v14 = vrot.slane %v4023_v30, 6 }
 0x41f   : > { %v4468_v53 = vmul.f32 %v8624_v60, %v4322_v31  ;;  %v4143_v44 = vrot.slane %v4023_v30, 7  ;;  %v4504_v59 = vmul.f32 %v8655_v13, %v4379_v38  ;;  %v4411_v45 = vmul.f32 %v8549_v61, %v4322_v31 }
 0x420   : > { %v4185_v63 = vsel %vm4177_vm6, %v4176_v33, %v4095_v10  ;;  %v4450_v23 = vmul.f32 %v8608_v47, %v4379_v38  ;;  %v4332_v33 = vmul.f32 %v8515_v8, %v4322_v31  ;;  %v4350_v62 = vmul.f32 %v8520_v32, %v8777_v49 }
 0x421   : > { %v4194_v20 = vsel %vm4186_vm7, %v4185_v63, %v4111_v15  ;;  %v4476_v0 = vadd.f32 %v4468_v53, %v4457_v26  ;;  %v4419_v48 = vadd.f32 %v4411_v45, %v4396_v2  ;;  %v4389_v63 = vmul.f32 %v8532_v37, %v4379_v38 }
 0x422   : > { %v4203_v29 = vsel %vm4195_vm8, %v4194_v20, %v4127_v14  ;;  %v4358_v14 = vadd.f32 %v4350_v62, %v4332_v33 }
 0x423   : > { %v4211_v22 = vsel %vm1015_vm3, %v4203_v29, %v4143_v44  ;;  %v4494_v58 = vadd.f32 %v4486_v17, %v4476_v0  ;;  %v4437_v18 = vadd.f32 %v4429_v16, %v4419_v48 }
 0x424   : > { %5052 = vmatmul.msk.f32.gmra.mxu2 %vm4224_vm9, %v4211_v22  ;;  %v4397_v44 = vadd.f32 %v4389_v63, %v4358_v14 }
 0x425   : > { %v4512_v12 = vadd.f32 %v4504_v59, %v4494_v58  ;;  %v4458_v1 = vadd.f32 %v4450_v23, %v4437_v18 }
 0x427   : > { %v4524_v56 = vadd.f32 %v8672_v54, %v4512_v12  ;;  %v4278_v35 = vpop.f32.mrf.mxu2 }
 0x428   : > { %v4279_v55 = vadd.f32 %v8500_v34, %v4278_v35  ;;  %v8836_v35 = vld [vmem:[%s8941_s14] ss:$0 sm:$0xff] }
 0x429   : > { %v4532_v24 = vmax.f32 %v4524_v56, 0.0 }
 0x42a   : > { %v4294_v36 = vmax.f32 %v4279_v55, 0.0 }
 0x42b   : > { %4580 = vmatmul.f32.gmra.mxu3 %v4532_v24 }
 0x42c   : > { %v4309_v25 = vrot.slane %v4294_v36, 7  ;;  %v4366_v19 = vrot.slane %v4294_v36, 1  ;;  %v4351_v5 = vmul.f32 %v8520_v32, %v4294_v36  ;;  %v4487_v50 = vmul.f32 %v8641_v52, %v4294_v36 }
 0x42d   : > { %v4430_v22 = vmul.f32 %v8578_v11, %v4294_v36 }
 0x42e   : > { %v4323_v21 = vsel %vm556_vm1, 0.0, %v4309_v25  ;;  %v4380_v42 = vsel %vm1015_vm3, %v4366_v19, 0.0 }
 0x42f   : > { %v4333_v9 = vmul.f32 %v8515_v8, %v4323_v21  ;;  %v4469_v7 = vmul.f32 %v8624_v60, %v4323_v21  ;;  %v4390_v30 = vmul.f32 %v8532_v37, %v4380_v42  ;;  %v4505_v39 = vmul.f32 %v8655_v13, %v4380_v42 }
 0x430   : > { %v4412_v53 = vmul.f32 %v8549_v61, %v4323_v21  ;;  %v4451_v49 = vmul.f32 %v8608_v47, %v4380_v42 }
 0x431   : > { %v4359_v46 = vadd.f32 %v4351_v5, %v4333_v9  ;;  %v4477_v43 = vadd.f32 %v4469_v7, %v4458_v1 }
 0x432   : > { %v4420_v29 = vadd.f32 %v4412_v53, %v4397_v44 }
 0x433   : > { %v4398_v3 = vadd.f32 %v4390_v30, %v4359_v46  ;;  %v4495_v6 = vadd.f32 %v4487_v50, %v4477_v43 }
 0x434   : > { %v4438_v58 = vadd.f32 %v4430_v22, %v4420_v29 }
 0x435   : > { %v4513_v10 = vadd.f32 %v4505_v39, %v4495_v6 }
 0x436   : > { %v4459_v38 = vadd.f32 %v4451_v49, %v4438_v58 }
 0x437   : > { %v4525_v15 = vadd.f32 %v8672_v54, %v4513_v10 }
 0x439   : > { %v4533_v57 = vmax.f32 %v4525_v15, 0.0 }
 0x43b   : > { %4583 = vmatmul.f32.gmra.mxu3 %v4533_v57 }
 0x45a   : > { %v4281_v20 = vpop.f32.mrf.mxu2 }
 0x45b   : > { %v4282_v26 = vadd.f32 %v8500_v34, %v4281_v20 }
 0x45d   : > { %v4295_v0 = vmax.f32 %v4282_v26, 0.0 }
 0x45f   : > { %v4310_v17 = vrot.slane %v4295_v0, 7  ;;  %v4367_v31 = vrot.slane %v4295_v0, 1  ;;  %v4488_v56 = vmul.f32 %v8641_v52, %v4295_v0  ;;  %v4431_v23 = vmul.f32 %v8578_v11, %v4295_v0 }
 0x460   : > { %v4352_v53 = vmul.f32 %v8520_v32, %v4295_v0 }
 0x461   : > { %v4324_v59 = vsel %vm556_vm1, 0.0, %v4310_v17  ;;  %v4381_v12 = vsel %vm1015_vm3, %v4367_v31, 0.0 }
 0x462   : > { %v4470_v51 = vmul.f32 %v8624_v60, %v4324_v59  ;;  %v4506_v24 = vmul.f32 %v8655_v13, %v4381_v12  ;;  %v4413_v36 = vmul.f32 %v8549_v61, %v4324_v59  ;;  %v4452_v1 = vmul.f32 %v8608_v47, %v4381_v12 }
 0x463   : > { %v4334_v63 = vmul.f32 %v8515_v8, %v4324_v59  ;;  %v4391_v20 = vmul.f32 %v8532_v37, %v4381_v12 }
 0x464   : > { %v4478_v40 = vadd.f32 %v4470_v51, %v4459_v38  ;;  %v4421_v18 = vadd.f32 %v4413_v36, %v4398_v3 }
 0x465   : > { %v4360_v44 = vadd.f32 %v4352_v53, %v4334_v63 }
 0x466   : > { %v4496_v28 = vadd.f32 %v4488_v56, %v4478_v40  ;;  %v4439_v5 = vadd.f32 %v4431_v23, %v4421_v18 }
 0x467   : > { %v4399_v29 = vadd.f32 %v4391_v20, %v4360_v44 }
 0x468   : > { %v4514_v4 = vadd.f32 %v4506_v24, %v4496_v28  ;;  %v4460_v46 = vadd.f32 %v4452_v1, %v4439_v5  ;;  %v4491_v5 = vmul.f32 0.0, %v8641_v52 }
 0x46a   : > { %v4526_v45 = vadd.f32 %v8672_v54, %v4514_v4 }
 0x46c   : > { %v4534_v2 = vmax.f32 %v4526_v45, 0.0 }
 0x46e   : > { %4586 = vmatmul.f32.gmra.mxu3 %v4534_v2 }
 0x476   : > { %v4575_v55 = vpop.f32.mrf.mxu3 }
 0x477   : > { %v4576_v48 = vadd.f32 %v8836_v35, %v4575_v55 }
 0x479   : > { %v4599_v16 = vmax.f32 %v4576_v48, 0.0 }
 0x47b   : > { %4607 = vst [vmem:[%s8841_s0] sm:$0xff] %v4599_v16 }
 0x487   : > { %v4284_v25 = vpop.f32.mrf.mxu2 }
 0x488   : > { %v4285_v19 = vadd.f32 %v8500_v34, %v4284_v25 }
 0x48a   : > { %v4296_v21 = vmax.f32 %v4285_v19, 0.0 }
 0x48c   : > { %v4311_v42 = vrot.slane %v4296_v21, 7  ;;  %v4368_v9 = vrot.slane %v4296_v21, 1  ;;  %v4489_v6 = vmul.f32 %v8641_v52, %v4296_v21  ;;  %v4353_v31 = vmul.f32 %v8520_v32, %v4296_v21 }
 0x48d   : > { %v4432_v59 = vmul.f32 %v8578_v11, %v4296_v21 }
 0x48e   : > { %v4325_v7 = vsel %vm556_vm1, 0.0, %v4311_v42  ;;  %v4382_v43 = vsel %vm1015_vm3, %v4368_v9, 0.0 }
 0x48f   : > { %v4471_v30 = vmul.f32 %v8624_v60, %v4325_v7  ;;  %v4507_v39 = vmul.f32 %v8655_v13, %v4382_v43  ;;  %v4414_v26 = vmul.f32 %v8549_v61, %v4325_v7  ;;  %v4335_v22 = vmul.f32 %v8515_v8, %v4325_v7 }
 0x490   : > { %v4392_v0 = vmul.f32 %v8532_v37, %v4382_v43  ;;  %v4453_v28 = vmul.f32 %v8608_v47, %v4382_v43 }
 0x491   : > { %v4479_v50 = vadd.f32 %v4471_v30, %v4460_v46  ;;  %v4422_v58 = vadd.f32 %v4414_v26, %v4399_v29  ;;  %v4361_v51 = vadd.f32 %v4353_v31, %v4335_v22 }
 0x493   : > { %v4497_v3 = vadd.f32 %v4489_v6, %v4479_v50  ;;  %v4440_v40 = vadd.f32 %v4432_v59, %v4422_v58  ;;  %v4400_v24 = vadd.f32 %v4392_v0, %v4361_v51 }
 0x495   : > { %v4515_v10 = vadd.f32 %v4507_v39, %v4497_v3  ;;  %v4578_v15 = vpop.f32.mrf.mxu3  ;;  %v4461_v45 = vadd.f32 %v4453_v28, %v4440_v40 }
 0x496   : > { %v4579_v33 = vadd.f32 %v8836_v35, %v4578_v15 }
 0x497   : > { %v4527_v57 = vadd.f32 %v8672_v54, %v4515_v10 }
 0x498   : > { %v4600_v14 = vmax.f32 %v4579_v33, 0.0 }
 0x499   : > { %v4535_v62 = vmax.f32 %v4527_v57, 0.0 }
 0x49a   : > { %4608 = vst [vmem:[%s8841_s0 + $0x8] sm:$0xff] %v4600_v14 }
 0x49b   : > { %4589 = vmatmul.f32.gmra.mxu3 %v4535_v62 }
 0x4a7   : > { %v4287_v17 = vpop.f32.mrf.mxu2 }
 0x4a8   : > { %v4288_v49 = vadd.f32 %v8500_v34, %v4287_v17 }
 0x4aa   : > { %v4297_v38 = vmax.f32 %v4288_v49, 0.0 }
 0x4ac   : > { %v4402_v56 = vrot.slane %v4297_v38, 7  ;;  %v4442_v12 = vrot.slane %v4297_v38, 1  ;;  %v4433_v2 = vmul.f32 %v8578_v11, %v4297_v38  ;;  %v4490_v37 = vmul.f32 %v8641_v52, %v4297_v38 }
 0x4ae   : > { %v4404_v8 = vsel %vm556_vm1, 0.0, %v4402_v56  ;;  %v4444_v34 = vsel %vm1015_vm3, %v4442_v12, 0.0  ;;  %v4581_v55 = vpop.f32.mrf.mxu3 }
 0x4af   : > { %v4415_v4 = vmul.f32 %v8549_v61, %v4404_v8  ;;  %v4472_v32 = vmul.f32 %v8624_v60, %v4404_v8  ;;  %v4582_v36 = vadd.f32 %v8836_v35, %v4581_v55  ;;  %v4454_v25 = vmul.f32 %v8608_v47, %v4444_v34 }
 0x4b0   : > { %v4473_v61 = vmul.f32 %v8624_v60, %v9344_v41  ;;  %v4508_v23 = vmul.f32 %v8655_v13, %v4444_v34  ;;  %v4509_v47 = vmul.f32 %v8655_v13, %v9347_v27 }
 0x4b1   : > { %v4423_v48 = vadd.f32 %v4415_v4, %v4400_v24  ;;  %v4480_v16 = vadd.f32 %v4472_v32, %v4461_v45  ;;  %v4601_v21 = vmax.f32 %v4582_v36, 0.0 }
 0x4b3   : > { %v4441_v19 = vadd.f32 %v4433_v2, %v4423_v48  ;;  %v4498_v18 = vadd.f32 %v4490_v37, %v4480_v16  ;;  %4609 = vst [vmem:[%s8841_s0 + $0x10] sm:$0xff] %v4601_v21 }
 0x4b5   : > { %v4516_v42 = vadd.f32 %v4508_v23, %v4498_v18  ;;  %v4462_v11 = vadd.f32 %v4454_v25, %v4441_v19 }
 0x4b7   : > { %v4528_v9 = vadd.f32 %v8672_v54, %v4516_v42  ;;  %v4481_v1 = vadd.f32 %v4473_v61, %v4462_v11 }
 0x4b9   : > { %v4536_v7 = vmax.f32 %v4528_v9, 0.0  ;;  %v4499_v41 = vadd.f32 %v4491_v5, %v4481_v1 }
 0x4bb   : > { %4592 = vmatmul.f32.gmra.mxu3 %v4536_v7  ;;  %v4517_v60 = vadd.f32 %v4509_v47, %v4499_v41 }
 0x4bd   : > { %v4529_v46 = vadd.f32 %v8672_v54, %v4517_v60 }
 0x4be   : > { %v4584_v43 = vpop.f32.mrf.mxu3 }
 0x4bf   : > { %v4537_v30 = vmax.f32 %v4529_v46, 0.0  ;;  %v4585_v52 = vadd.f32 %v8836_v35, %v4584_v43 }
 0x4c1   : > { %v4602_v50 = vmax.f32 %v4585_v52, 0.0 }
 0x4c3   : > { %4595 = vmatmul.f32.gmra.mxu3 %v4537_v30  ;;  %4610 = vst [vmem:[%s8841_s0 + $0x18] sm:$0xff] %v4602_v50 }
 0x4f1   : > { %v4587_v6 = vpop.f32.mrf.mxu3 }
 0x4f2   : > { %v4588_v27 = vadd.f32 %v8836_v35, %v4587_v6 }
 0x4f4   : > { %v4603_v13 = vmax.f32 %v4588_v27, 0.0 }
 0x4f6   : > { %4611 = vst [vmem:[%s8841_s0 + $0x20] sm:$0xff] %v4603_v13 }
 0x51e   : > { %v4590_v3 = vpop.f32.mrf.mxu3 }
 0x51f   : > { %v4591_v39 = vadd.f32 %v8836_v35, %v4590_v3 }
 0x521   : > { %v4604_v54 = vmax.f32 %v4591_v39, 0.0 }
 0x523   : > { %4612 = vst [vmem:[%s8841_s0 + $0x28] sm:$0xff] %v4604_v54 }
 0x53e   : > { %v4593_v10 = vpop.f32.mrf.mxu3 }
 0x53f   : > { %v4594_v15 = vadd.f32 %v8836_v35, %v4593_v10 }
 0x541   : > { %v4605_v57 = vmax.f32 %v4594_v15, 0.0 }
 0x543   : > { %4613 = vst [vmem:[%s8841_s0 + $0x30] sm:$0xff] %v4605_v57 }
 0x546   : > { %v4596_v33 = vpop.f32.mrf.mxu3 }
 0x547   : > { %v4597_v62 = vadd.f32 %v8836_v35, %v4596_v33 }
 0x549   : > { %v4606_v14 = vmax.f32 %v4597_v62, 0.0 }
 0x54b   : > { %4614 = vst [vmem:[%s8841_s0 + $0x38] sm:$0xff] %v4606_v14 }
 0x54c   : > { %5231 = shalt.err (!%p5228_p3)
}
 0x54d   : > { %s5269_s1 = smov 128   ;;  %s5270_s0 = smov 8  }
 0x54e   : > { %5068 = dma.vmem_to_hbm [thread:$0]  (%p5389_p5), %s4629_s30, 1024, %s4631_s17, %s4616_s2, %s5269_s1, %s5269_s1, %s5270_s0  }
 0x54f PF: > { %p5074_p4 = scmp.ge.s32.totalorder %s5266_s21, 2  ;;  %s4645_s25 = sand.u32 1, %s5254_s18  }
 0x550   : > { %s4646_s4 = scalar_lea.sflag [#allocation3], %s4645_s25 }
 0x551   : > { %p5071_p7 = pnand %p5074_p4, %p5393_p6 }
 0x553   : > { %p5072_p8 = pneg %p5071_p7 }
 0x555   : > { %5249 = dma.done.wait (%p5072_p8), %s4646_s4, 1024  }
 0x556   : > { %5251 = vsyncadd (%p5072_p8), %s4646_s4, 4294966272  ;;  %p25_p9 = scmp.ge.s32.totalorder %s5376_s24, 4   ;;  %s9349_s18 = smov %s5258_s19 }
 0x557   : > { %s9350_s19 = smov %s5262_s20  ;;  %s9351_s20 = smov %s5387_s27 }
 0x558   : > { %s9352_s21 = smov %s5376_s24  ;;  %27 = sbr.rel (!%p25_p9) target bundleno = 9 (0x9), region = 129 }
 0x55d   :  { %4652 = vsyncpa [#allocation3], 1 }
 0x55e   :  { %4654 = vsyncpa [#allocation3 + $0x1], 1 }

</bundles_post_ra>
